<compile_context>
chip_gen: v7x
topology: tpu7x:2x2x1
jax: 0.10.0
libtpu: 0.0.40
codegen_flags: <defaults>
</compile_context>

<pallas_src>
import functools

import numpy as np
import jax
import jax.numpy as jnp
from jax.experimental import pallas as pl
from jax.experimental.pallas import tpu as pltpu


# ---------------------------------------------------------------------------
# Helpers
# ---------------------------------------------------------------------------
def _ceil_to(v, m):
    return -(-v // m) * m


def _make_tap_masks_np(hh, ww):
    """(9, H*W) float32 0/1 validity masks for the 3x3 taps (SAME zero pad)."""
    lane = np.arange(hh * ww)
    yy, xx = lane // ww, lane % ww
    masks = []
    for ky in range(3):
        for kx in range(3):
            dy, dx = ky - 1, kx - 1
            m = (yy + dy >= 0) & (yy + dy < hh) & (xx + dx >= 0) & (xx + dx < ww)
            masks.append(m)
    return np.stack(masks).astype(np.float32)


def _im2col_patches(src, masks, ww, out_dtype):
    """src: (C, S) f32, lanes = flattened (H, W) of ONE image; masks: (9, S).

    Returns the tap-major (9*C, S) patch matrix in `out_dtype`: row t*C + c is
    channel c spatially shifted by tap t (dy = t//3 - 1, dx = t%3 - 1), zero
    outside the image.  Shifts are static XLU lane rotations; masking is a VPU
    multiply; each tap is cast to bf16 immediately so the big concatenated
    matrix is half-width.
    """
    s = src.shape[1]
    taps = []
    for t in range(9):
        dy, dx = t // 3 - 1, t % 3 - 1
        if dy == 0 and dx == 0:
            taps.append(src.astype(out_dtype))
            continue
        off = dy * ww + dx
        shifted = pltpu.roll(src, shift=(-off) % s, axis=1)
        taps.append((shifted * masks[t:t + 1]).astype(out_dtype))
    return jnp.concatenate(taps, axis=0)


# ---------------------------------------------------------------------------
# Kernel
# ---------------------------------------------------------------------------
def lstm_prior_kernel(x_ref, init_ref, wg_ref, wh_ref, mask_ref,
                      heads_ref, state_ref, state_sc,
                      *, ch, cin, ww, head_pad):
    t = pl.program_id(1)
    s_blk = x_ref.shape[-1]
    masks = mask_ref[...]                                     # (9, S) f32 0/1

    # ---- recurrent state: VMEM-resident, (re)initialized at t == 0 ----------
    @pl.when(t == 0)
    def _():
        state_sc[...] = init_ref[...]

    st = state_sc[...]
    h_prev, c_prev = st[:ch], st[ch:]

    # ---- ConvLSTM gates: ONE bf16 matmul over [x ; ones ; h_prev] patches ---
    # (the constant ones channel inside x carries the gate-bias column of wg).
    xh = jnp.concatenate([x_ref[...], h_prev], axis=0)        # (cin_p+ch, S) f32
    xh_patch = _im2col_patches(xh, masks, ww, jnp.bfloat16)   # (9*(cin_p+ch), S)
    gates = jnp.dot(wg_ref[...], xh_patch,
                    preferred_element_type=jnp.float32)       # (4*ch, S) f32

    i_g = jax.nn.sigmoid(gates[0 * ch:1 * ch])
    f_g = jax.nn.sigmoid(gates[1 * ch:2 * ch])
    o_g = jax.nn.sigmoid(gates[2 * ch:3 * ch])
    g_g = jnp.tanh(gates[3 * ch:4 * ch])

    c_new = f_g * c_prev + i_g * g_g
    h_new = o_g * jnp.tanh(c_new)
    state_sc[...] = jnp.concatenate([h_new, c_new], axis=0)

    # ---- loc/scale heads: ONE bf16 matmul over [h_new ; ones] patches -------
    # (an appended ones channel carries the [b_loc; b_scale] column of wh).
    row = jax.lax.broadcasted_iota(jnp.int32, (head_pad, s_blk), 0)
    ones_pad = jnp.where(row == 0, 1.0, 0.0)                  # (head_pad, S) f32
    hn = jnp.concatenate([h_new, ones_pad], axis=0)           # (ch+head_pad, S)
    hn_patch = _im2col_patches(hn, masks, ww, jnp.bfloat16)   # (9*(ch+hp), S)
    heads = jnp.dot(wh_ref[...], hn_patch,
                    preferred_element_type=jnp.float32)       # (2*cin, S) f32

    # loc rows [0, cin) verbatim, scale rows get exp(); full-tile select keeps
    # the write a single unmasked (8, S) store.
    is_loc = jax.lax.broadcasted_iota(jnp.int32, heads.shape, 0) < cin
    heads_ref[...] = jnp.where(is_loc, heads, jnp.exp(heads))

    # ---- final recurrent state written once, at the last timestep -----------
    @pl.when(t == pl.num_programs(1) - 1)
    def _():
        state_ref[...] = state_sc[...]


# ---------------------------------------------------------------------------
# Wrapper (NCHW sequences in / NCHW out, semantics = T applications of the
# PyTorch module's forward with the recurrent state threaded through)
# ---------------------------------------------------------------------------
def lstm_prior_sequence(x_seq, params, hidden=None):
    """x_seq: (T, N, C_in, H, W).  Returns (loc_seq, scale_seq, (h_T, c_T))."""
    w_gates, b_gates, w_loc, b_loc, w_scale, b_scale = params
    tt, n, cin, hh, ww = x_seq.shape
    ch = w_gates.shape[0] // 4
    assert w_gates.shape[1] == cin + ch
    assert ch % 8 == 0 and (hh * ww) % 128 == 0

    s_blk = hh * ww            # lanes per block: one whole image
    s_tot = n * s_blk

    # pad x channels (incl. the ones/bias channel) so every bf16 im2col tap is
    # a whole number of packed (16,128) vregs: (cin_p + ch) % 16 == 0.
    cin_p = _ceil_to(cin + 1, 8)
    while (cin_p + ch) % 16:
        cin_p += 8
    head_pad = 8
    while (ch + head_pad) % 16:
        head_pad += 8

    # ---- one-time layout plumbing (pure XLA, outside the kernel) ------------
    x_t = x_seq.astype(jnp.float32).transpose(0, 2, 1, 3, 4).reshape(tt, cin, s_tot)
    x_t = jnp.concatenate(
        [x_t,
         jnp.ones((tt, 1, s_tot), jnp.float32),                     # bias carrier
         jnp.zeros((tt, cin_p - cin - 1, s_tot), jnp.float32)], axis=1)

    def to_cs(a, c):                                                # NCHW -> (C,S)
        return a.astype(jnp.float32).transpose(1, 0, 2, 3).reshape(c, s_tot)

    if hidden is None:
        init = jnp.zeros((2 * ch, s_tot), jnp.float32)
    else:
        init = jnp.concatenate([to_cs(hidden[0], ch), to_cs(hidden[1], ch)], axis=0)

    # Fused gate weight (4*ch, 9*(cin_p+ch)), tap-major / channel-minor; the
    # ones channel's centre-tap column carries b_gates (bias folded into MXU).
    w_x = jnp.pad(w_gates[:, :cin].astype(jnp.float32),
                  ((0, 0), (0, cin_p - cin), (0, 0), (0, 0)))
    w_x = w_x.at[:, cin, 1, 1].set(b_gates)
    w_comb = jnp.concatenate([w_x, w_gates[:, cin:].astype(jnp.float32)], axis=1)
    wg = (w_comb.transpose(0, 2, 3, 1)
          .reshape(4 * ch, 9 * (cin_p + ch)).astype(jnp.bfloat16))

    # Fused head weight (2*cin, 9*(ch+head_pad)): loc rows then scale rows; the
    # appended ones channel's centre tap carries [b_loc; b_scale].
    w_head = jnp.concatenate([w_loc, w_scale], axis=0).astype(jnp.float32)
    w_head = jnp.pad(w_head, ((0, 0), (0, head_pad), (0, 0), (0, 0)))
    w_head = w_head.at[:, ch, 1, 1].set(jnp.concatenate([b_loc, b_scale]))
    wh = (w_head.transpose(0, 2, 3, 1)
          .reshape(2 * cin, 9 * (ch + head_pad)).astype(jnp.bfloat16))

    mask_stack = jnp.asarray(_make_tap_masks_np(hh, ww))            # (9, s_blk)

    grid = (n, tt)   # (batch image blocks [parallel/megacore], time [recurrent])
    heads_t, state_t = pl.pallas_call(
        functools.partial(lstm_prior_kernel,
                          ch=ch, cin=cin, ww=ww, head_pad=head_pad),
        grid=grid,
        in_specs=[
            pl.BlockSpec((None, cin_p, s_blk), lambda b, t: (t, 0, b)),   # x_t
            pl.BlockSpec((2 * ch, s_blk), lambda b, t: (0, b)),           # init h,c
            pl.BlockSpec((4 * ch, 9 * (cin_p + ch)), lambda b, t: (0, 0)),  # wg
            pl.BlockSpec((2 * cin, 9 * (ch + head_pad)), lambda b, t: (0, 0)),  # wh
            pl.BlockSpec((9, s_blk), lambda b, t: (0, 0)),                # tap masks
        ],
        out_specs=(
            pl.BlockSpec((None, 2 * cin, s_blk), lambda b, t: (t, 0, b)),  # loc|scale
            pl.BlockSpec((2 * ch, s_blk), lambda b, t: (0, b)),            # h|c final
        ),
        out_shape=(
            jax.ShapeDtypeStruct((tt, 2 * cin, s_tot), jnp.float32),
            jax.ShapeDtypeStruct((2 * ch, s_tot), jnp.float32),
        ),
        scratch_shapes=[pltpu.VMEM((2 * ch, s_blk), jnp.float32)],   # resident h|c
        compiler_params=pltpu.CompilerParams(
            dimension_semantics=("parallel", "arbitrary")),
    )(x_t, init, wg, wh, mask_stack)

    def seq_cs_to_nchw(a, c):                                   # (T,C,S)->(T,N,C,H,W)
        return a.reshape(tt, c, n, hh, ww).transpose(0, 2, 1, 3, 4)

    loc = seq_cs_to_nchw(heads_t[:, :cin], cin)
    scale = seq_cs_to_nchw(heads_t[:, cin:], cin)
    h_t = state_t[:ch].reshape(ch, n, hh, ww).transpose(1, 0, 2, 3)
    c_t = state_t[ch:].reshape(ch, n, hh, ww).transpose(1, 0, 2, 3)
    return loc, scale, (h_t, c_t)


def lstm_prior_forward(x, params, hidden=None):
    """Single-step forward matching LSTMPrior.forward: x is (N, C_in, H, W)."""
    loc, scale, state = lstm_prior_sequence(x[None], params, hidden)
    return loc[0], scale[0], state


# ---------------------------------------------------------------------------
# Pure-JAX reference (NCHW, mirrors the PyTorch module, f32 HIGHEST precision)
# ---------------------------------------------------------------------------
def ref_step(x, params, hidden=None):
    w_gates, b_gates, w_loc, b_loc, w_scale, b_scale = params
    n, cin, hh, ww = x.shape
    ch = w_gates.shape[0] // 4
    if hidden is None:
        h_prev = jnp.zeros((n, ch, hh, ww), jnp.float32)
        c_prev = jnp.zeros((n, ch, hh, ww), jnp.float32)
    else:
        h_prev, c_prev = hidden

    def conv(a, w, b):
        o = jax.lax.conv_general_dilated(
            a, w, (1, 1), "SAME",
            dimension_numbers=("NCHW", "OIHW", "NCHW"),
            precision=jax.lax.Precision.HIGHEST)
        return o + b.reshape(1, -1, 1, 1)

    g = conv(jnp.concatenate([x, h_prev], axis=1), w_gates, b_gates)
    i_g = jax.nn.sigmoid(g[:, 0 * ch:1 * ch])
    f_g = jax.nn.sigmoid(g[:, 1 * ch:2 * ch])
    o_g = jax.nn.sigmoid(g[:, 2 * ch:3 * ch])
    g_g = jnp.tanh(g[:, 3 * ch:4 * ch])
    c_new = f_g * c_prev + i_g * g_g
    h_new = o_g * jnp.tanh(c_new)
    loc = conv(h_new, w_loc, b_loc)
    scale = jnp.exp(conv(h_new, w_scale, b_scale))
    return loc, scale, (h_new, c_new)


def ref_sequence(x_seq, params, hidden=None):
    locs, scales = [], []
    for t in range(x_seq.shape[0]):
        loc, scale, hidden = ref_step(x_seq[t], params, hidden)
        locs.append(loc)
        scales.append(scale)
    return jnp.stack(locs), jnp.stack(scales), hidden


# ---------------------------------------------------------------------------
# Main
# ---------------------------------------------------------------------------
if __name__ == "__main__":
    N, H, W = 2, 16, 16        # two image blocks of 256 lanes each
    FILTER_SIZE = 4            # filter_size (C_in)
    RNN_HIDDEN = 32            # rnn_hidden_size
    T = 8                      # autoregressive steps

    key = jax.random.PRNGKey(0)
    ks = jax.random.split(key, 9)

    def init_p(k, shape, scale=0.05):
        return scale * jax.random.normal(k, shape, jnp.float32)

    w_gates = init_p(ks[0], (4 * RNN_HIDDEN, FILTER_SIZE + RNN_HIDDEN, 3, 3))
    b_gates = init_p(ks[1], (4 * RNN_HIDDEN,), 0.02)
    w_loc = init_p(ks[2], (FILTER_SIZE, RNN_HIDDEN, 3, 3))
    b_loc = init_p(ks[3], (FILTER_SIZE,), 0.02)
    w_scale = init_p(ks[4], (FILTER_SIZE, RNN_HIDDEN, 3, 3))
    b_scale = init_p(ks[5], (FILTER_SIZE,), 0.02)
    params = (w_gates, b_gates, w_loc, b_loc, w_scale, b_scale)

    x_seq = jax.random.normal(ks[6], (T, N, FILTER_SIZE, H, W), jnp.float32)
    h0 = 0.5 * jax.random.normal(ks[7], (N, RNN_HIDDEN, H, W), jnp.float32)
    c0 = 0.5 * jax.random.normal(ks[8], (N, RNN_HIDDEN, H, W), jnp.float32)

    # bf16 MXU operands (per perf review) -> bf16-level tolerances.
    RTOL = ATOL = 2e-2

    for hidden in (None, (h0, c0)):
        out = jax.block_until_ready(lstm_prior_sequence(x_seq, params, hidden))
        ref = jax.block_until_ready(ref_sequence(x_seq, params, hidden))
        pairs = (("loc", out[0], ref[0]), ("scale", out[1], ref[1]),
                 ("h_T", out[2][0], ref[2][0]), ("c_T", out[2][1], ref[2][1]))
        for name, a, b in pairs:
            np.testing.assert_allclose(
                np.asarray(a), np.asarray(b), rtol=RTOL, atol=ATOL,
                err_msg=f"mismatch in {name} (hidden={'set' if hidden else 'None'})")

    # Single-step call matching the module's forward() signature (T == 1).
    loc1, scale1, (h1, c1) = jax.block_until_ready(
        lstm_prior_forward(x_seq[0], params, (h0, c0)))
    rloc, rscale, (rh, rc) = jax.block_until_ready(
        ref_step(x_seq[0], params, (h0, c0)))
    for name, a, b in (("loc", loc1, rloc), ("scale", scale1, rscale),
                       ("h", h1, rh), ("c", c1, rc)):
        np.testing.assert_allclose(np.asarray(a), np.asarray(b),
                                   rtol=RTOL, atol=ATOL,
                                   err_msg=f"single-step mismatch in {name}")

    print("KERNEL_OK")
</pallas_src>

<mosaic_0001>
module attributes {stable_mosaic.version = 11 : i64} {
  func.func @lstm_prior_kernel(%arg0: i32, %arg1: i32, %arg2: memref<1x16x256xf32, #tpu.memory_space<vmem>>, %arg3: memref<64x256xf32, #tpu.memory_space<vmem>>, %arg4: memref<128x432xbf16, #tpu.memory_space<vmem>>, %arg5: memref<8x432xbf16, #tpu.memory_space<vmem>>, %arg6: memref<9x256xf32, #tpu.memory_space<vmem>>, %arg7: memref<1x8x256xf32, #tpu.memory_space<vmem>>, %arg8: memref<64x256xf32, #tpu.memory_space<vmem>>, %arg9: memref<64x256xf32, #tpu.memory_space<vmem>>) attributes {dimension_semantics = [#tpu.dimension_semantics<parallel>, #tpu.dimension_semantics<arbitrary>], iteration_bounds = array<i64: 2, 8>, scalar_prefetch = 0 : i64, scratch_operands = 1 : i64, tpu.core_type = #tpu.core_type<tc>, window_params = [{transform_indices = @transform_0, window_bounds = array<i64: 1, 16, 256>}, {transform_indices = @transform_1, window_bounds = array<i64: 64, 256>}, {pipeline_mode = #tpu.pipeline_mode<synchronous>, transform_indices = @transform_2, window_bounds = array<i64: 128, 432>}, {pipeline_mode = #tpu.pipeline_mode<synchronous>, transform_indices = @transform_3, window_bounds = array<i64: 8, 432>}, {pipeline_mode = #tpu.pipeline_mode<synchronous>, transform_indices = @transform_4, window_bounds = array<i64: 9, 256>}, {transform_indices = @transform_5, window_bounds = array<i64: 1, 8, 256>}, {transform_indices = @transform_6, window_bounds = array<i64: 64, 256>}]} {
    %c0 = arith.constant 0 : index
    %c0_0 = arith.constant 0 : index
    %0 = vector.load %arg6[%c0, %c0_0] : memref<9x256xf32, #tpu.memory_space<vmem>>, vector<9x256xf32>
    %c0_i32 = arith.constant 0 : i32
    %1 = arith.cmpi eq, %arg1, %c0_i32 : i32
    %2 = arith.extui %1 : i1 to i32
    %c0_i32_1 = arith.constant 0 : i32
    %3 = arith.cmpi ne, %2, %c0_i32_1 : i32
    scf.if %3 {
      %c0_32 = arith.constant 0 : index
      %c0_33 = arith.constant 0 : index
      %143 = vector.load %arg3[%c0_32, %c0_33] : memref<64x256xf32, #tpu.memory_space<vmem>>, vector<64x256xf32>
      %c0_34 = arith.constant 0 : index
      %c0_35 = arith.constant 0 : index
      %144 = vector.load %arg9[%c0_34, %c0_35] : memref<64x256xf32, #tpu.memory_space<vmem>>, vector<64x256xf32>
      tpu.vector_store %arg9[%c0_34, %c0_35], %143 {strides = array<i32>} : memref<64x256xf32, #tpu.memory_space<vmem>>, vector<64x256xf32>,
    } else {
    }
    %c0_2 = arith.constant 0 : index
    %c0_3 = arith.constant 0 : index
    %4 = vector.load %arg9[%c0_2, %c0_3] : memref<64x256xf32, #tpu.memory_space<vmem>>, vector<64x256xf32>
    %5 = vector.extract_strided_slice %4 {offsets = [0, 0], sizes = [32, 256], strides = [1, 1]} : vector<64x256xf32> to vector<32x256xf32>
    %6 = vector.extract_strided_slice %4 {offsets = [32, 0], sizes = [32, 256], strides = [1, 1]} : vector<64x256xf32> to vector<32x256xf32>
    %c0_4 = arith.constant 0 : index
    %c0_5 = arith.constant 0 : index
    %c0_6 = arith.constant 0 : index
    %7 = vector.load %arg2[%c0_4, %c0_5, %c0_6] : memref<1x16x256xf32, #tpu.memory_space<vmem>>, vector<1x16x256xf32>
    %8 = vector.shape_cast %7 : vector<1x16x256xf32> to vector<16x256xf32>
    %9 = tpu.concatenate %8, %5 in 0 : vector<16x256xf32>, vector<32x256xf32> -> vector<48x256xf32>
    %c17_i32 = arith.constant 17 : i32
    %10 = tpu.dynamic_rotate %9 by %c17_i32 dim 1 : vector<48x256xf32>, i32 -> vector<48x256xf32>
    %11 = vector.extract_strided_slice %0 {offsets = [0, 0], sizes = [1, 256], strides = [1, 1]} : vector<9x256xf32> to vector<1x256xf32>
    %12 = vector.broadcast %11 : vector<1x256xf32> to vector<48x256xf32>
    %13 = arith.mulf %10, %12 : vector<48x256xf32>
    %14 = arith.truncf %13 : vector<48x256xf32> to vector<48x256xbf16>
    %c16_i32 = arith.constant 16 : i32
    %15 = tpu.dynamic_rotate %9 by %c16_i32 dim 1 : vector<48x256xf32>, i32 -> vector<48x256xf32>
    %16 = vector.extract_strided_slice %0 {offsets = [1, 0], sizes = [1, 256], strides = [1, 1]} : vector<9x256xf32> to vector<1x256xf32>
    %17 = vector.broadcast %16 : vector<1x256xf32> to vector<48x256xf32>
    %18 = arith.mulf %15, %17 : vector<48x256xf32>
    %19 = arith.truncf %18 : vector<48x256xf32> to vector<48x256xbf16>
    %c15_i32 = arith.constant 15 : i32
    %20 = tpu.dynamic_rotate %9 by %c15_i32 dim 1 : vector<48x256xf32>, i32 -> vector<48x256xf32>
    %21 = vector.extract_strided_slice %0 {offsets = [2, 0], sizes = [1, 256], strides = [1, 1]} : vector<9x256xf32> to vector<1x256xf32>
    %22 = vector.broadcast %21 : vector<1x256xf32> to vector<48x256xf32>
    %23 = arith.mulf %20, %22 : vector<48x256xf32>
    %24 = arith.truncf %23 : vector<48x256xf32> to vector<48x256xbf16>
    %c1_i32 = arith.constant 1 : i32
    %25 = tpu.dynamic_rotate %9 by %c1_i32 dim 1 : vector<48x256xf32>, i32 -> vector<48x256xf32>
    %26 = vector.extract_strided_slice %0 {offsets = [3, 0], sizes = [1, 256], strides = [1, 1]} : vector<9x256xf32> to vector<1x256xf32>
    %27 = vector.broadcast %26 : vector<1x256xf32> to vector<48x256xf32>
    %28 = arith.mulf %25, %27 : vector<48x256xf32>
    %29 = arith.truncf %28 : vector<48x256xf32> to vector<48x256xbf16>
    %30 = arith.truncf %9 : vector<48x256xf32> to vector<48x256xbf16>
    %c255_i32 = arith.constant 255 : i32
    %31 = tpu.dynamic_rotate %9 by %c255_i32 dim 1 : vector<48x256xf32>, i32 -> vector<48x256xf32>
    %32 = vector.extract_strided_slice %0 {offsets = [5, 0], sizes = [1, 256], strides = [1, 1]} : vector<9x256xf32> to vector<1x256xf32>
    %33 = vector.broadcast %32 : vector<1x256xf32> to vector<48x256xf32>
    %34 = arith.mulf %31, %33 : vector<48x256xf32>
    %35 = arith.truncf %34 : vector<48x256xf32> to vector<48x256xbf16>
    %c241_i32 = arith.constant 241 : i32
    %36 = tpu.dynamic_rotate %9 by %c241_i32 dim 1 : vector<48x256xf32>, i32 -> vector<48x256xf32>
    %37 = vector.extract_strided_slice %0 {offsets = [6, 0], sizes = [1, 256], strides = [1, 1]} : vector<9x256xf32> to vector<1x256xf32>
    %38 = vector.broadcast %37 : vector<1x256xf32> to vector<48x256xf32>
    %39 = arith.mulf %36, %38 : vector<48x256xf32>
    %40 = arith.truncf %39 : vector<48x256xf32> to vector<48x256xbf16>
    %c240_i32 = arith.constant 240 : i32
    %41 = tpu.dynamic_rotate %9 by %c240_i32 dim 1 : vector<48x256xf32>, i32 -> vector<48x256xf32>
    %42 = vector.extract_strided_slice %0 {offsets = [7, 0], sizes = [1, 256], strides = [1, 1]} : vector<9x256xf32> to vector<1x256xf32>
    %43 = vector.broadcast %42 : vector<1x256xf32> to vector<48x256xf32>
    %44 = arith.mulf %41, %43 : vector<48x256xf32>
    %45 = arith.truncf %44 : vector<48x256xf32> to vector<48x256xbf16>
    %c239_i32 = arith.constant 239 : i32
    %46 = tpu.dynamic_rotate %9 by %c239_i32 dim 1 : vector<48x256xf32>, i32 -> vector<48x256xf32>
    %47 = vector.extract_strided_slice %0 {offsets = [8, 0], sizes = [1, 256], strides = [1, 1]} : vector<9x256xf32> to vector<1x256xf32>
    %48 = vector.broadcast %47 : vector<1x256xf32> to vector<48x256xf32>
    %49 = arith.mulf %46, %48 : vector<48x256xf32>
    %50 = arith.truncf %49 : vector<48x256xf32> to vector<48x256xbf16>
    %51 = tpu.concatenate %14, %19, %24, %29, %30, %35, %40, %45, %50 in 0 : vector<48x256xbf16>, vector<48x256xbf16>, vector<48x256xbf16>, vector<48x256xbf16>, vector<48x256xbf16>, vector<48x256xbf16>, vector<48x256xbf16>, vector<48x256xbf16>, vector<48x256xbf16> -> vector<432x256xbf16>
    %c0_7 = arith.constant 0 : index
    %c0_8 = arith.constant 0 : index
    %52 = vector.load %arg4[%c0_7, %c0_8] : memref<128x432xbf16, #tpu.memory_space<vmem>>, vector<128x432xbf16>
    %cst = arith.constant dense<0.000000e+00> : vector<128x256xf32>
    %53 = tpu.matmul %52, %51, %cst {dimension_numbers = #tpu.dot_dimension_numbers<[1], [0], [0], [1], [0, 0, 1, 1], [], []>} : vector<128x432xbf16>, vector<432x256xbf16>, vector<128x256xf32> -> vector<128x256xf32>
    %54 = vector.extract_strided_slice %53 {offsets = [0, 0], sizes = [32, 256], strides = [1, 1]} : vector<128x256xf32> to vector<32x256xf32>
    %55 = arith.negf %54 : vector<32x256xf32>
    %56 = math.exp %55 : vector<32x256xf32>
    %cst_9 = arith.constant 1.000000e+00 : f32
    %57 = vector.broadcast %cst_9 : f32 to vector<32x256xf32>
    %58 = arith.addf %57, %56 : vector<32x256xf32>
    %59 = arith.divf %57, %58 : vector<32x256xf32>
    %60 = vector.extract_strided_slice %53 {offsets = [32, 0], sizes = [32, 256], strides = [1, 1]} : vector<128x256xf32> to vector<32x256xf32>
    %61 = arith.negf %60 : vector<32x256xf32>
    %62 = math.exp %61 : vector<32x256xf32>
    %cst_10 = arith.constant 1.000000e+00 : f32
    %63 = vector.broadcast %cst_10 : f32 to vector<32x256xf32>
    %64 = arith.addf %63, %62 : vector<32x256xf32>
    %65 = arith.divf %63, %64 : vector<32x256xf32>
    %66 = vector.extract_strided_slice %53 {offsets = [64, 0], sizes = [32, 256], strides = [1, 1]} : vector<128x256xf32> to vector<32x256xf32>
    %67 = arith.negf %66 : vector<32x256xf32>
    %68 = math.exp %67 : vector<32x256xf32>
    %cst_11 = arith.constant 1.000000e+00 : f32
    %69 = vector.broadcast %cst_11 : f32 to vector<32x256xf32>
    %70 = arith.addf %69, %68 : vector<32x256xf32>
    %71 = arith.divf %69, %70 : vector<32x256xf32>
    %72 = vector.extract_strided_slice %53 {offsets = [96, 0], sizes = [32, 256], strides = [1, 1]} : vector<128x256xf32> to vector<32x256xf32>
    %73 = math.tanh %72 : vector<32x256xf32>
    %74 = arith.mulf %65, %6 : vector<32x256xf32>
    %75 = arith.mulf %59, %73 : vector<32x256xf32>
    %76 = arith.addf %74, %75 : vector<32x256xf32>
    %77 = math.tanh %76 : vector<32x256xf32>
    %78 = arith.mulf %71, %77 : vector<32x256xf32>
    %79 = tpu.concatenate %78, %76 in 0 : vector<32x256xf32>, vector<32x256xf32> -> vector<64x256xf32>
    %c0_12 = arith.constant 0 : index
    %c0_13 = arith.constant 0 : index
    %80 = vector.load %arg9[%c0_12, %c0_13] : memref<64x256xf32, #tpu.memory_space<vmem>>, vector<64x256xf32>
    tpu.vector_store %arg9[%c0_12, %c0_13], %79 {strides = array<i32>} : memref<64x256xf32, #tpu.memory_space<vmem>>, vector<64x256xf32>,
    %81 = tpu.iota {dimensions = array<i32: 0>} : vector<16x256xi32>
    %c0_i32_14 = arith.constant 0 : i32
    %82 = vector.broadcast %c0_i32_14 : i32 to vector<16x256xi32>
    %83 = arith.cmpi eq, %81, %82 : vector<16x256xi32>
    %cst_15 = arith.constant 1.000000e+00 : f32
    %cst_16 = arith.constant 0.000000e+00 : f32
    %84 = vector.broadcast %cst_15 : f32 to vector<16x256xf32>
    %85 = vector.broadcast %cst_16 : f32 to vector<16x256xf32>
    %86 = arith.select %83, %84, %85 : vector<16x256xi1>, vector<16x256xf32>
    %87 = tpu.concatenate %78, %86 in 0 : vector<32x256xf32>, vector<16x256xf32> -> vector<48x256xf32>
    %c17_i32_17 = arith.constant 17 : i32
    %88 = tpu.dynamic_rotate %87 by %c17_i32_17 dim 1 : vector<48x256xf32>, i32 -> vector<48x256xf32>
    %89 = vector.extract_strided_slice %0 {offsets = [0, 0], sizes = [1, 256], strides = [1, 1]} : vector<9x256xf32> to vector<1x256xf32>
    %90 = vector.broadcast %89 : vector<1x256xf32> to vector<48x256xf32>
    %91 = arith.mulf %88, %90 : vector<48x256xf32>
    %92 = arith.truncf %91 : vector<48x256xf32> to vector<48x256xbf16>
    %c16_i32_18 = arith.constant 16 : i32
    %93 = tpu.dynamic_rotate %87 by %c16_i32_18 dim 1 : vector<48x256xf32>, i32 -> vector<48x256xf32>
    %94 = vector.extract_strided_slice %0 {offsets = [1, 0], sizes = [1, 256], strides = [1, 1]} : vector<9x256xf32> to vector<1x256xf32>
    %95 = vector.broadcast %94 : vector<1x256xf32> to vector<48x256xf32>
    %96 = arith.mulf %93, %95 : vector<48x256xf32>
    %97 = arith.truncf %96 : vector<48x256xf32> to vector<48x256xbf16>
    %c15_i32_19 = arith.constant 15 : i32
    %98 = tpu.dynamic_rotate %87 by %c15_i32_19 dim 1 : vector<48x256xf32>, i32 -> vector<48x256xf32>
    %99 = vector.extract_strided_slice %0 {offsets = [2, 0], sizes = [1, 256], strides = [1, 1]} : vector<9x256xf32> to vector<1x256xf32>
    %100 = vector.broadcast %99 : vector<1x256xf32> to vector<48x256xf32>
    %101 = arith.mulf %98, %100 : vector<48x256xf32>
    %102 = arith.truncf %101 : vector<48x256xf32> to vector<48x256xbf16>
    %c1_i32_20 = arith.constant 1 : i32
    %103 = tpu.dynamic_rotate %87 by %c1_i32_20 dim 1 : vector<48x256xf32>, i32 -> vector<48x256xf32>
    %104 = vector.extract_strided_slice %0 {offsets = [3, 0], sizes = [1, 256], strides = [1, 1]} : vector<9x256xf32> to vector<1x256xf32>
    %105 = vector.broadcast %104 : vector<1x256xf32> to vector<48x256xf32>
    %106 = arith.mulf %103, %105 : vector<48x256xf32>
    %107 = arith.truncf %106 : vector<48x256xf32> to vector<48x256xbf16>
    %108 = arith.truncf %87 : vector<48x256xf32> to vector<48x256xbf16>
    %c255_i32_21 = arith.constant 255 : i32
    %109 = tpu.dynamic_rotate %87 by %c255_i32_21 dim 1 : vector<48x256xf32>, i32 -> vector<48x256xf32>
    %110 = vector.extract_strided_slice %0 {offsets = [5, 0], sizes = [1, 256], strides = [1, 1]} : vector<9x256xf32> to vector<1x256xf32>
    %111 = vector.broadcast %110 : vector<1x256xf32> to vector<48x256xf32>
    %112 = arith.mulf %109, %111 : vector<48x256xf32>
    %113 = arith.truncf %112 : vector<48x256xf32> to vector<48x256xbf16>
    %c241_i32_22 = arith.constant 241 : i32
    %114 = tpu.dynamic_rotate %87 by %c241_i32_22 dim 1 : vector<48x256xf32>, i32 -> vector<48x256xf32>
    %115 = vector.extract_strided_slice %0 {offsets = [6, 0], sizes = [1, 256], strides = [1, 1]} : vector<9x256xf32> to vector<1x256xf32>
    %116 = vector.broadcast %115 : vector<1x256xf32> to vector<48x256xf32>
    %117 = arith.mulf %114, %116 : vector<48x256xf32>
    %118 = arith.truncf %117 : vector<48x256xf32> to vector<48x256xbf16>
    %c240_i32_23 = arith.constant 240 : i32
    %119 = tpu.dynamic_rotate %87 by %c240_i32_23 dim 1 : vector<48x256xf32>, i32 -> vector<48x256xf32>
    %120 = vector.extract_strided_slice %0 {offsets = [7, 0], sizes = [1, 256], strides = [1, 1]} : vector<9x256xf32> to vector<1x256xf32>
    %121 = vector.broadcast %120 : vector<1x256xf32> to vector<48x256xf32>
    %122 = arith.mulf %119, %121 : vector<48x256xf32>
    %123 = arith.truncf %122 : vector<48x256xf32> to vector<48x256xbf16>
    %c239_i32_24 = arith.constant 239 : i32
    %124 = tpu.dynamic_rotate %87 by %c239_i32_24 dim 1 : vector<48x256xf32>, i32 -> vector<48x256xf32>
    %125 = vector.extract_strided_slice %0 {offsets = [8, 0], sizes = [1, 256], strides = [1, 1]} : vector<9x256xf32> to vector<1x256xf32>
    %126 = vector.broadcast %125 : vector<1x256xf32> to vector<48x256xf32>
    %127 = arith.mulf %124, %126 : vector<48x256xf32>
    %128 = arith.truncf %127 : vector<48x256xf32> to vector<48x256xbf16>
    %129 = tpu.concatenate %92, %97, %102, %107, %108, %113, %118, %123, %128 in 0 : vector<48x256xbf16>, vector<48x256xbf16>, vector<48x256xbf16>, vector<48x256xbf16>, vector<48x256xbf16>, vector<48x256xbf16>, vector<48x256xbf16>, vector<48x256xbf16>, vector<48x256xbf16> -> vector<432x256xbf16>
    %c0_25 = arith.constant 0 : index
    %c0_26 = arith.constant 0 : index
    %130 = vector.load %arg5[%c0_25, %c0_26] : memref<8x432xbf16, #tpu.memory_space<vmem>>, vector<8x432xbf16>
    %cst_27 = arith.constant dense<0.000000e+00> : vector<8x256xf32>
    %131 = tpu.matmul %130, %129, %cst_27 {dimension_numbers = #tpu.dot_dimension_numbers<[1], [0], [0], [1], [0, 0, 1, 1], [], []>} : vector<8x432xbf16>, vector<432x256xbf16>, vector<8x256xf32> -> vector<8x256xf32>
    %132 = tpu.iota {dimensions = array<i32: 0>} : vector<8x256xi32>
    %c4_i32 = arith.constant 4 : i32
    %133 = vector.broadcast %c4_i32 : i32 to vector<8x256xi32>
    %134 = arith.cmpi slt, %132, %133 : vector<8x256xi32>
    %135 = math.exp %131 : vector<8x256xf32>
    %136 = arith.select %134, %131, %135 : vector<8x256xi1>, vector<8x256xf32>
    %c0_28 = arith.constant 0 : index
    %c0_29 = arith.constant 0 : index
    %c0_30 = arith.constant 0 : index
    %137 = vector.load %arg7[%c0_28, %c0_29, %c0_30] : memref<1x8x256xf32, #tpu.memory_space<vmem>>, vector<1x8x256xf32>
    %138 = vector.shape_cast %137 : vector<1x8x256xf32> to vector<8x256xf32>
    %139 = vector.shape_cast %136 : vector<8x256xf32> to vector<1x8x256xf32>
    tpu.vector_store %arg7[%c0_28, %c0_29, %c0_30], %139 {strides = array<i32>} : memref<1x8x256xf32, #tpu.memory_space<vmem>>, vector<1x8x256xf32>,
    %c7_i32 = arith.constant 7 : i32
    %140 = arith.cmpi eq, %arg1, %c7_i32 : i32
    %141 = arith.extui %140 : i1 to i32
    %c0_i32_31 = arith.constant 0 : i32
    %142 = arith.cmpi ne, %141, %c0_i32_31 : i32
    scf.if %142 {
      %c0_32 = arith.constant 0 : index
      %c0_33 = arith.constant 0 : index
      %143 = vector.load %arg9[%c0_32, %c0_33] : memref<64x256xf32, #tpu.memory_space<vmem>>, vector<64x256xf32>
      %c0_34 = arith.constant 0 : index
      %c0_35 = arith.constant 0 : index
      %144 = vector.load %arg8[%c0_34, %c0_35] : memref<64x256xf32, #tpu.memory_space<vmem>>, vector<64x256xf32>
      tpu.vector_store %arg8[%c0_34, %c0_35], %143 {strides = array<i32>} : memref<64x256xf32, #tpu.memory_space<vmem>>, vector<64x256xf32>,
    } else {
    }
    return
  }
  func.func @transform_0(%arg0: i32, %arg1: i32) -> (i32, i32, i32) {
    %c0_i32 = arith.constant 0 : i32
    %c0_i32_0 = arith.constant 0 : i32
    return %arg1, %c0_i32, %arg0 : i32, i32, i32
  }
  func.func @transform_1(%arg0: i32, %arg1: i32) -> (i32, i32) {
    %c0_i32 = arith.constant 0 : i32
    %c0_i32_0 = arith.constant 0 : i32
    return %c0_i32, %arg0 : i32, i32
  }
  func.func @transform_2(%arg0: i32, %arg1: i32) -> (i32, i32) {
    %c0_i32 = arith.constant 0 : i32
    %c0_i32_0 = arith.constant 0 : i32
    %c0_i32_1 = arith.constant 0 : i32
    return %c0_i32, %c0_i32_0 : i32, i32
  }
  func.func @transform_3(%arg0: i32, %arg1: i32) -> (i32, i32) {
    %c0_i32 = arith.constant 0 : i32
    %c0_i32_0 = arith.constant 0 : i32
    %c0_i32_1 = arith.constant 0 : i32
    return %c0_i32, %c0_i32_0 : i32, i32
  }
  func.func @transform_4(%arg0: i32, %arg1: i32) -> (i32, i32) {
    %c0_i32 = arith.constant 0 : i32
    %c0_i32_0 = arith.constant 0 : i32
    %c0_i32_1 = arith.constant 0 : i32
    return %c0_i32, %c0_i32_0 : i32, i32
  }
  func.func @transform_5(%arg0: i32, %arg1: i32) -> (i32, i32, i32) {
    %c0_i32 = arith.constant 0 : i32
    %c0_i32_0 = arith.constant 0 : i32
    return %arg1, %c0_i32, %arg0 : i32, i32, i32
  }
  func.func @transform_6(%arg0: i32, %arg1: i32) -> (i32, i32) {
    %c0_i32 = arith.constant 0 : i32
    %c0_i32_0 = arith.constant 0 : i32
    return %c0_i32, %arg0 : i32, i32
  }
}

</mosaic_0001>

<bundles_post_ra>
// kernel: tpu_custom_call.1
= control target key start
LH: loop header
LB: loop body
LE: loop exit
PB: predicated region body
PF: predicated region fallthrough
CT: control target
= control target key end

     0   :  { %s4742_s0 = inlined_call_operand.hbm [shape: f32[8,16,512], index: 0, kind: input, shape index: {}]   ;;  %s4743_s1 = inlined_call_operand.vmem [shape: f32[64,512], index: 1, kind: input, shape index: {}]   ;;  %s4744_s2 = inlined_call_operand.vmem [shape: bf16[128,432], index: 2, kind: input, shape index: {}]   ;;  %s4745_s3 = inlined_call_operand.vmem [shape: bf16[8,432], index: 3, kind: input, shape index: {}]   ;;  %s4746_s4 = inlined_call_operand.vmem [shape: f32[9,256], index: 4, kind: input, shape index: {}]   ;;  %s4747_s5 = inlined_call_operand.hbm [shape: f32[8,8,512], index: 5, kind: output, shape index: {0}]   ;;  %s4748_s6 = inlined_call_operand.hbm [shape: f32[64,512], index: 6, kind: output, shape index: {1}]  }
   0x1   :  { %4793 = sst [smem:[#allocation39_spill]] %s4748_s6 }
   0x2   :  { %12 = vsyncpa [#allocation4], 0 }
   0x3   :  { %14 = vsyncpa [#allocation4 + $0x1], 0 }
   0x4   :  { %15 = vsyncpa [#allocation5], 0 }
   0x5   :  { %17 = vsyncpa [#allocation5 + $0x1], 0 }
   0x6   :  { %18 = vsyncpa [#allocation9], 0 }
   0x7   :  { %20 = vsyncpa [#allocation9 + $0x1], 0  ;;  %s3009_s21 = smov 0   ;;  %s3011_s22 = smov 0  }
   0x8   :  { %s3013_s23 = smov 0   ;;  %s3015_s24 = smov 0  }
   0x9   :  { %s3017_s25 = smov 0   ;;  %s3019_s26 = smov 0  }
   0xa   :  { %s3021_s27 = smov 0   ;;  %s3023_s28 = smov 0  }
   0xb   :  { %s3025_s29 = smov 0   ;;  %s3027_s30 = smov 0  }
   0xc   :  { %s3029_s7 = smov 0  }
   0xd LB: > { %4794 = sst [smem:[#allocation13_spill]] %s2913_s21  ;;  %s2289_s8 = sadd.s32 4294967295, %s2953_s7   ;;  %s2953_s7 = sphi %s3029_s7, %s26_s7   ;;  %s2949_s30 = sphi %s3027_s30, %s4879_s30   ;;  %s2945_s29 = sphi %s3025_s29, %s4878_s29   ;;  %s2941_s28 = sphi %s3023_s28, %s4877_s28   ;;  %s2937_s27 = sphi %s3021_s27, %s4876_s27   ;;  %s2933_s26 = sphi %s3019_s26, %s4868_s26   ;;  %s2929_s25 = sphi %s3017_s25, %s4875_s25   ;;  %s2925_s24 = sphi %s3015_s24, %s4874_s24   ;;  %s2921_s23 = sphi %s3013_s23, %s4873_s23   ;;  %s2917_s22 = sphi %s3011_s22, %s4872_s22   ;;  %s2913_s21 = sphi %s3009_s21, %s4871_s21  }
   0xe   : > { %4795 = sst [smem:[#allocation14_spill]] %s2925_s24  ;;  %s2290_s9 = sadd.s32 4294967294, %s2953_s7  }
   0xf   : > { %4796 = sst [smem:[#allocation15_spill]] %s2933_s26  ;;  %s35_s10 = sadd.s32 1, %s2945_s29 }
  0x10   : > { %s38_s11 = sadd.s32 1, %s2949_s30  ;;  %p36_p0 = scmp.ge.s32.totalorder %s35_s10, 8 }
  0x11   : > { %s47_s12 = sadd.s32 1, %s2933_s26  ;;  %p54_p1 = scmp.ne.s32.totalorder %s2933_s26, %s2929_s25 }
  0x12   : > { %p55_p2 = scmp.eq.s32.totalorder %s2953_s7, 0  ;;  %s4881_s10 = smov (%p36_p0, %s35_s10), 0 }
  0x13   : > { %4797 = sst [smem:[#allocation16_spill]] %s4881_s10  ;;  %s4883_s11 = smov (!%p36_p0, %s38_s11), %s2949_s30 }
  0x14   : > { %s42_s13 = ssub.s32 %s2945_s29, %s4881_s10  ;;  %p3082_p3 = por %p55_p2, %p54_p1 }
  0x15   : > { %p40_p4 = scmp.ge.s32.totalorder %s4883_s11, 2  ;;  %p60_p5 = scmp.ne.s32.totalorder %s2929_s25, %s2925_s24 }
  0x16   : > { %p61_p6 = scmp.eq.s32.totalorder %s2289_s8, 0  ;;  %s73_s15 = sadd.s32 1, %s2921_s23 }
  0x17   : > { %s4885_s11 = smov (%p40_p4, %s4883_s11), 0  ;;  %p80_p8 = scmp.ne.s32.totalorder %s2921_s23, %s2917_s22 }
  0x18   : > { %4799 = sst [smem:[#allocation17_spill]] %s4885_s11  ;;  %p3094_p7 = por %p61_p6, %p60_p5 }
  0x19   : > { %s43_s17 = ssub.s32 %s2949_s30, %s4885_s11  ;;  %p175_p9 = scmp.eq.s32.totalorder %s2289_s8, 15 }
  0x1a   : > { %s4800_s16 = scalar_select %p3094_p7, 1, 0 }
  0x1b   : > { %s44_s18 = sor.u32 %s43_s17, %s42_s13  ;;  %p71_p10 = scmp.eq.s32.totalorder %s43_s17, 0 }
  0x1c   : > { %p45_p11 = scmp.eq.s32.totalorder %s44_s18, 0  ;;  %p3104_p12 = por %p80_p8, %p55_p2 }
  0x1d   : > { %s3109_s20 = scalar_select %p71_p10, %s2921_s23, %s73_s15  }
  0x1e   : > { %s3112_s10 = scalar_select %p45_p11, %s2933_s26, %s47_s12  }
  0x1f   : > { %4802 = sst [smem:[#allocation18_spill]] %s3109_s20  ;;  %p3117_p13 = por %p175_p9, %p54_p1 }
  0x20   : > { %4803 = sst [smem:[#allocation19_spill]] %s3112_s10  ;;  %p181_p0 = scmp.eq.s32.totalorder %s2290_s9, 15 }
  0x21   : > { %s4804_s6 = scalar_select %p3117_p13, 1, 0 }
  0x22   : > { %p3121_p4 = por %p175_p9, %p80_p8  ;;  %p206_p6 = scmp.ne.s32.totalorder %s2917_s22, %s2913_s21 }
  0x23   : > { %p3130_p2 = por %p181_p0, %p60_p5  ;;  %p2292_p1 = scmp.ge.s32.totalorder %s2953_s7, 16 }
  0x24   : > { %s4805_s8 = scalar_select %p3121_p4, 1, 0 }
  0x25   : > { %s4807_s13 = scalar_select %p3130_p2, 1, 0 }
  0x26   : > { %4806 = sst [smem:[#allocation20_spill]] %s4805_s8  ;;  %p3134_p10 = por %p206_p6, %p181_p0 }
  0x27   : > { %4808 = sst [smem:[#allocation21_spill]] %s4807_s13  ;;  %232 = sbr.rel (%p2292_p1) target bundleno = 81 (0x51), region = 28 }
  0x28   : > { %s4809_s15 = scalar_select %p3134_p10, 1, 0 }
  0x29   : > { %s236_s9 = sand.u32 (!%p2292_p1), 1, %s2933_s26   ;;  %s2294_s12 = sshll.u32 (!%p2292_p1), %s2949_s30, 1 }
  0x2a   : > { %4810 = sst [smem:[#allocation22_spill]] %s4809_s15  ;;  %s2293_s17 = sshll.u32 (!%p2292_p1), %s236_s9, 5 }
  0x2b   : > { %s2295_s18 = sshll.u32 (!%p2292_p1), %s2945_s29, 3  ;;  %s240_s10 = scalar_lea.vmem (!%p2292_p1), [#allocation3], %s2293_s17 }
  0x2c   : > { %s246_s11 = sadd.s32 (!%p2292_p1), %s2295_s18, %s2294_s12  ;;  %s249_s20 = sshll.u32 (!%p2292_p1), %s240_s10, 4  ;;  %s3142_s20 = int_to_ptr.vmem [resolvable:$true] %s249_s20 }
  0x2d   : > { %s2296_s21 = sshll.u32 (!%p2292_p1), %s246_s11, 7  ;;  %s3149_s8 = scalar_lea.sflag (!%p2292_p1), [#allocation4], %s236_s9 }
  0x2e   : > { %s3147_s15 = scalar_lea.hbm %s4742_s0, %s2296_s21  ;;  %s2775_s12 = scalar_lea.hbm %s4742_s0, 8192 }
  0x2f   : > { %s2771_s26 = scalar_lea.hbm %s3147_s15, 512  ;;  %p2776_p11 = scmp.lt.u32.totalorder %s3147_s15, %s4742_s0 }
  0x30   : > { %p2772_p5 = scmp.ne.s32.totalorder %s3147_s15, %s2771_s26  ;;  %p2777_p0 = scmp.lt.u32.totalorder %s2775_s12, %s2771_s26 }
  0x31   : > { %p2779_p1 = scmp.lt.u32.totalorder %s2771_s26, %s3147_s15 }
  0x32   : > { %p2773_p8 = pnand %p2772_p5, %p3082_p3  ;;  %p2778_p6 = por %p2777_p0, %p2776_p11 }
  0x34   : > { %p2774_p9 = pneg %p2773_p8  ;;  %p2780_p10 = por %p2779_p1, %p2778_p6 }
  0x36   : > { %p2781_p2 = pnand %p2780_p10, %p2774_p9 }
  0x38   : > { %2784 = shalt.err (!%p2781_p2)
}
  0x39   : > { %s2785_s21 = scalar_lea.vmem %s3142_s20, 512  ;;  %s2955_s24 = smov [#allocation3]  }
  0x3a   : > { %p2786_p5 = scmp.ne.s32.totalorder %s3142_s20, %s2785_s21  ;;  %s2789_s13 = sshll.u32 %s2955_s24, 4  ;;  %s2790_s13 = int_to_ptr.vmem [resolvable:$false] %s2789_s13 }
  0x3b   : > { %s2791_s9 = scalar_lea.vmem %s2790_s13, 1024  ;;  %p2792_p13 = scmp.lt.s32.totalorder %s3142_s20, %s2790_s13 }
  0x3c   : > { %p2787_p8 = pnand %p2786_p5, %p3082_p3  ;;  %p2793_p7 = scmp.lt.s32.totalorder %s2791_s9, %s2785_s21 }
  0x3e   : > { %p2788_p4 = pneg %p2787_p8  ;;  %p2794_p11 = por %p2793_p7, %p2792_p13 }
  0x40   : > { %p2795_p0 = pnand %p2794_p11, %p2788_p4 }
  0x42   : > { %2798 = shalt.err (!%p2795_p0)
}
  0x43   : > { %s2956_s26 = smov 512   ;;  %s2957_s10 = smov 256  }
  0x44   : > { %s2958_s11 = smov 16   ;;  %258 = sbr.rel (!%p3104_p12) target bundleno = 81 (0x51), region = 36 }
  0x45   : > { %2429 = dma.hbm_to_vmem [thread:$0]  (%p3082_p3), %s3147_s15, 512, %s3142_s20, %s3149_s8, %s2956_s26, %s2957_s10, %s2958_s11  }
  0x46   : > { %s260_s12 = sand.u32 (%p3104_p12), 1, %s2921_s23   ;;  %s2393_s17 = sshll.u32 (%p3104_p12), %s2949_s30, 4 }
  0x47   : > { %s2297_s18 = sshll.u32 (%p3104_p12), %s260_s12, 7  ;;  %s3180_s13 = scalar_lea.vmem (%p3104_p12), %s4743_s1, %s2393_s17 }
  0x48   : > { %v278_v0 = vld [vmem:[%s3180_s13] sm:$0xff] (%p3104_p12)  ;;  %v280_v1 = vld [vmem:[%s3180_s13 + $0x8] sm:$0xff] (%p3104_p12)  ;;  %s262_s14 = scalar_lea.vmem (%p3104_p12), [#allocation6], %s2297_s18 }
  0x49   : > { %v282_v2 = vld [vmem:[%s3180_s13 + $0x20] sm:$0xff] (%p3104_p12)  ;;  %279 = vst [vmem:[%s262_s14] sm:$0xff] (%p3104_p12), %v278_v0  ;;  %281 = vst [vmem:[%s262_s14 + $0x8] sm:$0xff] (%p3104_p12), %v280_v1  ;;  %v284_v3 = vld [vmem:[%s3180_s13 + $0x28] sm:$0xff] (%p3104_p12) }
  0x4a   : > { %283 = vst [vmem:[%s262_s14 + $0x10] sm:$0xff] (%p3104_p12), %v282_v2  ;;  %v286_v4 = vld [vmem:[%s3180_s13 + $0x40] sm:$0xff] (%p3104_p12)  ;;  %v288_v5 = vld [vmem:[%s3180_s13 + $0x48] sm:$0xff] (%p3104_p12)  ;;  %285 = vst [vmem:[%s262_s14 + $0x18] sm:$0xff] (%p3104_p12), %v284_v3 }
  0x4b   : > { %287 = vst [vmem:[%s262_s14 + $0x20] sm:$0xff] %v286_v4  ;;  %289 = vst [vmem:[%s262_s14 + $0x28] sm:$0xff] %v288_v5  ;;  %v290_v6 = vld [vmem:[%s3180_s13 + $0x60] sm:$0xff]  ;;  %v292_v7 = vld [vmem:[%s3180_s13 + $0x68] sm:$0xff] }
  0x4c   : > { %v294_v8 = vld [vmem:[%s3180_s13 + $0x80] sm:$0xff]  ;;  %291 = vst [vmem:[%s262_s14 + $0x30] sm:$0xff] %v290_v6  ;;  %293 = vst [vmem:[%s262_s14 + $0x38] sm:$0xff] %v292_v7  ;;  %v296_v9 = vld [vmem:[%s3180_s13 + $0x88] sm:$0xff] }
  0x4d   : > { %295 = vst [vmem:[%s262_s14 + $0x40] sm:$0xff] %v294_v8  ;;  %v298_v10 = vld [vmem:[%s3180_s13 + $0xa0] sm:$0xff]  ;;  %v300_v11 = vld [vmem:[%s3180_s13 + $0xa8] sm:$0xff]  ;;  %297 = vst [vmem:[%s262_s14 + $0x48] sm:$0xff] %v296_v9 }
  0x4e   : > { %299 = vst [vmem:[%s262_s14 + $0x50] sm:$0xff] %v298_v10  ;;  %301 = vst [vmem:[%s262_s14 + $0x58] sm:$0xff] %v300_v11  ;;  %v302_v12 = vld [vmem:[%s3180_s13 + $0xc0] sm:$0xff]  ;;  %v304_v13 = vld [vmem:[%s3180_s13 + $0xc8] sm:$0xff] }
  0x4f   : > { %v306_v14 = vld [vmem:[%s3180_s13 + $0xe0] sm:$0xff]  ;;  %303 = vst [vmem:[%s262_s14 + $0x60] sm:$0xff] %v302_v12  ;;  %305 = vst [vmem:[%s262_s14 + $0x68] sm:$0xff] %v304_v13  ;;  %v308_v15 = vld [vmem:[%s3180_s13 + $0xe8] sm:$0xff] }
  0x50   : > { %307 = vst [vmem:[%s262_s14 + $0x70] sm:$0xff] %v306_v14  ;;  %309 = vst [vmem:[%s262_s14 + $0x78] sm:$0xff] %v308_v15 }
  0x51 PF: > { %p2300_p3 = scmp.ge.s32.totalorder %s2953_s7, 1  ;;  %p314_p7 = scmp.lt.s32.totalorder %s2953_s7, 17 }
  0x53   : > { %p315_p12 = pnand %p2300_p3, %p314_p7 }
  0x55   : > { %318 = sbr.rel (%p315_p12) target bundleno = 1257 (0x4e9), region = 59 }
  0x5c   : > { %s3201_s19 = sand.u32 1, %s2929_s25   ;;  %p4811_p13 = scmp.ne.s32.totalorder %s4800_s16, 0 }
  0x5d   : > { %s2301_s20 = sshll.u32 %s3201_s19, 5  ;;  %s321_s8 = scalar_lea.sflag [#allocation4], %s3201_s19 }
  0x5e   : > { %s3205_s15 = scalar_lea.vmem [#allocation3], %s2301_s20 }
  0x5f   : > { %2900 = dma.done.wait (%p4811_p13), %s321_s8, 512  }
  0x60   : > { %2902 = vsyncadd (%p4811_p13), %s321_s8, 4294966784  ;;  %s4762_s9 = sand.u32 1, %s2917_s22   ;;  %s2303_s26 = sshll.u32 %s3201_s19, 4  ;;  %v3218_v16 = vld [vmem:[%s4746_s4] sm:$0xff]  ;;  %v3223_v17 = vld [vmem:[%s4746_s4 + $0x8] sm:$0xff] }
  0x61   : > { %s2302_s10 = sshll.u32 %s4762_s9, 7  ;;  %v3228_v18 = vld [vmem:[%s4746_s4 + $0x10] ss:$0 sm:$0xff]  ;;  %v3233_v19 = vld [vmem:[%s4746_s4 + $0x18] ss:$0 sm:$0xff]  ;;  %s3237_s20 = scalar_lea.vmem [#allocation7], %s2303_s26 }
  0x62   : > { %4812 = vst [vmem:[#allocation23_spill] sm:$0xff] %v3228_v18  ;;  %4813 = vst [vmem:[#allocation24_spill] sm:$0xff] %v3233_v19  ;;  %s3235_s14 = scalar_lea.vmem [#allocation6], %s2302_s10  ;;  %s3239_s8 = scalar_lea.vmem [#allocation8], %s2302_s10 }
  0x63   : > { %p2305_p4 = scmp.ne.s32.totalorder %s2937_s27, 0 }
  0x64   : > { %v382_v20 = vld [vmem:[%s3235_s14] sm:$0xff] (!%p2305_p4)  ;;  %v383_v21 = vld [vmem:[%s3235_s14 + $0x8] sm:$0xff] (!%p2305_p4)  ;;  %v384_v22 = vld [vmem:[%s3235_s14 + $0x10] sm:$0xff] (!%p2305_p4) }
  0x65   : > { %381 = sbr.rel (%p2305_p4) target bundleno = 109 (0x6d), region = 71  ;;  %398 = vst [vmem:[#allocation2] sm:$0xff] (!%p2305_p4), %v382_v20  ;;  %399 = vst [vmem:[#allocation2 + $0x8] sm:$0xff] (!%p2305_p4), %v383_v21  ;;  %v385_v23 = vld [vmem:[%s3235_s14 + $0x18] sm:$0xff] (!%p2305_p4)  ;;  %v386_v24 = vld [vmem:[%s3235_s14 + $0x20] sm:$0xff] (!%p2305_p4) }
  0x66   : > { %400 = vst [vmem:[#allocation2 + $0x10] sm:$0xff] (!%p2305_p4), %v384_v22  ;;  %v387_v25 = vld [vmem:[%s3235_s14 + $0x28] sm:$0xff] (!%p2305_p4)  ;;  %401 = vst [vmem:[#allocation2 + $0x18] sm:$0xff] (!%p2305_p4), %v385_v23  ;;  %v388_v26 = vld [vmem:[%s3235_s14 + $0x30] sm:$0xff] (!%p2305_p4) }
  0x67   : > { %402 = vst [vmem:[#allocation2 + $0x20] sm:$0xff] (!%p2305_p4), %v386_v24  ;;  %403 = vst [vmem:[#allocation2 + $0x28] sm:$0xff] (!%p2305_p4), %v387_v25  ;;  %v389_v27 = vld [vmem:[%s3235_s14 + $0x38] sm:$0xff] (!%p2305_p4)  ;;  %v390_v28 = vld [vmem:[%s3235_s14 + $0x40] sm:$0xff] (!%p2305_p4) }
  0x68   : > { %404 = vst [vmem:[#allocation2 + $0x30] sm:$0xff] (!%p2305_p4), %v388_v26  ;;  %405 = vst [vmem:[#allocation2 + $0x38] sm:$0xff] (!%p2305_p4), %v389_v27  ;;  %v391_v29 = vld [vmem:[%s3235_s14 + $0x48] sm:$0xff] (!%p2305_p4)  ;;  %v392_v30 = vld [vmem:[%s3235_s14 + $0x50] sm:$0xff] (!%p2305_p4) }
  0x69   : > { %406 = vst [vmem:[#allocation2 + $0x40] sm:$0xff] (!%p2305_p4), %v390_v28  ;;  %v393_v31 = vld [vmem:[%s3235_s14 + $0x58] sm:$0xff] (!%p2305_p4)  ;;  %407 = vst [vmem:[#allocation2 + $0x48] sm:$0xff] (!%p2305_p4), %v391_v29  ;;  %v394_v32 = vld [vmem:[%s3235_s14 + $0x60] sm:$0xff] (!%p2305_p4) }
  0x6a   : > { %408 = vst [vmem:[#allocation2 + $0x50] sm:$0xff] (!%p2305_p4), %v392_v30  ;;  %409 = vst [vmem:[#allocation2 + $0x58] sm:$0xff] (!%p2305_p4), %v393_v31  ;;  %v395_v33 = vld [vmem:[%s3235_s14 + $0x68] sm:$0xff] (!%p2305_p4)  ;;  %v396_v34 = vld [vmem:[%s3235_s14 + $0x70] sm:$0xff] (!%p2305_p4) }
  0x6b   : > { %410 = vst [vmem:[#allocation2 + $0x60] sm:$0xff] (!%p2305_p4), %v394_v32  ;;  %411 = vst [vmem:[#allocation2 + $0x68] sm:$0xff] (!%p2305_p4), %v395_v33  ;;  %v397_v35 = vld [vmem:[%s3235_s14 + $0x78] sm:$0xff] (!%p2305_p4) }
  0x6c   : > { %412 = vst [vmem:[#allocation2 + $0x70] sm:$0xff] %v396_v34  ;;  %413 = vst [vmem:[#allocation2 + $0x78] sm:$0xff] %v397_v35 }
  0x6d PF: > { %v3259_v36 = vld [vmem:[%s3205_s15 + $0x8] sm:$0xff]  ;;  %v3262_v37 = vld [vmem:[%s3205_s15] sm:$0xff]  ;;  %s2959_s26 = smov 17   ;;  %v3269_v38 = vld [vmem:[%s3205_s15 + $0x18] sm:$0xff]  ;;  %s2961_s10 = smov 127   ;;  %v458_v48 = vlaneseq  ;;  %vm1130_vm4 = vcmask 392192  }
  0x6e   : > { %446 = vrot.lane.b32.xlu1 %v3259_v36, %s2959_s26  ;;  %434 = vrot.lane.b32.xlu0 %v3262_v37, %s2959_s26  ;;  %v3272_v39 = vld [vmem:[%s3205_s15 + $0x10] sm:$0xff]  ;;  %v3280_v41 = vld [vmem:[#allocation2] sm:$0xff]  ;;  %v3282_v42 = vld [vmem:[#allocation2 + $0x18] sm:$0xff]  ;;  %s2960_s15 = smov 16   ;;  %s2962_s11 = smov 15   ;;  %vm2969_vm10 = vmmov 1  }
  0x6f   : > { %v3274_v40 = vld [vmem:[#allocation2 + $0x10] sm:$0xff]  ;;  %v3288_v43 = vld [vmem:[#allocation2 + $0x8] sm:$0xff]  ;;  %v3296_v45 = vld [vmem:[#allocation2 + $0x20] sm:$0xff]  ;;  %s4769_s12 = smov 113   ;;  %s4767_s17 = smov 1   ;;  %v3394_v49 = vshrl.u32 %v458_v48, 7 }
  0x70   : > { %v3290_v44 = vld [vmem:[#allocation2 + $0x30] sm:$0xff]  ;;  %v3302_v46 = vld [vmem:[#allocation2 + $0x38] sm:$0xff]  ;;  %v3304_v47 = vld [vmem:[#allocation2 + $0x28] sm:$0xff]  ;;  %v3400_v50 = vand.u32 127, %v458_v48  ;;  %s4765_s18 = smov 112   ;;  %s4763_s21 = smov 111  }
  0x71   : > { %4814 = vst [vmem:[#allocation25_spill] sm:$0xff] %v3394_v49  ;;  %v475_v51 = vsub.s32 0, %v3394_v49  ;;  %v538_v26 = vsub.s32 1, %v3394_v49  ;;  %vm1592_vm9 = vcmp.eq.s32.totalorder %v3394_v49, 0  ;;  %s4820_s14 = smov 113   ;;  %s4827_s9 = smov 112  }
  0x72   : > { %448 = vrot.lane.b32.xlu1 %v3269_v38, %s2959_s26  ;;  %436 = vrot.lane.b32.xlu0 %v3272_v39, %s2959_s26  ;;  %vm460_vm0 = vcmp.lt.s32.totalorder %v3400_v50, 17  ;;  %vm523_vm1 = vcmp.lt.s32.totalorder %v3400_v50, 16  ;;  %vm718_vm2 = vcmp.lt.s32.totalorder %v3400_v50, 127  ;;  %vm586_vm3 = vcmp.lt.s32.totalorder %v3400_v50, 15  ;;  %vm4581_vm11 = vmpackc.low %vm2969_vm10, %vm1592_vm9  ;;  %p2383_p2 = scmp.ne.s32.totalorder %s2937_s27, 7 }
  0x73   : > { %v3409_v54 = vrot.slane %v3223_v17, %v475_v51  ;;  %v3418_v56 = vrot.slane %v3218_v16, %v475_v51  ;;  %vm781_vm5 = vcmp.lt.s32.totalorder %v3400_v50, 113  ;;  %vm649_vm6 = vcmp.lt.s32.totalorder %v3400_v50, 1 }
  0x74   : > { %vm844_vm7 = vcmp.lt.s32.totalorder %v3400_v50, 112  ;;  %vm907_vm8 = vcmp.lt.s32.totalorder %v3400_v50, 111 }
  0x76   : > { %440 = vrot.lane.b32.xlu1 %v3274_v40, %s2959_s26  ;;  %438 = vrot.lane.b32.xlu0 %v3280_v41, %s2959_s26 }
  0x7a   : > { %452 = vrot.lane.b32.xlu1 %v3282_v42, %s2959_s26  ;;  %450 = vrot.lane.b32.xlu0 %v3288_v43, %s2959_s26 }
  0x7e   : > { %444 = vrot.lane.b32.xlu1 %v3290_v44, %s2959_s26  ;;  %442 = vrot.lane.b32.xlu0 %v3296_v45, %s2959_s26 }
  0x82   : > { %456 = vrot.lane.b32.xlu1 %v3302_v46, %s2959_s26  ;;  %454 = vrot.lane.b32.xlu0 %v3304_v47, %s2959_s26 }
  0x86   : > { %501 = vrot.lane.b32.xlu1 %v3272_v39, %s2960_s15  ;;  %499 = vrot.lane.b32.xlu0 %v3262_v37, %s2960_s15 }
  0x8a   : > { %513 = vrot.lane.b32.xlu1 %v3269_v38, %s2960_s15  ;;  %511 = vrot.lane.b32.xlu0 %v3259_v36, %s2960_s15 }
  0x8e   : > { %505 = vrot.lane.b32.xlu1 %v3274_v40, %s2960_s15  ;;  %503 = vrot.lane.b32.xlu0 %v3280_v41, %s2960_s15 }
  0x92   : > { %517 = vrot.lane.b32.xlu1 %v3282_v42, %s2960_s15  ;;  %515 = vrot.lane.b32.xlu0 %v3288_v43, %s2960_s15 }
  0x96   : > { %509 = vrot.lane.b32.xlu1 %v3290_v44, %s2960_s15  ;;  %507 = vrot.lane.b32.xlu0 %v3296_v45, %s2960_s15 }
  0x9a   : > { %521 = vrot.lane.b32.xlu1 %v3302_v46, %s2960_s15  ;;  %519 = vrot.lane.b32.xlu0 %v3304_v47, %s2960_s15 }
  0x9e   : > { %700 = vrot.lane.b32.xlu1 %v3274_v40, %s2961_s10  ;;  %698 = vrot.lane.b32.xlu0 %v3280_v41, %s2961_s10 }
  0xa2   : > { %712 = vrot.lane.b32.xlu1 %v3282_v42, %s2961_s10  ;;  %710 = vrot.lane.b32.xlu0 %v3288_v43, %s2961_s10 }
  0xa6   : > { %564 = vrot.lane.b32.xlu1 %v3272_v39, %s2962_s11  ;;  %562 = vrot.lane.b32.xlu0 %v3262_v37, %s2962_s11 }
  0xaa   : > { %576 = vrot.lane.b32.xlu1 %v3269_v38, %s2962_s11  ;;  %574 = vrot.lane.b32.xlu0 %v3259_v36, %s2962_s11 }
  0xae   : > { %704 = vrot.lane.b32.xlu1 %v3290_v44, %s2961_s10  ;;  %702 = vrot.lane.b32.xlu0 %v3296_v45, %s2961_s10 }
  0xb2   : > { %716 = vrot.lane.b32.xlu1 %v3302_v46, %s2961_s10  ;;  %714 = vrot.lane.b32.xlu0 %v3304_v47, %s2961_s10 }
  0xb6   : > { %568 = vrot.lane.b32.xlu1 %v3274_v40, %s2962_s11  ;;  %566 = vrot.lane.b32.xlu0 %v3280_v41, %s2962_s11 }
  0xba   : > { %580 = vrot.lane.b32.xlu1 %v3282_v42, %s2962_s11  ;;  %578 = vrot.lane.b32.xlu0 %v3288_v43, %s2962_s11 }
  0xbe   : > { %759 = vrot.lane.b32.xlu1 %v3272_v39, %s4769_s12  ;;  %757 = vrot.lane.b32.xlu0 %v3262_v37, %s4769_s12 }
  0xc2   : > { %771 = vrot.lane.b32.xlu1 %v3269_v38, %s4769_s12  ;;  %769 = vrot.lane.b32.xlu0 %v3259_v36, %s4769_s12 }
  0xc6   : > { %572 = vrot.lane.b32.xlu1 %v3290_v44, %s2962_s11  ;;  %570 = vrot.lane.b32.xlu0 %v3296_v45, %s2962_s11 }
  0xca   : > { %584 = vrot.lane.b32.xlu1 %v3302_v46, %s2962_s11  ;;  %582 = vrot.lane.b32.xlu0 %v3304_v47, %s2962_s11 }
  0xce   : > { %763 = vrot.lane.b32.xlu1 %v3274_v40, %s4769_s12  ;;  %761 = vrot.lane.b32.xlu0 %v3280_v41, %s4769_s12 }
  0xd2   : > { %775 = vrot.lane.b32.xlu1 %v3282_v42, %s4769_s12  ;;  %773 = vrot.lane.b32.xlu0 %v3288_v43, %s4769_s12 }
  0xd6   : > { %627 = vrot.lane.b32.xlu1 %v3272_v39, %s4767_s17  ;;  %625 = vrot.lane.b32.xlu0 %v3262_v37, %s4767_s17 }
  0xda   : > { %639 = vrot.lane.b32.xlu1 %v3269_v38, %s4767_s17  ;;  %637 = vrot.lane.b32.xlu0 %v3259_v36, %s4767_s17 }
  0xde   : > { %767 = vrot.lane.b32.xlu1 %v3290_v44, %s4769_s12  ;;  %765 = vrot.lane.b32.xlu0 %v3296_v45, %s4769_s12 }
  0xe0   : > { %v447_v52 = vpop.permute.xlu1 %446  ;;  %v435_v53 = vpop.permute.xlu0 %434 }
  0xe1   : > { %v461_v55 = vsel %vm460_vm0, %v435_v53, %v447_v52  ;;  %v467_v57 = vsel %vm460_vm0, %v447_v52, %v435_v53  ;;  %v3479_v53 = vrot.slane %v3218_v16, %v538_v26 }
  0xe2   : > { %779 = vrot.lane.b32.xlu1 %v3302_v46, %s4769_s12  ;;  %777 = vrot.lane.b32.xlu0 %v3304_v47, %s4769_s12  ;;  %v482_v62 = vmul.f32 %v3409_v54, %v461_v55  ;;  %v481_v0 = vmul.f32 %v3418_v56, %v467_v57  ;;  %v3482_v55 = vrot.slane %v3223_v17, %v538_v26  ;;  %s4823_s12 = smov 1  }
  0xe4   : > { %v449_v58 = vpop.permute.xlu1 %448  ;;  %v437_v59 = vpop.permute.xlu0 %436 }
  0xe5   : > { %v468_v60 = vsel %vm460_vm0, %v449_v58, %v437_v59  ;;  %v462_v61 = vsel %vm460_vm0, %v437_v59, %v449_v58 }
  0xe6   : > { %631 = vrot.lane.b32.xlu1 %v3274_v40, %s4767_s17  ;;  %629 = vrot.lane.b32.xlu0 %v3280_v41, %s4767_s17  ;;  %v484_v63 = vmul.f32 %v3409_v54, %v462_v61  ;;  %v483_v1 = vmul.f32 %v3418_v56, %v468_v60 }
  0xe8   : > { %v441_v2 = vpop.permute.xlu1 %440  ;;  %v439_v3 = vpop.permute.xlu0 %438  ;;  %v494_v4 = vpack.c.bf16 %v484_v63, %v482_v62  ;;  %v493_v5 = vpack.c.bf16 %v483_v1, %v481_v0 }
  0xea   : > { %1155 = vmatprep.subr.bf16.mxu0 %v494_v4  ;;  %643 = vrot.lane.b32.xlu1 %v3282_v42, %s4767_s17 }
  0xeb   : > { %641 = vrot.lane.b32.xlu0 %v3288_v43, %s4767_s17  ;;  %1156 = vmatpush1.bf16.msra.mxu0 %v493_v5 }
  0xec   : > { %v453_v6 = vpop.permute.xlu1 %452  ;;  %v451_v7 = vpop.permute.xlu0 %450 }
  0xed   : > { %v464_v8 = vsel %vm460_vm0, %v441_v2, %v453_v6  ;;  %v470_v9 = vsel %vm460_vm0, %v453_v6, %v441_v2  ;;  %v463_v10 = vsel %vm460_vm0, %v439_v3, %v451_v7  ;;  %v469_v11 = vsel %vm460_vm0, %v451_v7, %v439_v3 }
  0xee   : > { %v487_v12 = vmul.f32 %v3418_v56, %v470_v9  ;;  %v488_v13 = vmul.f32 %v3409_v54, %v464_v8  ;;  %v485_v14 = vmul.f32 %v3418_v56, %v469_v11  ;;  %v486_v15 = vmul.f32 %v3409_v54, %v463_v10  ;;  %822 = vrot.lane.b32.xlu1 %v3272_v39, %s4765_s18 }
  0xef   : > { %820 = vrot.lane.b32.xlu0 %v3262_v37, %s4765_s18 }
  0xf0   : > { %v445_v20 = vpop.permute.xlu1 %444  ;;  %v443_v21 = vpop.permute.xlu0 %442  ;;  %v496_v22 = vpack.c.bf16 %v488_v13, %v486_v15  ;;  %v495_v23 = vpack.c.bf16 %v487_v12, %v485_v14 }
  0xf2   : > { %834 = vrot.lane.b32.xlu1 %v3269_v38, %s4765_s18  ;;  %1157 = vmatprep.subr.bf16.mxu0 %v496_v22 }
  0xf3   : > { %832 = vrot.lane.b32.xlu0 %v3259_v36, %s4765_s18  ;;  %1158 = vmatpush1.bf16.msra.mxu0 %v495_v23 }
  0xf4   : > { %v457_v24 = vpop.permute.xlu1 %456  ;;  %v455_v25 = vpop.permute.xlu0 %454 }
  0xf5   : > { %v466_v27 = vsel %vm460_vm0, %v445_v20, %v457_v24  ;;  %v472_v28 = vsel %vm460_vm0, %v457_v24, %v445_v20  ;;  %v465_v29 = vsel %vm460_vm0, %v443_v21, %v455_v25  ;;  %v471_v30 = vsel %vm460_vm0, %v455_v25, %v443_v21 }
  0xf6   : > { %v491_v31 = vmul.f32 %v3418_v56, %v472_v28  ;;  %v492_v32 = vmul.f32 %v3409_v54, %v466_v27  ;;  %v489_v33 = vmul.f32 %v3418_v56, %v471_v30  ;;  %v490_v34 = vmul.f32 %v3409_v54, %v465_v29  ;;  %635 = vrot.lane.b32.xlu1 %v3290_v44, %s4767_s17 }
  0xf7   : > { %633 = vrot.lane.b32.xlu0 %v3296_v45, %s4767_s17  ;;  %v733_v27 = vsub.s32 5, %v3394_v49 }
  0xf8   : > { %v502_v35 = vpop.permute.xlu1 %501  ;;  %v500_v48 = vpop.permute.xlu0 %499  ;;  %v498_v51 = vpack.c.bf16 %v492_v32, %v490_v34  ;;  %v497_v52 = vpack.c.bf16 %v491_v31, %v489_v33 }
  0xfa   : > { %647 = vrot.lane.b32.xlu1 %v3302_v46, %s4767_s17  ;;  %1159 = vmatprep.subr.bf16.mxu0 %v498_v51 }
  0xfb   : > { %645 = vrot.lane.b32.xlu0 %v3304_v47, %s4767_s17  ;;  %1160 = vmatpush1.bf16.msra.mxu0 %v497_v52 }
  0xfc   : > { %v514_v57 = vpop.permute.xlu1 %513  ;;  %v512_v58 = vpop.permute.xlu0 %511 }
  0xfd   : > { %v525_v59 = vsel %vm523_vm1, %v502_v35, %v514_v57  ;;  %v531_v60 = vsel %vm523_vm1, %v514_v57, %v502_v35  ;;  %v524_v61 = vsel %vm523_vm1, %v500_v48, %v512_v58  ;;  %v530_v62 = vsel %vm523_vm1, %v512_v58, %v500_v48 }
  0xfe   : > { %v546_v63 = vmul.f32 %v3479_v53, %v531_v60  ;;  %v547_v0 = vmul.f32 %v3482_v55, %v525_v59  ;;  %v544_v1 = vmul.f32 %v3479_v53, %v530_v62  ;;  %v545_v2 = vmul.f32 %v3482_v55, %v524_v61  ;;  %826 = vrot.lane.b32.xlu1 %v3274_v40, %s4765_s18 }
  0xff   : > { %824 = vrot.lane.b32.xlu0 %v3280_v41, %s4765_s18  ;;  %v3547_v58 = vrot.slane %v3223_v17, %v733_v27  ;;  %v3550_v59 = vrot.slane %v3218_v16, %v733_v27  ;;  %v601_v62 = vsub.s32 2, %v3394_v49  ;;  %v2589_v27 = vld [vmem:[%s4744_s2 + $0x4] ss:$16 sps:$4 sm:$0xff]  }
 0x100   : > { %v506_v3 = vpop.permute.xlu1 %505  ;;  %v504_v4 = vpop.permute.xlu0 %503  ;;  %v557_v5 = vpack.c.bf16 %v547_v0, %v545_v2  ;;  %v556_v6 = vpack.c.bf16 %v546_v63, %v544_v1  ;;  %1187 = vmatprep.mubr.bf16.mxu0 %v2589_v27 }
 0x102   : > { %838 = vrot.lane.b32.xlu1 %v3282_v42, %s4765_s18  ;;  %1161 = vmatprep.subr.bf16.mxu0 %v557_v5 }
 0x103   : > { %836 = vrot.lane.b32.xlu0 %v3288_v43, %s4765_s18  ;;  %1162 = vmatpush1.bf16.msra.mxu0 %v556_v6 }
 0x104   : > { %v518_v7 = vpop.permute.xlu1 %517  ;;  %v516_v8 = vpop.permute.xlu0 %515 }
 0x105   : > { %v527_v9 = vsel %vm523_vm1, %v506_v3, %v518_v7  ;;  %v533_v10 = vsel %vm523_vm1, %v518_v7, %v506_v3  ;;  %v526_v11 = vsel %vm523_vm1, %v504_v4, %v516_v8  ;;  %v532_v12 = vsel %vm523_vm1, %v516_v8, %v504_v4 }
 0x106   : > { %v550_v13 = vmul.f32 %v3479_v53, %v533_v10  ;;  %v551_v14 = vmul.f32 %v3482_v55, %v527_v9  ;;  %v548_v15 = vmul.f32 %v3479_v53, %v532_v12  ;;  %v549_v20 = vmul.f32 %v3482_v55, %v526_v11  ;;  %830 = vrot.lane.b32.xlu1 %v3290_v44, %s4765_s18 }
 0x107   : > { %828 = vrot.lane.b32.xlu0 %v3296_v45, %s4765_s18  ;;  %v3575_v11 = vrot.slane %v3218_v16, %v601_v62  ;;  %v3578_v12 = vrot.slane %v3223_v17, %v601_v62 }
 0x108   : > { %v510_v21 = vpop.permute.xlu1 %509  ;;  %v508_v22 = vpop.permute.xlu0 %507  ;;  %v559_v23 = vpack.c.bf16 %v551_v14, %v549_v20  ;;  %v558_v24 = vpack.c.bf16 %v550_v13, %v548_v15 }
 0x10a   : > { %842 = vrot.lane.b32.xlu1 %v3302_v46, %s4765_s18  ;;  %1163 = vmatprep.subr.bf16.mxu0 %v559_v23 }
 0x10b   : > { %840 = vrot.lane.b32.xlu0 %v3304_v47, %s4765_s18  ;;  %1164 = vmatpush1.bf16.msra.mxu0 %v558_v24 }
 0x10c   : > { %v522_v25 = vpop.permute.xlu1 %521  ;;  %v520_v26 = vpop.permute.xlu0 %519 }
 0x10d   : > { %v529_v28 = vsel %vm523_vm1, %v510_v21, %v522_v25  ;;  %v535_v29 = vsel %vm523_vm1, %v522_v25, %v510_v21  ;;  %v528_v30 = vsel %vm523_vm1, %v508_v22, %v520_v26  ;;  %v534_v31 = vsel %vm523_vm1, %v520_v26, %v508_v22 }
 0x10e   : > { %v554_v32 = vmul.f32 %v3479_v53, %v535_v29  ;;  %v555_v33 = vmul.f32 %v3482_v55, %v529_v28  ;;  %v552_v34 = vmul.f32 %v3479_v53, %v534_v31  ;;  %v553_v35 = vmul.f32 %v3482_v55, %v528_v30  ;;  %885 = vrot.lane.b32.xlu1 %v3272_v39, %s4763_s21 }
 0x10f   : > { %883 = vrot.lane.b32.xlu0 %v3262_v37, %s4763_s21 }
 0x110   : > { %v701_v48 = vpop.permute.xlu1 %700  ;;  %v699_v51 = vpop.permute.xlu0 %698  ;;  %v561_v52 = vpack.c.bf16 %v555_v33, %v553_v35  ;;  %v560_v57 = vpack.c.bf16 %v554_v32, %v552_v34  ;;  %v2592_v34 = vld [vmem:[%s4744_s2 + $0xc] ss:$16 sps:$4 sm:$0xff]  }
 0x111   : > { %2340 = vmatprep.mubr.msk.bf16.mxu1 %vm1130_vm4, %v2592_v34 }
 0x112   : > { %897 = vrot.lane.b32.xlu1 %v3269_v38, %s4763_s21  ;;  %1165 = vmatprep.subr.bf16.mxu0 %v561_v52 }
 0x113   : > { %895 = vrot.lane.b32.xlu0 %v3259_v36, %s4763_s21  ;;  %1166 = vmatpush1.bf16.msra.mxu0 %v560_v57 }
 0x114   : > { %v713_v60 = vpop.permute.xlu1 %712  ;;  %v711_v61 = vpop.permute.xlu0 %710 }
 0x115   : > { %v722_v63 = vsel %vm718_vm2, %v701_v48, %v713_v60  ;;  %v721_v0 = vsel %vm718_vm2, %v699_v51, %v711_v61  ;;  %v727_v1 = vsel %vm718_vm2, %v711_v61, %v699_v51  ;;  %v728_v2 = vsel %vm718_vm2, %v713_v60, %v701_v48 }
 0x116   : > { %889 = vrot.lane.b32.xlu1 %v3274_v40, %s4763_s21  ;;  %v744_v3 = vmul.f32 %v3547_v58, %v727_v1  ;;  %v746_v4 = vmul.f32 %v3547_v58, %v728_v2  ;;  %v743_v5 = vmul.f32 %v3550_v59, %v721_v0  ;;  %v745_v6 = vmul.f32 %v3550_v59, %v722_v63 }
 0x117   : > { %887 = vrot.lane.b32.xlu0 %v3280_v41, %s4763_s21 }
 0x118   : > { %v565_v7 = vpop.permute.xlu1 %564  ;;  %v563_v8 = vpop.permute.xlu0 %562  ;;  %v754_v9 = vpack.c.bf16 %v746_v4, %v744_v3  ;;  %v753_v10 = vpack.c.bf16 %v745_v6, %v743_v5  ;;  %v796_v5 = vsub.s32 6, %v3394_v49 }
 0x11a   : > { %901 = vrot.lane.b32.xlu1 %v3282_v42, %s4763_s21  ;;  %1268 = vmatprep.subr.bf16.mxu1 %v754_v9 }
 0x11b   : > { %899 = vrot.lane.b32.xlu0 %v3288_v43, %s4763_s21  ;;  %1269 = vmatpush1.bf16.msra.mxu1 %v753_v10 }
 0x11c   : > { %v577_v13 = vpop.permute.xlu1 %576  ;;  %v575_v14 = vpop.permute.xlu0 %574 }
 0x11d   : > { %v588_v15 = vsel %vm586_vm3, %v565_v7, %v577_v13  ;;  %v594_v20 = vsel %vm586_vm3, %v577_v13, %v565_v7  ;;  %v587_v21 = vsel %vm586_vm3, %v563_v8, %v575_v14  ;;  %v593_v22 = vsel %vm586_vm3, %v575_v14, %v563_v8 }
 0x11e   : > { %v609_v23 = vmul.f32 %v3575_v11, %v594_v20  ;;  %v610_v24 = vmul.f32 %v3578_v12, %v588_v15  ;;  %v607_v25 = vmul.f32 %v3575_v11, %v593_v22  ;;  %v608_v26 = vmul.f32 %v3578_v12, %v587_v21  ;;  %696 = vrot.lane.b32.xlu1 %v3272_v39, %s2961_s10 }
 0x11f   : > { %694 = vrot.lane.b32.xlu0 %v3262_v37, %s2961_s10 }
 0x120   : > { %v705_v28 = vpop.permute.xlu1 %704  ;;  %v703_v29 = vpop.permute.xlu0 %702  ;;  %v620_v30 = vpack.c.bf16 %v610_v24, %v608_v26  ;;  %v619_v31 = vpack.c.bf16 %v609_v23, %v607_v25  ;;  %v3644_v24 = vrot.slane %v3218_v16, %v796_v5  ;;  %v3647_v25 = vrot.slane %v3223_v17, %v796_v5 }
 0x122   : > { %708 = vrot.lane.b32.xlu1 %v3269_v38, %s2961_s10  ;;  %1167 = vmatprep.subr.bf16.mxu0 %v620_v30 }
 0x123   : > { %706 = vrot.lane.b32.xlu0 %v3259_v36, %s2961_s10  ;;  %1168 = vmatpush1.bf16.msra.mxu0 %v619_v31 }
 0x124   : > { %v717_v32 = vpop.permute.xlu1 %716  ;;  %v715_v33 = vpop.permute.xlu0 %714 }
 0x125   : > { %v724_v35 = vsel %vm718_vm2, %v705_v28, %v717_v32  ;;  %v730_v48 = vsel %vm718_vm2, %v717_v32, %v705_v28  ;;  %v723_v51 = vsel %vm718_vm2, %v703_v29, %v715_v33  ;;  %v729_v52 = vsel %vm718_vm2, %v715_v33, %v703_v29 }
 0x126   : > { %v749_v57 = vmul.f32 %v3550_v59, %v724_v35  ;;  %v750_v60 = vmul.f32 %v3547_v58, %v730_v48  ;;  %v747_v61 = vmul.f32 %v3550_v59, %v723_v51  ;;  %v748_v62 = vmul.f32 %v3547_v58, %v729_v52  ;;  %893 = vrot.lane.b32.xlu1 %v3290_v44, %s4763_s21 }
 0x127   : > { %891 = vrot.lane.b32.xlu0 %v3296_v45, %s4763_s21 }
 0x128   : > { %v569_v63 = vpop.permute.xlu1 %568  ;;  %v567_v0 = vpop.permute.xlu0 %566  ;;  %v756_v1 = vpack.c.bf16 %v750_v60, %v748_v62  ;;  %v755_v2 = vpack.c.bf16 %v749_v57, %v747_v61 }
 0x12a   : > { %905 = vrot.lane.b32.xlu1 %v3302_v46, %s4763_s21  ;;  %1270 = vmatprep.subr.bf16.mxu1 %v756_v1 }
 0x12b   : > { %903 = vrot.lane.b32.xlu0 %v3304_v47, %s4763_s21  ;;  %1271 = vmatpush1.bf16.msra.mxu1 %v755_v2 }
 0x12c   : > { %v581_v3 = vpop.permute.xlu1 %580  ;;  %v579_v4 = vpop.permute.xlu0 %578 }
 0x12d   : > { %v590_v6 = vsel %vm586_vm3, %v569_v63, %v581_v3  ;;  %v596_v7 = vsel %vm586_vm3, %v581_v3, %v569_v63  ;;  %v589_v8 = vsel %vm586_vm3, %v567_v0, %v579_v4  ;;  %v595_v9 = vsel %vm586_vm3, %v579_v4, %v567_v0 }
 0x12e   : > { %v613_v10 = vmul.f32 %v3575_v11, %v596_v7  ;;  %v614_v13 = vmul.f32 %v3578_v12, %v590_v6  ;;  %v611_v14 = vmul.f32 %v3575_v11, %v595_v9  ;;  %v612_v15 = vmul.f32 %v3578_v12, %v589_v8 }
 0x130   : > { %v760_v20 = vpop.permute.xlu1 %759  ;;  %v758_v21 = vpop.permute.xlu0 %757  ;;  %v622_v22 = vpack.c.bf16 %v614_v13, %v612_v15  ;;  %v621_v23 = vpack.c.bf16 %v613_v10, %v611_v14  ;;  %v664_v14 = vsub.s32 3, %v3394_v49 }
 0x132   : > { %1169 = vmatprep.subr.bf16.mxu0 %v622_v22 }
 0x133   : > { %1170 = vmatpush1.bf16.msra.mxu0 %v621_v23 }
 0x134   : > { %v772_v26 = vpop.permute.xlu1 %771  ;;  %v770_v27 = vpop.permute.xlu0 %769 }
 0x135   : > { %v783_v28 = vsel %vm781_vm5, %v760_v20, %v772_v26  ;;  %v789_v29 = vsel %vm781_vm5, %v772_v26, %v760_v20  ;;  %v782_v30 = vsel %vm781_vm5, %v758_v21, %v770_v27  ;;  %v788_v31 = vsel %vm781_vm5, %v770_v27, %v758_v21 }
 0x136   : > { %v804_v32 = vmul.f32 %v3644_v24, %v783_v28  ;;  %v805_v33 = vmul.f32 %v3647_v25, %v789_v29  ;;  %v802_v34 = vmul.f32 %v3644_v24, %v782_v30  ;;  %v803_v35 = vmul.f32 %v3647_v25, %v788_v31 }
 0x138   : > { %v573_v48 = vpop.permute.xlu1 %572  ;;  %v571_v51 = vpop.permute.xlu0 %570  ;;  %v815_v52 = vpack.c.bf16 %v805_v33, %v803_v35  ;;  %v814_v57 = vpack.c.bf16 %v804_v32, %v802_v34  ;;  %v3688_v33 = vrot.slane %v3218_v16, %v664_v14  ;;  %v3691_v34 = vrot.slane %v3223_v17, %v664_v14 }
 0x13a   : > { %1272 = vmatprep.subr.bf16.mxu1 %v815_v52 }
 0x13b   : > { %1273 = vmatpush1.bf16.msra.mxu1 %v814_v57 }
 0x13c   : > { %v585_v60 = vpop.permute.xlu1 %584  ;;  %v583_v61 = vpop.permute.xlu0 %582 }
 0x13d   : > { %v592_v62 = vsel %vm586_vm3, %v573_v48, %v585_v60  ;;  %v598_v63 = vsel %vm586_vm3, %v585_v60, %v573_v48  ;;  %v591_v0 = vsel %vm586_vm3, %v571_v51, %v583_v61  ;;  %v597_v1 = vsel %vm586_vm3, %v583_v61, %v571_v51 }
 0x13e   : > { %v617_v2 = vmul.f32 %v3575_v11, %v598_v63  ;;  %v618_v3 = vmul.f32 %v3578_v12, %v592_v62  ;;  %v615_v4 = vmul.f32 %v3575_v11, %v597_v1  ;;  %v616_v5 = vmul.f32 %v3578_v12, %v591_v0 }
 0x140   : > { %v764_v6 = vpop.permute.xlu1 %763  ;;  %v762_v7 = vpop.permute.xlu0 %761  ;;  %v624_v8 = vpack.c.bf16 %v618_v3, %v616_v5  ;;  %v623_v9 = vpack.c.bf16 %v617_v2, %v615_v4 }
 0x142   : > { %1171 = vmatprep.subr.bf16.mxu0 %v624_v8 }
 0x143   : > { %1172 = vmatpush1.bf16.msra.mxu0 %v623_v9 }
 0x144   : > { %v776_v10 = vpop.permute.xlu1 %775  ;;  %v774_v13 = vpop.permute.xlu0 %773 }
 0x145   : > { %v785_v15 = vsel %vm781_vm5, %v764_v6, %v776_v10  ;;  %v791_v20 = vsel %vm781_vm5, %v776_v10, %v764_v6  ;;  %v784_v21 = vsel %vm781_vm5, %v762_v7, %v774_v13  ;;  %v790_v22 = vsel %vm781_vm5, %v774_v13, %v762_v7 }
 0x146   : > { %v808_v23 = vmul.f32 %v3644_v24, %v785_v15  ;;  %v809_v26 = vmul.f32 %v3647_v25, %v791_v20  ;;  %v806_v27 = vmul.f32 %v3644_v24, %v784_v21  ;;  %v807_v28 = vmul.f32 %v3647_v25, %v790_v22 }
 0x148   : > { %v628_v29 = vpop.permute.xlu1 %627  ;;  %v626_v30 = vpop.permute.xlu0 %625  ;;  %v817_v31 = vpack.c.bf16 %v809_v26, %v807_v28  ;;  %v816_v32 = vpack.c.bf16 %v808_v23, %v806_v27 }
 0x14a   : > { %1274 = vmatprep.subr.bf16.mxu1 %v817_v31  ;;  %v859_v31 = vsub.s32 7, %v3394_v49 }
 0x14b   : > { %1275 = vmatpush1.bf16.msra.mxu1 %v816_v32 }
 0x14c   : > { %v640_v35 = vpop.permute.xlu1 %639  ;;  %v638_v48 = vpop.permute.xlu0 %637 }
 0x14d   : > { %v651_v51 = vsel %vm649_vm6, %v628_v29, %v640_v35  ;;  %v657_v52 = vsel %vm649_vm6, %v640_v35, %v628_v29  ;;  %v650_v57 = vsel %vm649_vm6, %v626_v30, %v638_v48  ;;  %v656_v60 = vsel %vm649_vm6, %v638_v48, %v626_v30 }
 0x14e   : > { %v672_v61 = vmul.f32 %v3688_v33, %v657_v52  ;;  %v673_v62 = vmul.f32 %v3691_v34, %v651_v51  ;;  %v670_v63 = vmul.f32 %v3688_v33, %v656_v60  ;;  %v671_v0 = vmul.f32 %v3691_v34, %v650_v57 }
 0x150   : > { %v768_v1 = vpop.permute.xlu1 %767  ;;  %v766_v2 = vpop.permute.xlu0 %765  ;;  %v683_v3 = vpack.c.bf16 %v673_v62, %v671_v0  ;;  %v682_v4 = vpack.c.bf16 %v672_v61, %v670_v63  ;;  %v3732_v0 = vrot.slane %v3218_v16, %v859_v31 }
 0x152   : > { %1173 = vmatprep.subr.bf16.mxu0 %v683_v3  ;;  %4815 = vst [vmem:[#allocation26_spill] sm:$0xff] %v3732_v0 }
 0x153   : > { %1174 = vmatpush1.bf16.msra.mxu0 %v682_v4 }
 0x154   : > { %v780_v5 = vpop.permute.xlu1 %779  ;;  %v778_v6 = vpop.permute.xlu0 %777 }
 0x155   : > { %v787_v7 = vsel %vm781_vm5, %v768_v1, %v780_v5  ;;  %v793_v8 = vsel %vm781_vm5, %v780_v5, %v768_v1  ;;  %v786_v9 = vsel %vm781_vm5, %v766_v2, %v778_v6  ;;  %v792_v10 = vsel %vm781_vm5, %v778_v6, %v766_v2 }
 0x156   : > { %v812_v13 = vmul.f32 %v3644_v24, %v787_v7  ;;  %v813_v14 = vmul.f32 %v3647_v25, %v793_v8  ;;  %v810_v15 = vmul.f32 %v3644_v24, %v786_v9  ;;  %v811_v20 = vmul.f32 %v3647_v25, %v792_v10 }
 0x157   : > { %v3735_v1 = vrot.slane %v3223_v17, %v859_v31 }
 0x158   : > { %v632_v21 = vpop.permute.xlu1 %631  ;;  %v630_v22 = vpop.permute.xlu0 %629  ;;  %v819_v23 = vpack.c.bf16 %v813_v14, %v811_v20  ;;  %v818_v26 = vpack.c.bf16 %v812_v13, %v810_v15 }
 0x159   : > { %4816 = vst [vmem:[#allocation27_spill] sm:$0xff] %v3735_v1 }
 0x15a   : > { %1276 = vmatprep.subr.bf16.mxu1 %v819_v23 }
 0x15b   : > { %1277 = vmatpush1.bf16.msra.mxu1 %v818_v26 }
 0x15c   : > { %v644_v27 = vpop.permute.xlu1 %643 }
 0x15d   : > { %v653_v28 = vsel %vm649_vm6, %v632_v21, %v644_v27  ;;  %v659_v29 = vsel %vm649_vm6, %v644_v27, %v632_v21  ;;  %v642_v30 = vpop.permute.xlu0 %641 }
 0x15e   : > { %v676_v32 = vmul.f32 %v3688_v33, %v659_v29  ;;  %v677_v35 = vmul.f32 %v3691_v34, %v653_v28  ;;  %v652_v48 = vsel %vm649_vm6, %v630_v22, %v642_v30  ;;  %v658_v51 = vsel %vm649_vm6, %v642_v30, %v630_v22 }
 0x15f   : > { %v674_v52 = vmul.f32 %v3688_v33, %v658_v51  ;;  %v675_v57 = vmul.f32 %v3691_v34, %v652_v48 }
 0x160   : > { %v823_v60 = vpop.permute.xlu1 %822 }
 0x161   : > { %v821_v61 = vpop.permute.xlu0 %820  ;;  %v685_v62 = vpack.c.bf16 %v677_v35, %v675_v57  ;;  %v684_v63 = vpack.c.bf16 %v676_v32, %v674_v52  ;;  %v689_v52 = vpack.c.bf16 %v3269_v38, %v3259_v36 }
 0x163   : > { %1175 = vmatprep.subr.bf16.mxu0 %v685_v62 }
 0x164   : > { %1176 = vmatpush1.bf16.msra.mxu0 %v684_v63  ;;  %v835_v2 = vpop.permute.xlu1 %834 }
 0x165   : > { %v846_v3 = vsel %vm844_vm7, %v823_v60, %v835_v2  ;;  %v852_v4 = vsel %vm844_vm7, %v835_v2, %v823_v60  ;;  %v833_v5 = vpop.permute.xlu0 %832  ;;  %v688_v60 = vpack.c.bf16 %v3272_v39, %v3262_v37  ;;  %v691_v2 = vpack.c.bf16 %v3282_v42, %v3288_v43 }
 0x166   : > { %v867_v6 = vmul.f32 %v3732_v0, %v846_v3  ;;  %v868_v7 = vmul.f32 %v3735_v1, %v852_v4  ;;  %v845_v16 = vsel %vm844_vm7, %v821_v61, %v833_v5  ;;  %v851_v17 = vsel %vm844_vm7, %v833_v5, %v821_v61 }
 0x167   : > { %v865_v8 = vmul.f32 %v3732_v0, %v845_v16  ;;  %v866_v9 = vmul.f32 %v3735_v1, %v851_v17  ;;  %v693_v16 = vpack.c.bf16 %v3302_v46, %v3304_v47 }
 0x168   : > { %v636_v10 = vpop.permute.xlu1 %635 }
 0x169   : > { %v634_v13 = vpop.permute.xlu0 %633  ;;  %v878_v14 = vpack.c.bf16 %v868_v7, %v866_v9  ;;  %v877_v15 = vpack.c.bf16 %v867_v6, %v865_v8  ;;  %v690_v6 = vpack.c.bf16 %v3274_v40, %v3280_v41  ;;  %v692_v8 = vpack.c.bf16 %v3290_v44, %v3296_v45 }
 0x16b   : > { %1278 = vmatprep.subr.bf16.mxu1 %v878_v14 }
 0x16c   : > { %1279 = vmatpush1.bf16.msra.mxu1 %v877_v15  ;;  %v648_v20 = vpop.permute.xlu1 %647 }
 0x16d   : > { %v655_v21 = vsel %vm649_vm6, %v636_v10, %v648_v20  ;;  %v661_v22 = vsel %vm649_vm6, %v648_v20, %v636_v10  ;;  %v646_v23 = vpop.permute.xlu0 %645 }
 0x16e   : > { %v680_v26 = vmul.f32 %v3688_v33, %v661_v22  ;;  %v681_v27 = vmul.f32 %v3691_v34, %v655_v21  ;;  %v654_v28 = vsel %vm649_vm6, %v634_v13, %v646_v23  ;;  %v660_v29 = vsel %vm649_vm6, %v646_v23, %v634_v13 }
 0x16f   : > { %v678_v30 = vmul.f32 %v3688_v33, %v660_v29  ;;  %v679_v31 = vmul.f32 %v3691_v34, %v654_v28 }
 0x170   : > { %v827_v32 = vpop.permute.xlu1 %826 }
 0x171   : > { %v825_v35 = vpop.permute.xlu0 %824  ;;  %v687_v48 = vpack.c.bf16 %v681_v27, %v679_v31  ;;  %v686_v51 = vpack.c.bf16 %v680_v26, %v678_v30 }
 0x173   : > { %1177 = vmatprep.subr.bf16.mxu0 %v687_v48 }
 0x174   : > { %1178 = vmatpush1.bf16.msra.mxu0 %v686_v51  ;;  %v839_v57 = vpop.permute.xlu1 %838 }
 0x175   : > { %v848_v61 = vsel %vm844_vm7, %v827_v32, %v839_v57  ;;  %v854_v62 = vsel %vm844_vm7, %v839_v57, %v827_v32  ;;  %v837_v63 = vpop.permute.xlu0 %836  ;;  %1179 = vmatprep.subr.bf16.mxu0 %v689_v52 }
 0x176   : > { %v871_v3 = vmul.f32 %v3732_v0, %v848_v61  ;;  %v872_v36 = vmul.f32 %v3735_v1, %v854_v62  ;;  %v847_v38 = vsel %vm844_vm7, %v825_v35, %v837_v63  ;;  %v853_v37 = vsel %vm844_vm7, %v837_v63, %v825_v35 }
 0x177   : > { %v869_v39 = vmul.f32 %v3732_v0, %v847_v38  ;;  %v870_v4 = vmul.f32 %v3735_v1, %v853_v37 }
 0x178   : > { %v831_v5 = vpop.permute.xlu1 %830  ;;  %1180 = vmatpush1.bf16.msra.mxu0 %v688_v60 }
 0x179   : > { %v829_v42 = vpop.permute.xlu0 %828  ;;  %v880_v43 = vpack.c.bf16 %v872_v36, %v870_v4  ;;  %v879_v7 = vpack.c.bf16 %v871_v3, %v869_v39  ;;  %1181 = vmatprep.subr.bf16.mxu0 %v691_v2 }
 0x17b   : > { %1280 = vmatprep.subr.bf16.mxu1 %v880_v43 }
 0x17c   : > { %1281 = vmatpush1.bf16.msra.mxu1 %v879_v7  ;;  %v843_v17 = vpop.permute.xlu1 %842  ;;  %1182 = vmatpush1.bf16.msra.mxu0 %v690_v6 }
 0x17d   : > { %v850_v9 = vsel %vm844_vm7, %v831_v5, %v843_v17  ;;  %v856_v40 = vsel %vm844_vm7, %v843_v17, %v831_v5  ;;  %v841_v41 = vpop.permute.xlu0 %840  ;;  %1183 = vmatprep.subr.bf16.mxu0 %v693_v16 }
 0x17e   : > { %v875_v10 = vmul.f32 %v3732_v0, %v850_v9  ;;  %v876_v13 = vmul.f32 %v3735_v1, %v856_v40  ;;  %v849_v46 = vsel %vm844_vm7, %v829_v42, %v841_v41  ;;  %v855_v47 = vsel %vm844_vm7, %v841_v41, %v829_v42 }
 0x17f   : > { %v873_v44 = vmul.f32 %v3732_v0, %v849_v46  ;;  %v874_v45 = vmul.f32 %v3735_v1, %v855_v47 }
 0x180   : > { %v886_v14 = vpop.permute.xlu1 %885  ;;  %1184 = vmatpush1.bf16.msra.mxu0 %v692_v8 }
 0x181   : > { %v884_v15 = vpop.permute.xlu0 %883  ;;  %v882_v20 = vpack.c.bf16 %v876_v13, %v874_v45  ;;  %v881_v21 = vpack.c.bf16 %v875_v10, %v873_v44 }
 0x183   : > { %1282 = vmatprep.subr.bf16.mxu1 %v882_v20  ;;  %v2593_v20 = vld [vmem:[%s4744_s2 + $0x24] ss:$16 sps:$4 sm:$0xff]  }
 0x184   : > { %1283 = vmatpush1.bf16.msra.mxu1 %v881_v21  ;;  %v898_v22 = vpop.permute.xlu1 %897 }
 0x185   : > { %v909_v23 = vsel %vm907_vm8, %v886_v14, %v898_v22  ;;  %v915_v26 = vsel %vm907_vm8, %v898_v22, %v886_v14  ;;  %v896_v27 = vpop.permute.xlu0 %895  ;;  %v2587_v14 = vld [vmem:[%s4744_s2] ss:$16 sps:$4 sm:$0xff]  }
 0x186   : > { %v930_v28 = vmul.f32 %v3228_v18, %v909_v23  ;;  %v931_v29 = vmul.f32 %v3233_v19, %v915_v26  ;;  %v908_v30 = vsel %vm907_vm8, %v884_v15, %v896_v27  ;;  %v914_v31 = vsel %vm907_vm8, %v896_v27, %v884_v15 }
 0x187   : > { %v928_v32 = vmul.f32 %v3228_v18, %v908_v30  ;;  %v929_v35 = vmul.f32 %v3233_v19, %v914_v31 }
 0x188   : > { %v890_v48 = vpop.permute.xlu1 %889 }
 0x189   : > { %v888_v51 = vpop.permute.xlu0 %887  ;;  %v941_v52 = vpack.c.bf16 %v931_v29, %v929_v35  ;;  %v940_v57 = vpack.c.bf16 %v930_v28, %v928_v32 }
 0x18b   : > { %1284 = vmatprep.subr.bf16.mxu1 %v941_v52  ;;  %v2596_v52 = vld [vmem:[%s4744_s2 + $0x2c] ss:$16 sps:$4 sm:$0xff]  }
 0x18c   : > { %1285 = vmatpush1.bf16.msra.mxu1 %v940_v57  ;;  %v902_v60 = vpop.permute.xlu1 %901  ;;  %v2599_v57 = vld [vmem:[%s4744_s2 + $0x44] ss:$16 sps:$4 sm:$0xff]  }
 0x18d   : > { %v911_v61 = vsel %vm907_vm8, %v890_v48, %v902_v60  ;;  %v917_v62 = vsel %vm907_vm8, %v902_v60, %v890_v48  ;;  %v900_v63 = vpop.permute.xlu0 %899  ;;  %v2590_v48 = vld [vmem:[%s4744_s2 + $0x8] ss:$16 sps:$4 sm:$0xff]  }
 0x18e   : > { %v934_v2 = vmul.f32 %v3228_v18, %v911_v61  ;;  %v935_v3 = vmul.f32 %v3233_v19, %v917_v62  ;;  %v910_v36 = vsel %vm907_vm8, %v888_v51, %v900_v63  ;;  %v916_v38 = vsel %vm907_vm8, %v900_v63, %v888_v51  ;;  %v2595_v51 = vld [vmem:[%s4744_s2 + $0x20] ss:$16 sps:$4 sm:$0xff]   ;;  %v2598_v60 = vld [vmem:[%s4744_s2 + $0x28] ss:$16 sps:$4 sm:$0xff]   ;;  %v2602_v62 = vld [vmem:[%s4744_s2 + $0x4c] ss:$16 sps:$4 sm:$0xff]  }
 0x18f   : > { %v932_v37 = vmul.f32 %v3228_v18, %v910_v36  ;;  %v933_v39 = vmul.f32 %v3233_v19, %v916_v38  ;;  %v2601_v61 = vld [vmem:[%s4744_s2 + $0x40] ss:$16 sps:$4 sm:$0xff]   ;;  %v2605_v63 = vld [vmem:[%s4744_s2 + $0x64] ss:$16 sps:$4 sm:$0xff]   ;;  %v2608_v36 = vld [vmem:[%s4744_s2 + $0x6c] ss:$16 sps:$4 sm:$0xff]  }
 0x190   : > { %v697_v4 = vpop.permute.xlu1 %696  ;;  %v2611_v38 = vld [vmem:[%s4744_s2 + $0x84] ss:$16 sps:$4 sm:$0xff]  }
 0x191   : > { %v695_v5 = vpop.permute.xlu0 %694  ;;  %v943_v6 = vpack.c.bf16 %v935_v3, %v933_v39  ;;  %v942_v42 = vpack.c.bf16 %v934_v2, %v932_v37  ;;  %v2604_v2 = vld [vmem:[%s4744_s2 + $0x48] ss:$16 sps:$4 sm:$0xff]   ;;  %v2607_v3 = vld [vmem:[%s4744_s2 + $0x60] ss:$16 sps:$4 sm:$0xff]  }
 0x192   : > { %v2610_v37 = vld [vmem:[%s4744_s2 + $0x68] ss:$16 sps:$4 sm:$0xff]   ;;  %v2613_v39 = vld [vmem:[%s4744_s2 + $0x80] ss:$16 sps:$4 sm:$0xff]  }
 0x193   : > { %1286 = vmatprep.subr.bf16.mxu1 %v943_v6  ;;  %v2616_v6 = vld [vmem:[%s4744_s2 + $0x88] ss:$16 sps:$4 sm:$0xff]  }
 0x194   : > { %1287 = vmatpush1.bf16.msra.mxu1 %v942_v42  ;;  %v709_v43 = vpop.permute.xlu1 %708  ;;  %v2619_v42 = vld [vmem:[%s4744_s2 + $0xa0] ss:$16 sps:$4 sm:$0xff]  }
 0x195   : > { %v720_v7 = vsel %vm718_vm2, %v697_v4, %v709_v43  ;;  %v726_v16 = vsel %vm718_vm2, %v709_v43, %v697_v4  ;;  %v707_v17 = vpop.permute.xlu0 %706  ;;  %v2614_v4 = vld [vmem:[%s4744_s2 + $0x8c] ss:$16 sps:$4 sm:$0xff]  }
 0x196   : > { %v741_v8 = vmul.f32 %v3550_v59, %v720_v7  ;;  %v742_v9 = vmul.f32 %v3547_v58, %v726_v16  ;;  %v719_v40 = vsel %vm718_vm2, %v695_v5, %v707_v17  ;;  %v725_v41 = vsel %vm718_vm2, %v707_v17, %v695_v5  ;;  %v2617_v5 = vld [vmem:[%s4744_s2 + $0xa4] ss:$16 sps:$4 sm:$0xff]   ;;  %v2620_v43 = vld [vmem:[%s4744_s2 + $0xac] ss:$16 sps:$4 sm:$0xff]   ;;  %v2622_v16 = vld [vmem:[%s4744_s2 + $0xa8] ss:$16 sps:$4 sm:$0xff]  }
 0x197   : > { %v739_v10 = vmul.f32 %v3550_v59, %v719_v40  ;;  %v740_v13 = vmul.f32 %v3547_v58, %v725_v41  ;;  %v2623_v7 = vld [vmem:[%s4744_s2 + $0xc4] ss:$16 sps:$4 sm:$0xff]   ;;  %v2625_v17 = vld [vmem:[%s4744_s2 + $0xc0] ss:$16 sps:$4 sm:$0xff]   ;;  %v2628_v40 = vld [vmem:[%s4744_s2 + $0xc8] ss:$16 sps:$4 sm:$0xff]  }
 0x198   : > { %v894_v46 = vpop.permute.xlu1 %893  ;;  %v2633_v41 = vld [vmem:[%s4744_s2 + $0xe0] ss:$16 sps:$4 sm:$0xff]  }
 0x199   : > { %v892_v47 = vpop.permute.xlu0 %891  ;;  %v752_v44 = vpack.c.bf16 %v742_v9, %v740_v13  ;;  %v751_v45 = vpack.c.bf16 %v741_v8, %v739_v10  ;;  %v2626_v8 = vld [vmem:[%s4744_s2 + $0xcc] ss:$16 sps:$4 sm:$0xff]   ;;  %v2629_v9 = vld [vmem:[%s4744_s2 + $0xe4] ss:$16 sps:$4 sm:$0xff]   ;;  %v2634_v13 = vld [vmem:[%s4744_s2 + $0xe8] ss:$16 sps:$4 sm:$0xff]  }
 0x19a   : > { %v2631_v10 = vld [vmem:[%s4744_s2 + $0xec] ss:$16 sps:$4 sm:$0xff]  }
 0x19b   : > { %1185 = vmatprep.subr.bf16.mxu0 %v752_v44 }
 0x19c   : > { %1186 = vmatpush1.bf16.msra.mxu0 %v751_v45  ;;  %v906_v15 = vpop.permute.xlu1 %905 }
 0x19d   : > { %v913_v21 = vsel %vm907_vm8, %v894_v46, %v906_v15  ;;  %v919_v22 = vsel %vm907_vm8, %v906_v15, %v894_v46  ;;  %v904_v23 = vpop.permute.xlu0 %903  ;;  %v4771_v46 = vmov 0.0  }
 0x19e   : > { %v938_v26 = vmul.f32 %v3228_v18, %v913_v21  ;;  %v939_v27 = vmul.f32 %v3233_v19, %v919_v22  ;;  %v912_v28 = vsel %vm907_vm8, %v892_v47, %v904_v23  ;;  %v918_v29 = vsel %vm907_vm8, %v904_v23, %v892_v47 }
 0x19f   : > { %v936_v30 = vmul.f32 %v3228_v18, %v912_v28  ;;  %v937_v31 = vmul.f32 %v3233_v19, %v918_v29  ;;  %1188 = vmatmul.mubr.bf16.vlgmr.msra.gmra.mrb[0].mxu0 %v2587_v14  ;;  %v1594_v47 = vsel %vm1592_vm9, 1.0, %v4771_v46 }
 0x1a0   : > { %1197 = vmatprep.mubr.bf16.mxu0 %v2593_v20  ;;  %v3948_v44 = vpack.i.bf16 %v4771_v46, %v1594_v47 }
 0x1a1   : > { %v945_v32 = vpack.c.bf16 %v939_v27, %v937_v31  ;;  %v944_v35 = vpack.c.bf16 %v938_v26, %v936_v30 }
 0x1a2   : > { %2553 = vrot.lane.b32.xlu1 %v3948_v44, %s2960_s15  ;;  %2548 = vrot.lane.b32.xlu0 %v3948_v44, %s2959_s26 }
 0x1a3   : > { %1288 = vmatprep.subr.bf16.mxu1 %v945_v32 }
 0x1a4   : > { %1289 = vmatpush1.bf16.msra.mxu1 %v944_v35 }
 0x1a6   : > { %2563 = vrot.lane.b32.xlu1 %v3948_v44, %s2962_s11  ;;  %2558 = vrot.lane.b32.xlu0 %v3948_v44, %s2961_s10 }
 0x1a7   : > { %1301 = vmatmul.mubr.bf16.vlgmr.msra.gmra.mrb[0].mxu1 %v2590_v48  ;;  %1198 = vmatmul.mubr.bf16.gmra.mrb[4].mxu0 %v2595_v51 }
 0x1a8   : > { %2341 = vmatprep.mubr.msk.bf16.mxu1 %vm1130_vm4, %v2596_v52  ;;  %1207 = vmatprep.mubr.bf16.mxu0 %v2599_v57 }
 0x1af   : > { %1311 = vmatmul.mubr.bf16.gmra.mrb[4].mxu1 %v2598_v60  ;;  %1208 = vmatmul.mubr.bf16.gmra.mrb[8].mxu0 %v2601_v61 }
 0x1b0   : > { %2342 = vmatprep.mubr.msk.bf16.mxu1 %vm1130_vm4, %v2602_v62  ;;  %1217 = vmatprep.mubr.bf16.mxu0 %v2605_v63 }
 0x1b7   : > { %1321 = vmatmul.mubr.bf16.gmra.mrb[8].mxu1 %v2604_v2  ;;  %1218 = vmatmul.mubr.bf16.gmra.mrb[12].mxu0 %v2607_v3 }
 0x1b8   : > { %2343 = vmatprep.mubr.msk.bf16.mxu1 %vm1130_vm4, %v2608_v36  ;;  %1227 = vmatprep.mubr.bf16.mxu0 %v2611_v38 }
 0x1bf   : > { %1331 = vmatmul.mubr.bf16.gmra.mrb[12].mxu1 %v2610_v37  ;;  %1228 = vmatmul.mubr.bf16.gmra.mrb[16].mxu0 %v2613_v39 }
 0x1c0   : > { %2344 = vmatprep.mubr.msk.bf16.mxu1 %vm1130_vm4, %v2614_v4  ;;  %1237 = vmatprep.mubr.bf16.mxu0 %v2617_v5 }
 0x1c7   : > { %1341 = vmatmul.mubr.bf16.gmra.mrb[16].mxu1 %v2616_v6  ;;  %1238 = vmatmul.mubr.bf16.gmra.mrb[20].mxu0 %v2619_v42 }
 0x1c8   : > { %2345 = vmatprep.mubr.msk.bf16.mxu1 %vm1130_vm4, %v2620_v43  ;;  %1247 = vmatprep.mubr.bf16.mxu0 %v2623_v7 }
 0x1cf   : > { %1351 = vmatmul.mubr.bf16.gmra.mrb[20].mxu1 %v2622_v16  ;;  %1248 = vmatmul.mubr.bf16.gmra.mrb[24].mxu0 %v2625_v17 }
 0x1d0   : > { %2346 = vmatprep.mubr.msk.bf16.mxu1 %vm1130_vm4, %v2626_v8  ;;  %1257 = vmatprep.mubr.bf16.mxu0 %v2629_v9 }
 0x1d7   : > { %1361 = vmatmul.mubr.bf16.gmra.mrb[24].mxu1 %v2628_v40  ;;  %1258 = vmatmul.mubr.bf16.gmra.mrb[28].mxu0 %v2633_v41 }
 0x1d8   : > { %2347 = vmatprep.mubr.msk.bf16.mxu1 %vm1130_vm4, %v2631_v10 }
 0x1df   : > { %1371 = vmatmul.mubr.bf16.gmra.mrb[28].mxu1 %v2634_v13 }
 0x272   : > { %v1189_v45 = vpop.f32.mrb[0].mxu0 }
 0x273   : > { %v1191_v14 = vpop.f32.mrb[1].mxu0 }
 0x274   : > { %v1193_v15 = vpop.f32.mrb[2].mxu0 }
 0x275   : > { %v1195_v20 = vpop.f32.mrb[3].mxu0 }
 0x27a   : > { %v1302_v21 = vpop.f32.mrb[0].mxu1  ;;  %v1199_v22 = vpop.f32.mrb[4].mxu0 }
 0x27b   : > { %v1303_v23 = vadd.f32 %v1302_v21, %v1189_v45  ;;  %v1304_v26 = vpop.f32.mrb[1].mxu1  ;;  %v1201_v27 = vpop.f32.mrb[5].mxu0 }
 0x27c   : > { %v1305_v28 = vadd.f32 %v1304_v26, %v1191_v14  ;;  %v1306_v29 = vpop.f32.mrb[2].mxu1  ;;  %v1203_v30 = vpop.f32.mrb[6].mxu0 }
 0x27d   : > { %v1307_v31 = vadd.f32 %v1306_v29, %v1193_v15  ;;  %v1308_v32 = vpop.f32.mrb[3].mxu1  ;;  %v1205_v35 = vpop.f32.mrb[7].mxu0  ;;  %v2348_v51 = vmul.f32 -1.442695, %v1303_v23 }
 0x27e   : > { %v1309_v48 = vadd.f32 %v1308_v32, %v1195_v20  ;;  %v2349_v60 = vmul.f32 -1.442695, %v1305_v28 }
 0x27f   : > { %v2350_v2 = vmul.f32 -1.442695, %v1307_v31  ;;  %2639 = vpow2.f32 %v2348_v51 }
 0x280   : > { %2641 = vpow2.f32 %v2349_v60  ;;  %v2351_v6 = vmul.f32 -1.442695, %v1309_v48 }
 0x281   : > { %2643 = vpow2.f32 %v2350_v2 }
 0x282   : > { %v1312_v52 = vpop.f32.mrb[4].mxu1  ;;  %v1209_v57 = vpop.f32.mrb[8].mxu0  ;;  %2645 = vpow2.f32 %v2351_v6 }
 0x283   : > { %v1313_v61 = vadd.f32 %v1312_v52, %v1199_v22  ;;  %v1314_v62 = vpop.f32.mrb[5].mxu1  ;;  %v1211_v63 = vpop.f32.mrb[9].mxu0 }
 0x284   : > { %v1315_v3 = vadd.f32 %v1314_v62, %v1201_v27  ;;  %v1316_v36 = vpop.f32.mrb[6].mxu1  ;;  %v1213_v38 = vpop.f32.mrb[10].mxu0 }
 0x285   : > { %v1317_v37 = vadd.f32 %v1316_v36, %v1203_v30  ;;  %v1318_v39 = vpop.f32.mrb[7].mxu1  ;;  %v1215_v4 = vpop.f32.mrb[11].mxu0  ;;  %v2352_v42 = vmul.f32 -1.442695, %v1313_v61 }
 0x286   : > { %v1319_v5 = vadd.f32 %v1318_v39, %v1205_v35  ;;  %v2353_v16 = vmul.f32 -1.442695, %v1315_v3 }
 0x287   : > { %v2354_v40 = vmul.f32 -1.442695, %v1317_v37  ;;  %2647 = vpow2.f32 %v2352_v42 }
 0x288   : > { %v2355_v47 = vmul.f32 -1.442695, %v1319_v5  ;;  %2649 = vpow2.f32 %v2353_v16 }
 0x289   : > { %v2640_v23 = vpop.eup %2639  ;;  %2651 = vpow2.f32 %v2354_v40 }
 0x28a   : > { %v1322_v43 = vpop.f32.mrb[8].mxu1  ;;  %v1219_v7 = vpop.f32.mrb[12].mxu0  ;;  %2653 = vpow2.f32 %v2355_v47  ;;  %v1405_v32 = vadd.f32 1.0, %v2640_v23 }
 0x28b   : > { %v1323_v17 = vadd.f32 %v1322_v43, %v1209_v57  ;;  %v1324_v8 = vpop.f32.mrb[9].mxu1  ;;  %v1221_v9 = vpop.f32.mrb[13].mxu0 }
 0x28c   : > { %v1325_v41 = vadd.f32 %v1324_v8, %v1211_v63  ;;  %v1326_v10 = vpop.f32.mrb[10].mxu1  ;;  %v1223_v13 = vpop.f32.mrb[14].mxu0 }
 0x28d   : > { %v1327_v45 = vadd.f32 %v1326_v10, %v1213_v38  ;;  %v1328_v14 = vpop.f32.mrb[11].mxu1  ;;  %v1225_v15 = vpop.f32.mrb[15].mxu0  ;;  %v2356_v20 = vmul.f32 -1.442695, %v1323_v17 }
 0x28e   : > { %v1329_v21 = vadd.f32 %v1328_v14, %v1215_v4  ;;  %v2357_v22 = vmul.f32 -1.442695, %v1325_v41  ;;  %v2642_v27 = vpop.eup %2641 }
 0x28f   : > { %v2358_v26 = vmul.f32 -1.442695, %v1327_v45  ;;  %v2644_v29 = vpop.eup %2643  ;;  %2655 = vpow2.f32 %v2356_v20  ;;  %v1406_v52 = vadd.f32 1.0, %v2642_v27 }
 0x290   : > { %v2359_v28 = vmul.f32 -1.442695, %v1329_v21  ;;  %2657 = vpow2.f32 %v2357_v22  ;;  %v2646_v62 = vpop.eup %2645  ;;  %v1407_v63 = vadd.f32 1.0, %v2644_v29 }
 0x291   : > { %2659 = vpow2.f32 %v2358_v26  ;;  %v2648_v39 = vpop.eup %2647  ;;  %v1408_v5 = vadd.f32 1.0, %v2646_v62 }
 0x292   : > { %v1332_v30 = vpop.f32.mrb[12].mxu1  ;;  %v1229_v31 = vpop.f32.mrb[16].mxu0  ;;  %2661 = vpow2.f32 %v2359_v28 }
 0x293   : > { %v1333_v35 = vadd.f32 %v1332_v30, %v1219_v7  ;;  %v1334_v48 = vpop.f32.mrb[13].mxu1  ;;  %v1231_v51 = vpop.f32.mrb[17].mxu0  ;;  %2663 = vrcp.f32 %v1405_v32  ;;  %v1409_v7 = vadd.f32 1.0, %v2648_v39 }
 0x294   : > { %v1335_v57 = vadd.f32 %v1334_v48, %v1221_v9  ;;  %v1336_v60 = vpop.f32.mrb[14].mxu1  ;;  %v1233_v61 = vpop.f32.mrb[18].mxu0  ;;  %2665 = vrcp.f32 %v1406_v52 }
 0x295   : > { %v1337_v2 = vadd.f32 %v1336_v60, %v1223_v13  ;;  %v1338_v3 = vpop.f32.mrb[15].mxu1  ;;  %v1235_v36 = vpop.f32.mrb[19].mxu0  ;;  %v2360_v38 = vmul.f32 -1.442695, %v1333_v35  ;;  %2667 = vrcp.f32 %v1407_v63 }
 0x296   : > { %v1339_v37 = vadd.f32 %v1338_v3, %v1225_v15  ;;  %v2361_v4 = vmul.f32 -1.442695, %v1335_v57  ;;  %v2650_v6 = vpop.eup %2649 }
 0x297   : > { %v2362_v42 = vmul.f32 -1.442695, %v1337_v2  ;;  %v2652_v43 = vpop.eup %2651  ;;  %2669 = vpow2.f32 %v2360_v38  ;;  %v1410_v47 = vadd.f32 1.0, %v2650_v6 }
 0x298   : > { %v2654_v8 = vpop.eup %2653  ;;  %2671 = vpow2.f32 %v2361_v4  ;;  %v2363_v9 = vmul.f32 -1.442695, %v1339_v37  ;;  %v1411_v21 = vadd.f32 1.0, %v2652_v43 }
 0x299   : > { %v2656_v13 = vpop.eup %2655  ;;  %2673 = vrcp.f32 %v1408_v5  ;;  %v1412_v28 = vadd.f32 1.0, %v2654_v8 }
 0x29a   : > { %v1342_v16 = vpop.f32.mrb[16].mxu1  ;;  %v1239_v17 = vpop.f32.mrb[20].mxu0  ;;  %2675 = vpow2.f32 %v2362_v42 }
 0x29b   : > { %v1343_v40 = vadd.f32 %v1342_v16, %v1229_v31  ;;  %v1344_v41 = vpop.f32.mrb[17].mxu1  ;;  %v1241_v10 = vpop.f32.mrb[21].mxu0  ;;  %2677 = vrcp.f32 %v1409_v7  ;;  %v1453_v31 = vadd.f32 1.0, %v2656_v13 }
 0x29c   : > { %v1345_v45 = vadd.f32 %v1344_v41, %v1231_v51  ;;  %v1346_v14 = vpop.f32.mrb[18].mxu1  ;;  %v1243_v15 = vpop.f32.mrb[22].mxu0  ;;  %2679 = vpow2.f32 %v2363_v9 }
 0x29d   : > { %v2658_v20 = vpop.eup %2657  ;;  %v1347_v22 = vadd.f32 %v1346_v14, %v1233_v61  ;;  %v1348_v23 = vpop.f32.mrb[19].mxu1  ;;  %2681 = vrcp.f32 %v1410_v47  ;;  %v2364_v62 = vmul.f32 -1.442695, %v1343_v40 }
 0x29e   : > { %v1245_v26 = vpop.f32.mrb[23].mxu0  ;;  %v2660_v27 = vpop.eup %2659  ;;  %v1349_v29 = vadd.f32 %v1348_v23, %v1235_v36  ;;  %v1454_v32 = vadd.f32 1.0, %v2658_v20  ;;  %2683 = vrcp.f32 %v1411_v21  ;;  %v2365_v38 = vmul.f32 -1.442695, %v1345_v45 }
 0x29f   : > { %v2662_v30 = vpop.eup %2661  ;;  %v1455_v48 = vadd.f32 1.0, %v2660_v27  ;;  %2685 = vrcp.f32 %v1412_v28  ;;  %v2366_v6 = vmul.f32 -1.442695, %v1347_v22 }
 0x2a0   : > { %v3958_v35 = vpop.eup %2663  ;;  %v1456_v52 = vadd.f32 1.0, %v2662_v30  ;;  %2687 = vrcp.f32 %v1453_v31  ;;  %v2367_v8 = vmul.f32 -1.442695, %v1349_v29 }
 0x2a1   : > { %v3960_v51 = vpop.eup %2665  ;;  %2689 = vrcp.f32 %v1454_v32 }
 0x2a2   : > { %v1352_v57 = vpop.f32.mrb[20].mxu1  ;;  %v1249_v60 = vpop.f32.mrb[24].mxu0  ;;  %2691 = vrcp.f32 %v1455_v48 }
 0x2a3   : > { %v3962_v61 = vpop.eup %2667  ;;  %v1353_v63 = vadd.f32 %v1352_v57, %v1239_v17  ;;  %v1354_v2 = vpop.f32.mrb[21].mxu1  ;;  %2693 = vrcp.f32 %v1456_v52 }
 0x2a4   : > { %v1251_v3 = vpop.f32.mrb[25].mxu0  ;;  %v2670_v36 = vpop.eup %2669  ;;  %v1355_v37 = vadd.f32 %v1354_v2, %v1241_v10  ;;  %2695 = vpow2.f32 %v2364_v62 }
 0x2a5   : > { %v1356_v39 = vpop.f32.mrb[22].mxu1  ;;  %v1253_v4 = vpop.f32.mrb[26].mxu0  ;;  %v1457_v40 = vadd.f32 1.0, %v2670_v36  ;;  %2697 = vpow2.f32 %v2365_v38  ;;  %v2368_v21 = vmul.f32 -1.442695, %v1353_v63 }
 0x2a6   : > { %v2672_v5 = vpop.eup %2671  ;;  %v1357_v42 = vadd.f32 %v1356_v39, %v1243_v15  ;;  %v1358_v43 = vpop.f32.mrb[23].mxu1  ;;  %2699 = vpow2.f32 %v2366_v6  ;;  %v2369_v48 = vmul.f32 -1.442695, %v1355_v37 }
 0x2a7   : > { %v1255_v7 = vpop.f32.mrb[27].mxu0  ;;  %v3964_v16 = vpop.eup %2673  ;;  %v1359_v9 = vadd.f32 %v1358_v43, %v1245_v26  ;;  %v1458_v13 = vadd.f32 1.0, %v2672_v5  ;;  %2701 = vpow2.f32 %v2367_v8 }
 0x2a8   : > { %v2676_v17 = vpop.eup %2675  ;;  %2703 = vrcp.f32 %v1457_v40  ;;  %v2370_v5 = vmul.f32 -1.442695, %v1357_v42 }
 0x2a9   : > { %v3966_v41 = vpop.eup %2677  ;;  %v1459_v45 = vadd.f32 1.0, %v2676_v17  ;;  %2705 = vrcp.f32 %v1458_v13  ;;  %v2371_v43 = vmul.f32 -1.442695, %v1359_v9 }
 0x2aa   : > { %v2680_v10 = vpop.eup %2679  ;;  %v1362_v14 = vpop.f32.mrb[24].mxu1 }
 0x2ab   : > { %v3968_v47 = vpop.eup %2681  ;;  %v1259_v15 = vpop.f32.mrb[28].mxu0  ;;  %v1363_v22 = vadd.f32 %v1362_v14, %v1249_v60  ;;  %v1460_v28 = vadd.f32 1.0, %v2680_v10  ;;  %v422_v10 = vld [vmem:[#allocation2 + $0x40] sm:$0xff] }
 0x2ac   : > { %v3970_v20 = vpop.eup %2683  ;;  %v1364_v23 = vpop.f32.mrb[25].mxu1 }
 0x2ad   : > { %v1261_v26 = vpop.f32.mrb[29].mxu0  ;;  %v3972_v27 = vpop.eup %2685  ;;  %v1365_v29 = vadd.f32 %v1364_v23, %v1251_v3  ;;  %2707 = vtanh.f32 %v1363_v22 }
 0x2ae   : > { %v1366_v30 = vpop.f32.mrb[26].mxu1  ;;  %v1263_v31 = vpop.f32.mrb[30].mxu0  ;;  %2709 = vrcp.f32 %v1459_v45 }
 0x2af   : > { %v2688_v32 = vpop.eup %2687  ;;  %v1367_v52 = vadd.f32 %v1366_v30, %v1253_v4  ;;  %v1368_v57 = vpop.f32.mrb[27].mxu1  ;;  %2711 = vpow2.f32 %v2368_v21  ;;  %v423_v30 = vld [vmem:[#allocation2 + $0x48] sm:$0xff] }
 0x2b0   : > { %v1265_v62 = vpop.f32.mrb[31].mxu0  ;;  %v2690_v2 = vpop.eup %2689  ;;  %v1369_v36 = vadd.f32 %v1368_v57, %v1255_v7  ;;  %2713 = vrcp.f32 %v1460_v28  ;;  %v424_v57 = vld [vmem:[#allocation2 + $0x50] sm:$0xff] }
 0x2b1   : > { %v2692_v63 = vpop.eup %2691  ;;  %2715 = vpow2.f32 %v2369_v48 }
 0x2b2   : > { %v2694_v60 = vpop.eup %2693  ;;  %2717 = vtanh.f32 %v1365_v29  ;;  %v1372_v3 = vpop.f32.mrb[28].mxu1 }
 0x2b3   : > { %v2696_v38 = vpop.eup %2695  ;;  %2719 = vtanh.f32 %v1367_v52  ;;  %v1373_v37 = vadd.f32 %v1372_v3, %v1259_v15  ;;  %v1374_v4 = vpop.f32.mrb[29].mxu1  ;;  %v1533_v15 = vmul.f32 %v2688_v32, %v422_v10 }
 0x2b4   : > { %v2698_v39 = vpop.eup %2697  ;;  %v1501_v17 = vadd.f32 1.0, %v2696_v38  ;;  %2721 = vtanh.f32 %v1369_v36  ;;  %v1375_v40 = vadd.f32 %v1374_v4, %v1261_v26  ;;  %v1376_v7 = vpop.f32.mrb[30].mxu1  ;;  %v425_v38 = vld [vmem:[#allocation2 + $0x58] sm:$0xff] }
 0x2b5   : > { %v2700_v6 = vpop.eup %2699  ;;  %v1502_v45 = vadd.f32 1.0, %v2698_v39  ;;  %2723 = vtanh.f32 %v1373_v37  ;;  %v1377_v14 = vadd.f32 %v1376_v7, %v1263_v31  ;;  %v1378_v21 = vpop.f32.mrb[31].mxu1  ;;  %v1535_v37 = vmul.f32 %v2692_v63, %v424_v57 }
 0x2b6   : > { %v2702_v8 = vpop.eup %2701  ;;  %2725 = vpow2.f32 %v2370_v5  ;;  %v1379_v42 = vadd.f32 %v1378_v21, %v1265_v62  ;;  %v1503_v48 = vadd.f32 1.0, %v2700_v6  ;;  %v1534_v5 = vmul.f32 %v2690_v2, %v423_v30  ;;  %v427_v21 = vld [vmem:[#allocation2 + $0x68] sm:$0xff] }
 0x2b7   : > { %v2704_v13 = vpop.eup %2703  ;;  %2727 = vpow2.f32 %v2371_v43  ;;  %v1504_v36 = vadd.f32 1.0, %v2702_v8 }
 0x2b8   : > { %v3974_v22 = vpop.eup %2705  ;;  %2729 = vrcp.f32 %v1501_v17  ;;  %v1536_v17 = vmul.f32 %v2694_v60, %v425_v38 }
 0x2b9   : > { %v2708_v23 = vpop.eup %2707  ;;  %2731 = vrcp.f32 %v1502_v45 }
 0x2ba   : > { %v2710_v9 = vpop.eup %2709  ;;  %v1541_v28 = vmul.f32 %v2708_v23, %v3958_v35  ;;  %2733 = vtanh.f32 %v1375_v40  ;;  %v426_v35 = vld [vmem:[#allocation2 + $0x60] sm:$0xff] }
 0x2bb   : > { %v2712_v29 = vpop.eup %2711  ;;  %2735 = vtanh.f32 %v1377_v14  ;;  %v1537_v10 = vmul.f32 %v2704_v13, %v426_v35 }
 0x2bc   : > { %v3977_v26 = vpop.eup %2713  ;;  %v1549_v52 = vadd.f32 %v1541_v28, %v1533_v15  ;;  %v1505_v39 = vadd.f32 1.0, %v2712_v29  ;;  %v429_v28 = vld [vmem:[#allocation2 + $0x78] sm:$0xff] }
 0x2bd   : > { %v2716_v31 = vpop.eup %2715 }
 0x2be   : > { %v2718_v62 = vpop.eup %2717  ;;  %2737 = vtanh.f32 %v1549_v52  ;;  %1581 = vst [vmem:[#allocation2 + $0x40] sm:$0xff] %v1549_v52  ;;  %v1506_v23 = vadd.f32 1.0, %v2716_v31 }
 0x2bf   : > { %v2720_v32 = vpop.eup %2719  ;;  %v1542_v3 = vmul.f32 %v2718_v62, %v3960_v51  ;;  %2739 = vtanh.f32 %v1379_v42  ;;  %v428_v42 = vld [vmem:[#allocation2 + $0x70] sm:$0xff] }
 0x2c0   : > { %v2722_v43 = vpop.eup %2721  ;;  %2741 = vrcp.f32 %v1503_v48  ;;  %v1543_v6 = vmul.f32 %v2720_v32, %v3962_v61  ;;  %v1539_v48 = vmul.f32 %v2710_v9, %v428_v42 }
 0x2c1   : > { %v2724_v4 = vpop.eup %2723  ;;  %2743 = vrcp.f32 %v1504_v36  ;;  %v1550_v8 = vadd.f32 %v1542_v3, %v1534_v5  ;;  %v1544_v40 = vmul.f32 %v2722_v43, %v3964_v16 }
 0x2c2   : > { %v2726_v7 = vpop.eup %2725  ;;  %2745 = vrcp.f32 %v1505_v39  ;;  %v1551_v45 = vadd.f32 %v1543_v6, %v1535_v37  ;;  %v1545_v2 = vmul.f32 %v2724_v4, %v3966_v41  ;;  %v1538_v41 = vmul.f32 %v3974_v22, %v427_v21 }
 0x2c3   : > { %v2728_v14 = vpop.eup %2727  ;;  %2747 = vtanh.f32 %v1550_v8  ;;  %1582 = vst [vmem:[#allocation2 + $0x48] sm:$0xff] %v1550_v8  ;;  %v1552_v51 = vadd.f32 %v1544_v40, %v1536_v17  ;;  %v1507_v13 = vadd.f32 1.0, %v2726_v7  ;;  %v1540_v39 = vmul.f32 %v3977_v26, %v429_v28 }
 0x2c4   : > { %v2730_v63 = vpop.eup %2729  ;;  %2749 = vtanh.f32 %v1551_v45  ;;  %1583 = vst [vmem:[#allocation2 + $0x50] sm:$0xff] %v1551_v45  ;;  %v1553_v61 = vadd.f32 %v1545_v2, %v1537_v10  ;;  %v1508_v36 = vadd.f32 1.0, %v2728_v14 }
 0x2c5   : > { %v2732_v60 = vpop.eup %2731  ;;  %2751 = vtanh.f32 %v1552_v51  ;;  %1584 = vst [vmem:[#allocation2 + $0x58] sm:$0xff] %v1552_v51  ;;  %v4116_v51 = vpop.permute.xlu1 %2553 }
 0x2c6   : > { %v2734_v16 = vpop.eup %2733  ;;  %2753 = vtanh.f32 %v1553_v61  ;;  %1585 = vst [vmem:[#allocation2 + $0x60] sm:$0xff] %v1553_v61 }
 0x2c7   : > { %v2736_v15 = vpop.eup %2735  ;;  %v1546_v29 = vmul.f32 %v2734_v16, %v3968_v47  ;;  %2755 = vrcp.f32 %v1506_v23 }
 0x2c8   : > { %v2738_v30 = vpop.eup %2737  ;;  %v1547_v52 = vmul.f32 %v2736_v15, %v3970_v20  ;;  %2757 = vrcp.f32 %v1507_v13 }
 0x2c9   : > { %v2740_v57 = vpop.eup %2739  ;;  %v3986_v31 = vmul.f32 %v2738_v30, %v2730_v63  ;;  %v1554_v62 = vadd.f32 %v1546_v29, %v1538_v41  ;;  %v4118_v63 = vpop.permute.xlu0 %2548 }
 0x2ca   : > { %v2742_v38 = vpop.eup %2741  ;;  %v1555_v32 = vadd.f32 %v1547_v52, %v1539_v48  ;;  %v1548_v22 = vmul.f32 %v2740_v57, %v3972_v27  ;;  %v4128_v21 = vpop.permute.xlu1 %2563  ;;  %v4165_v57 = vld [vmem:[%s4745_s3] sm:$0xff] }
 0x2cb   : > { %4817 = vst [vmem:[#allocation28_spill] sm:$0xff] %v3986_v31  ;;  %v2744_v5 = vpop.eup %2743  ;;  %1573 = vst [vmem:[#allocation2] sm:$0xff] %v3986_v31  ;;  %2759 = vtanh.f32 %v1554_v62  ;;  %1642 = vrot.lane.b32.xlu1 %v3986_v31, %s2960_s15  ;;  %1596 = vrot.lane.b32.xlu0 %v3986_v31, %s2959_s26 }
 0x2cc   : > { %1586 = vst [vmem:[#allocation2 + $0x68] sm:$0xff] %v1554_v62  ;;  %v2746_v47 = vpop.eup %2745  ;;  %2761 = vtanh.f32 %v1555_v32  ;;  %1587 = vst [vmem:[#allocation2 + $0x70] sm:$0xff] %v1555_v32  ;;  %v1556_v20 = vadd.f32 %v1548_v22, %v1540_v39  ;;  %v2373_v62 = vcombine.high %v4165_v57, %v4165_v57 }
 0x2cd   : > { %v2748_v9 = vpop.eup %2747  ;;  %2763 = vrcp.f32 %v1508_v36  ;;  %v4130_v61 = vpop.permute.xlu0 %2558  ;;  %4829 = vst [vmem:[#allocation36_spill] sm:$0xff] %v4165_v57  ;;  %v4170_v36 = vld [vmem:[%s4745_s3 + $0x8] sm:$0xff] }
 0x2ce   : > { %v2750_v26 = vpop.eup %2749  ;;  %v3995_v35 = vmul.f32 %v2748_v9, %v2732_v60  ;;  %2765 = vtanh.f32 %v1556_v20  ;;  %1588 = vst [vmem:[#allocation2 + $0x78] sm:$0xff] %v1556_v20  ;;  %4830 = vst [vmem:[#allocation37_spill] sm:$0xff] %v4170_v36  ;;  %2019 = vmatprep.mubr.bf16.mxu0 %v2373_v62 }
 0x2cf   : > { %v2752_v27 = vpop.eup %2751  ;;  %v3997_v3 = vmul.f32 %v2750_v26, %v2742_v38  ;;  %1831 = vrot.lane.b32.xlu1 %v3986_v31, %s4820_s14  ;;  %1688 = vrot.lane.b32.xlu0 %v3986_v31, %s2962_s11  ;;  %v2375_v38 = vcombine.high %v4170_v36, %v4170_v36 }
 0x2d0   : > { %4818 = vst [vmem:[#allocation29_spill] sm:$0xff] %v3995_v35  ;;  %v2754_v43 = vpop.eup %2753  ;;  %1574 = vst [vmem:[#allocation2 + $0x8] sm:$0xff] %v3995_v35  ;;  %v4004_v37 = vmul.f32 %v2752_v27, %v2744_v5 }
 0x2d1   : > { %4819 = vst [vmem:[#allocation30_spill] sm:$0xff] %v3997_v3  ;;  %1575 = vst [vmem:[#allocation2 + $0x10] sm:$0xff] %v3997_v3  ;;  %v4007_v6 = vmul.f32 %v2754_v43, %v2746_v47  ;;  %v2756_v4 = vpop.eup %2755  ;;  %2382 = vmatprep.mubr.msk.bf16.mxu1 %vm1130_vm4, %v2375_v38 }
 0x2d2   : > { %4821 = vst [vmem:[#allocation31_spill] sm:$0xff] %v4004_v37  ;;  %1576 = vst [vmem:[#allocation2 + $0x18] sm:$0xff] %v4004_v37  ;;  %v2758_v17 = vpop.eup %2757 }
 0x2d3   : > { %4822 = vst [vmem:[#allocation32_spill] sm:$0xff] %v4007_v6  ;;  %1577 = vst [vmem:[#allocation2 + $0x20] sm:$0xff] %v4007_v6  ;;  %1734 = vrot.lane.b32.xlu0 %v3986_v31, %s4823_s12  ;;  %1654 = vrot.lane.b32.xlu1 %v3995_v35, %s2960_s15 }
 0x2d5   : > { %v2760_v8 = vpop.eup %2759 }
 0x2d6   : > { %v2762_v40 = vpop.eup %2761  ;;  %v4015_v7 = vmul.f32 %v2760_v8, %v2756_v4 }
 0x2d7   : > { %v2764_v10 = vpop.eup %2763  ;;  %v4017_v45 = vmul.f32 %v2762_v40, %v2758_v17  ;;  %1843 = vrot.lane.b32.xlu1 %v3995_v35, %s4820_s14  ;;  %1608 = vrot.lane.b32.xlu0 %v3995_v35, %s2959_s26 }
 0x2d8   : > { %4824 = vst [vmem:[#allocation33_spill] sm:$0xff] %v4015_v7  ;;  %v2766_v2 = vpop.eup %2765  ;;  %1578 = vst [vmem:[#allocation2 + $0x28] sm:$0xff] %v4015_v7 }
 0x2d9   : > { %4825 = vst [vmem:[#allocation34_spill] sm:$0xff] %v4017_v45  ;;  %1579 = vst [vmem:[#allocation2 + $0x30] sm:$0xff] %v4017_v45  ;;  %v4025_v14 = vmul.f32 %v2766_v2, %v2764_v10 }
 0x2db   : > { %4826 = vst [vmem:[#allocation35_spill] sm:$0xff] %v4025_v14  ;;  %1580 = vst [vmem:[#allocation2 + $0x38] sm:$0xff] %v4025_v14  ;;  %1700 = vrot.lane.b32.xlu0 %v3995_v35, %s2962_s11  ;;  %1598 = vrot.lane.b32.xlu1 %v3997_v3, %s2959_s26 }
 0x2df   : > { %1746 = vrot.lane.b32.xlu0 %v3995_v35, %s4823_s12  ;;  %1690 = vrot.lane.b32.xlu1 %v3997_v3, %s2962_s11 }
 0x2e3   : > { %1644 = vrot.lane.b32.xlu0 %v3997_v3, %s2960_s15  ;;  %1736 = vrot.lane.b32.xlu1 %v3997_v3, %s4823_s12 }
 0x2e7   : > { %1833 = vrot.lane.b32.xlu0 %v3997_v3, %s4820_s14  ;;  %1610 = vrot.lane.b32.xlu1 %v4004_v37, %s2959_s26 }
 0x2eb   : > { %1656 = vrot.lane.b32.xlu0 %v4004_v37, %s2960_s15  ;;  %1702 = vrot.lane.b32.xlu1 %v4004_v37, %s2962_s11 }
 0x2ef   : > { %1845 = vrot.lane.b32.xlu0 %v4004_v37, %s4820_s14  ;;  %1646 = vrot.lane.b32.xlu1 %v4007_v6, %s2960_s15 }
 0x2f3   : > { %1789 = vrot.lane.b32.xlu1 %v4007_v6, %s2961_s10  ;;  %1600 = vrot.lane.b32.xlu0 %v4007_v6, %s2959_s26 }
 0x2f7   : > { %1692 = vrot.lane.b32.xlu1 %v4007_v6, %s2962_s11  ;;  %1612 = vrot.lane.b32.xlu0 %v4015_v7, %s2959_s26 }
 0x2fb   : > { %1835 = vrot.lane.b32.xlu1 %v4007_v6, %s4820_s14  ;;  %1648 = vrot.lane.b32.xlu0 %v4017_v45, %s2960_s15 }
 0x2ff   : > { %1658 = vrot.lane.b32.xlu1 %v4015_v7, %s2960_s15  ;;  %1791 = vrot.lane.b32.xlu0 %v4017_v45, %s2961_s10 }
 0x303   : > { %1801 = vrot.lane.b32.xlu1 %v4015_v7, %s2961_s10  ;;  %1694 = vrot.lane.b32.xlu0 %v4017_v45, %s2962_s11 }
 0x307   : > { %1704 = vrot.lane.b32.xlu1 %v4015_v7, %s2962_s11  ;;  %1837 = vrot.lane.b32.xlu0 %v4017_v45, %s4820_s14 }
 0x30b   : > { %1847 = vrot.lane.b32.xlu1 %v4015_v7, %s4820_s14  ;;  %2568 = vrot.lane.b32.xlu0 %v3948_v44, %s4820_s14 }
 0x30f   : > { %1740 = vrot.lane.b32.xlu0 %v4017_v45, %s4823_s12  ;;  %1602 = vrot.lane.b32.xlu1 %v4017_v45, %s2959_s26 }
 0x313   : > { %1879 = vrot.lane.b32.xlu0 %v3997_v3, %s4827_s9  ;;  %1614 = vrot.lane.b32.xlu1 %v4025_v14, %s2959_s26  ;;  %s4828_s26 = smov 111  }
 0x317   : > { %1891 = vrot.lane.b32.xlu0 %v4004_v37, %s4827_s9  ;;  %1748 = vrot.lane.b32.xlu1 %v4004_v37, %s4823_s12 }
 0x31b   : > { %1883 = vrot.lane.b32.xlu0 %v4017_v45, %s4827_s9  ;;  %1738 = vrot.lane.b32.xlu1 %v4007_v6, %s4823_s12 }
 0x31f   : > { %2578 = vrot.lane.b32.xlu0 %v3948_v44, %s4827_s9  ;;  %1750 = vrot.lane.b32.xlu1 %v4015_v7, %s4823_s12 }
 0x323   : > { %1660 = vrot.lane.b32.xlu0 %v4025_v14, %s2960_s15  ;;  %1877 = vrot.lane.b32.xlu1 %v3986_v31, %s4827_s9 }
 0x327   : > { %1803 = vrot.lane.b32.xlu0 %v4025_v14, %s2961_s10  ;;  %1889 = vrot.lane.b32.xlu1 %v3995_v35, %s4827_s9 }
 0x32b   : > { %1925 = vrot.lane.b32.xlu0 %v3997_v3, %s4828_s26  ;;  %1881 = vrot.lane.b32.xlu1 %v4007_v6, %s4827_s9 }
 0x32f   : > { %1706 = vrot.lane.b32.xlu0 %v4025_v14, %s2962_s11  ;;  %1893 = vrot.lane.b32.xlu1 %v4015_v7, %s4827_s9 }
 0x333   : > { %1849 = vrot.lane.b32.xlu0 %v4025_v14, %s4820_s14  ;;  %2573 = vrot.lane.b32.xlu1 %v3948_v44, %s4823_s12 }
 0x337   : > { %1937 = vrot.lane.b32.xlu0 %v4004_v37, %s4828_s26  ;;  %1923 = vrot.lane.b32.xlu1 %v3986_v31, %s4828_s26 }
 0x33b   : > { %1752 = vrot.lane.b32.xlu0 %v4025_v14, %s4823_s12  ;;  %1935 = vrot.lane.b32.xlu1 %v3995_v35, %s4828_s26 }
 0x33d   : > { %v1643_v60 = vpop.permute.xlu1 %1642  ;;  %v1597_v42 = vpop.permute.xlu0 %1596 }
 0x33f   : > { %1895 = vrot.lane.b32.xlu0 %v4025_v14, %s4827_s9  ;;  %1927 = vrot.lane.b32.xlu1 %v4007_v6, %s4828_s26 }
 0x341   : > { %v1832_v23 = vpop.permute.xlu1 %1831  ;;  %v1689_v16 = vpop.permute.xlu0 %1688 }
 0x343   : > { %1929 = vrot.lane.b32.xlu0 %v4017_v45, %s4828_s26  ;;  %1939 = vrot.lane.b32.xlu1 %v4015_v7, %s4828_s26 }
 0x345   : > { %v1735_v13 = vpop.permute.xlu0 %1734  ;;  %v1655_v15 = vpop.permute.xlu1 %1654 }
 0x346   : > { %v4146_v41 = vsel %vm523_vm1, %v1643_v60, %v1655_v15  ;;  %v4150_v28 = vsel %vm523_vm1, %v1655_v15, %v1643_v60 }
 0x347   : > { %1787 = vrot.lane.b32.xlu0 %v3997_v3, %s2961_s10  ;;  %1785 = vrot.lane.b32.xlu1 %v3986_v31, %s2961_s10 }
 0x349   : > { %v1844_v29 = vpop.permute.xlu1 %1843  ;;  %v1609_v30 = vpop.permute.xlu0 %1608 }
 0x34a   : > { %v1851_v48 = vsel %vm781_vm5, %v1832_v23, %v1844_v29  ;;  %v1855_v52 = vsel %vm781_vm5, %v1844_v29, %v1832_v23  ;;  %v1616_v4 = vsel %vm460_vm0, %v1597_v42, %v1609_v30 }
 0x34b   : > { %1941 = vrot.lane.b32.xlu0 %v4025_v14, %s4828_s26  ;;  %1797 = vrot.lane.b32.xlu1 %v3995_v35, %s2961_s10  ;;  %v1625_v60 = vmul.f32 %v1616_v4, %v3409_v54  ;;  %v2551_v4 = vunpack.i.h.bf16 %v4118_v63 }
 0x34d   : > { %v1701_v39 = vpop.permute.xlu0 %1700  ;;  %v1599_v32 = vpop.permute.xlu1 %1598  ;;  %v1635_v6 = vmul.f32 %v2551_v4, %v3409_v54 }
 0x34e   : > { %v1708_v22 = vsel %vm586_vm3, %v1689_v16, %v1701_v39  ;;  %v1712_v5 = vsel %vm586_vm3, %v1701_v39, %v1689_v16 }
 0x34f   : > { %1799 = vrot.lane.b32.xlu0 %v4004_v37, %s2961_s10  ;;  %2583 = vrot.lane.b32.xlu1 %v3948_v44, %s4828_s26  ;;  %v1620_v44 = vsel %vm460_vm0, %v1609_v30, %v1597_v42  ;;  %v4218_v38 = vmul.f32 %v1712_v5, %v3575_v11  ;;  %v4221_v39 = vmul.f32 %v1708_v22, %v3578_v12  ;;  %v2550_v5 = vunpack.i.l.bf16 %v4118_v63 }
 0x350   : > { %v1624_v2 = vmul.f32 %v1620_v44, %v3418_v56 }
 0x351   : > { %v1747_v47 = vpop.permute.xlu0 %1746  ;;  %v1691_v20 = vpop.permute.xlu1 %1690  ;;  %v1633_v14 = vmul.f32 %v2550_v5, %v3409_v54 }
 0x352   : > { %v4189_v9 = vsel %vm649_vm6, %v1735_v13, %v1747_v47  ;;  %v4193_v26 = vsel %vm649_vm6, %v1747_v47, %v1735_v13 }
 0x355   : > { %v4195_v27 = vpop.permute.xlu0 %1644  ;;  %v4197_v43 = vpop.permute.xlu1 %1736 }
 0x359   : > { %v1834_v17 = vpop.permute.xlu0 %1833  ;;  %v1611_v8 = vpop.permute.xlu1 %1610 }
 0x35a   : > { %v1617_v40 = vsel %vm460_vm0, %v1599_v32, %v1611_v8  ;;  %v1621_v10 = vsel %vm460_vm0, %v1611_v8, %v1599_v32 }
 0x35b   : > { %v1626_v23 = vmul.f32 %v1621_v10, %v3418_v56  ;;  %v1627_v16 = vmul.f32 %v1617_v40, %v3409_v54  ;;  %v4240_v40 = vmul.f32 %v1851_v48, %v3644_v24  ;;  %v4243_v10 = vmul.f32 %v1855_v52, %v3647_v25 }
 0x35d   : > { %v1636_v13 = vpack.c.bf16 %v1626_v23, %v1624_v2  ;;  %v4211_v15 = vpop.permute.xlu0 %1656  ;;  %v1703_v42 = vpop.permute.xlu1 %1702  ;;  %v1637_v29 = vpack.c.bf16 %v1627_v16, %v1625_v60 }
 0x35e   : > { %v1709_v30 = vsel %vm586_vm3, %v1691_v20, %v1703_v42  ;;  %v1713_v62 = vsel %vm586_vm3, %v1703_v42, %v1691_v20  ;;  %v1663_v35 = vsel %vm523_vm1, %v4195_v27, %v4211_v15 }
 0x35f   : > { %v4224_v32 = vmul.f32 %v1713_v62, %v3575_v11  ;;  %v4227_v47 = vmul.f32 %v1709_v30, %v3578_v12  ;;  %1987 = vmatprep.subr.bf16.mxu0 %v1637_v29 }
 0x360   : > { %1988 = vmatpush1.bf16.msra.mxu0 %v1636_v13 }
 0x361   : > { %v1846_v44 = vpop.permute.xlu0 %1845  ;;  %v4231_v8 = vpop.permute.xlu1 %1646 }
 0x362   : > { %v1852_v22 = vsel %vm781_vm5, %v1834_v17, %v1846_v44  ;;  %v1856_v20 = vsel %vm781_vm5, %v1846_v44, %v1834_v17 }
 0x363   : > { %v4246_v2 = vmul.f32 %v1852_v22, %v3644_v24  ;;  %v4249_v60 = vmul.f32 %v1856_v20, %v3647_v25 }
 0x365   : > { %v4253_v16 = vpop.permute.xlu1 %1789  ;;  %v1601_v13 = vpop.permute.xlu0 %1600 }
 0x369   : > { %v4257_v48 = vpop.permute.xlu1 %1692  ;;  %v1613_v42 = vpop.permute.xlu0 %1612 }
 0x36a   : > { %v1618_v49 = vsel %vm460_vm0, %v1601_v13, %v1613_v42  ;;  %v1622_v45 = vsel %vm460_vm0, %v1613_v42, %v1601_v13  ;;  %v1634_v42 = vmul.f32 %v2551_v4, %v3418_v56 }
 0x36b   : > { %v1628_v18 = vmul.f32 %v1622_v45, %v3418_v56  ;;  %v1629_v19 = vmul.f32 %v1618_v49, %v3409_v54  ;;  %v4307_v49 = vmul.f32 %v4193_v26, %v3688_v33 }
 0x36d   : > { %v4259_v52 = vpop.permute.xlu1 %1835  ;;  %v4261_v29 = vpop.permute.xlu0 %1648 }
 0x371   : > { %v1659_v30 = vpop.permute.xlu1 %1658  ;;  %v4263_v62 = vpop.permute.xlu0 %1791 }
 0x375   : > { %v4265_v44 = vpop.permute.xlu1 %1801  ;;  %v4267_v22 = vpop.permute.xlu0 %1694 }
 0x379   : > { %v4269_v20 = vpop.permute.xlu1 %1704  ;;  %v4271_v46 = vpop.permute.xlu0 %1837 }
 0x37d   : > { %v4273_v23 = vpop.permute.xlu1 %1847  ;;  %v4275_v17 = vpop.permute.xlu0 %2568 }
 0x381   : > { %v4279_v36 = vpop.permute.xlu0 %1740  ;;  %v1603_v57 = vpop.permute.xlu1 %1602 }
 0x382   : > { %4831 = vst [vmem:[#allocation38_spill] sm:$0xff] %v4279_v36  ;;  %v1632_v36 = vmul.f32 %v2550_v5, %v3418_v56 }
 0x385   : > { %v4287_v7 = vpop.permute.xlu0 %1879  ;;  %v1615_v3 = vpop.permute.xlu1 %1614 }
 0x386   : > { %v1619_v31 = vsel %vm460_vm0, %v1603_v57, %v1615_v3  ;;  %v1623_v63 = vsel %vm460_vm0, %v1615_v3, %v1603_v57  ;;  %v1641_v57 = vpack.c.bf16 %v1635_v6, %v1633_v14  ;;  %v1671_v14 = vmul.f32 %v4146_v41, %v3482_v55 }
 0x387   : > { %v1630_v37 = vmul.f32 %v1623_v63, %v3418_v56  ;;  %v1631_v13 = vmul.f32 %v1619_v31, %v3409_v54  ;;  %v4311_v54 = vmul.f32 %v4189_v9, %v3691_v34  ;;  %v1673_v56 = vmul.f32 %v1663_v35, %v3482_v55 }
 0x388   : > { %v2556_v41 = vunpack.i.h.bf16 %v4116_v51 }
 0x389   : > { %v1638_v1 = vpack.c.bf16 %v1630_v37, %v1628_v18  ;;  %v4303_v0 = vpop.permute.xlu0 %1891  ;;  %v1749_v3 = vpop.permute.xlu1 %1748  ;;  %v1639_v45 = vpack.c.bf16 %v1631_v13, %v1629_v19  ;;  %v1667_v19 = vsel %vm523_vm1, %v4211_v15, %v4195_v27  ;;  %v1683_v4 = vpack.c.bf16 %v1673_v56, %v1671_v14 }
 0x38a   : > { %v1755_v31 = vsel %vm649_vm6, %v4197_v43, %v1749_v3  ;;  %v1759_v18 = vsel %vm649_vm6, %v1749_v3, %v4197_v43  ;;  %v1640_v43 = vpack.c.bf16 %v1634_v42, %v1632_v36  ;;  %v1672_v15 = vmul.f32 %v1667_v19, %v3479_v53 }
 0x38b   : > { %v4325_v37 = vmul.f32 %v1759_v18, %v3688_v33  ;;  %v4328_v6 = vmul.f32 %v1755_v31, %v3691_v34  ;;  %1989 = vmatprep.subr.bf16.mxu0 %v1639_v45  ;;  %v2555_v13 = vunpack.i.l.bf16 %v4116_v51  ;;  %v1664_v36 = vsel %vm523_vm1, %v4231_v8, %v1659_v30 }
 0x38c   : > { %1990 = vmatpush1.bf16.msra.mxu0 %v1638_v1  ;;  %v1670_v1 = vmul.f32 %v4150_v28, %v3479_v53  ;;  %v1668_v42 = vsel %vm523_vm1, %v1659_v30, %v4231_v8  ;;  %v1681_v28 = vmul.f32 %v2556_v41, %v3482_v55  ;;  %v2561_v45 = vunpack.i.h.bf16 %v4130_v61 }
 0x38d   : > { %v1774_v9 = vpack.c.bf16 %v4325_v37, %v4307_v49  ;;  %v4334_v26 = vpop.permute.xlu0 %1883  ;;  %1991 = vmatprep.subr.bf16.mxu0 %v1641_v57  ;;  %v4336_v27 = vpop.permute.xlu1 %1738  ;;  %v1775_v35 = vpack.c.bf16 %v4328_v6, %v4311_v54  ;;  %v1679_v18 = vmul.f32 %v2555_v13, %v3482_v55  ;;  %v2560_v51 = vunpack.i.l.bf16 %v4130_v61 }
 0x38e   : > { %v1682_v3 = vpack.c.bf16 %v1672_v15, %v1670_v1  ;;  %v1674_v30 = vmul.f32 %v1668_v42, %v3479_v53  ;;  %v1675_v56 = vmul.f32 %v1664_v36, %v3482_v55  ;;  %v1680_v15 = vmul.f32 %v2556_v41, %v3479_v53 }
 0x38f   : > { %v1807_v61 = vsel %vm718_vm2, %v4253_v16, %v4265_v44  ;;  %v1824_v1 = vmul.f32 %v2561_v45, %v3547_v58  ;;  %v1822_v41 = vmul.f32 %v2560_v51, %v3547_v58 }
 0x390   : > { %1992 = vmatpush1.bf16.msra.mxu0 %v1640_v43 }
 0x391   : > { %v4344_v5 = vpop.permute.xlu0 %2578  ;;  %1993 = vmatprep.subr.bf16.mxu0 %v1683_v4  ;;  %v4346_v63 = vpop.permute.xlu1 %1750  ;;  %v1678_v4 = vmul.f32 %v2555_v13, %v3479_v53 }
 0x394   : > { %1994 = vmatpush1.bf16.msra.mxu0 %v1682_v3 }
 0x395   : > { %v1661_v57 = vpop.permute.xlu0 %1660  ;;  %v4357_v31 = vpop.permute.xlu1 %1877 }
 0x396   : > { %v1665_v19 = vsel %vm523_vm1, %v4261_v29, %v1661_v57  ;;  %v1669_v8 = vsel %vm523_vm1, %v1661_v57, %v4261_v29  ;;  %v1811_v29 = vsel %vm718_vm2, %v4265_v44, %v4253_v16  ;;  %v1687_v16 = vpack.c.bf16 %v1681_v28, %v1679_v18 }
 0x397   : > { %v1676_v14 = vmul.f32 %v1669_v8, %v3479_v53  ;;  %v1677_v43 = vmul.f32 %v1665_v19, %v3482_v55  ;;  %v1817_v53 = vmul.f32 %v1807_v61, %v3550_v59  ;;  %v1818_v44 = vmul.f32 %v1811_v29, %v3547_v58 }
 0x398   : > { %v1686_v29 = vpack.c.bf16 %v1680_v15, %v1678_v4  ;;  %v4832_v4 = vpack.c.bf16 %v4227_v47, %v4221_v39  ;;  %v1853_v39 = vsel %vm781_vm5, %v4259_v52, %v4273_v23  ;;  %v2571_v47 = vunpack.i.h.bf16 %v4275_v17 }
 0x399   : > { %v1684_v3 = vpack.c.bf16 %v1676_v14, %v1674_v30  ;;  %v1804_v36 = vpop.permute.xlu0 %1803  ;;  %v4382_v42 = vpop.permute.xlu1 %1889  ;;  %v1685_v55 = vpack.c.bf16 %v1677_v43, %v1675_v56  ;;  %v2566_v30 = vunpack.i.h.bf16 %v4128_v21  ;;  %v2565_v56 = vunpack.i.l.bf16 %v4128_v21 }
 0x39a   : > { %v1808_v57 = vsel %vm718_vm2, %v4263_v62, %v1804_v36  ;;  %v1812_v19 = vsel %vm718_vm2, %v1804_v36, %v4263_v62  ;;  %v1823_v14 = vmul.f32 %v2561_v45, %v3550_v59  ;;  %v1821_v43 = vmul.f32 %v2560_v51, %v3550_v59 }
 0x39b   : > { %v1819_v13 = vmul.f32 %v1808_v57, %v3550_v59  ;;  %v1820_v8 = vmul.f32 %v1812_v19, %v3547_v58  ;;  %1995 = vmatprep.subr.bf16.mxu0 %v1685_v55  ;;  %v1710_v36 = vsel %vm586_vm3, %v4257_v48, %v4269_v20  ;;  %v1714_v21 = vsel %vm586_vm3, %v4269_v20, %v4257_v48 }
 0x39c   : > { %1996 = vmatpush1.bf16.msra.mxu0 %v1684_v3  ;;  %v1830_v45 = vpack.c.bf16 %v1824_v1, %v1822_v41  ;;  %v1727_v51 = vmul.f32 %v2566_v30, %v3578_v12  ;;  %v1725_v3 = vmul.f32 %v2565_v56, %v3578_v12  ;;  %v1829_v55 = vpack.c.bf16 %v1823_v14, %v1821_v43 }
 0x39d   : > { %v1827_v62 = vpack.c.bf16 %v1819_v13, %v1817_v53  ;;  %v4399_v28 = vpop.permute.xlu0 %1925  ;;  %1997 = vmatprep.subr.bf16.mxu0 %v1687_v16  ;;  %v4401_v18 = vpop.permute.xlu1 %1881  ;;  %v1828_v61 = vpack.c.bf16 %v1820_v8, %v1818_v44  ;;  %v1720_v19 = vmul.f32 %v1714_v21, %v3575_v11  ;;  %v1721_v48 = vmul.f32 %v1710_v36, %v3578_v12 }
 0x39e   : > { %v1857_v53 = vsel %vm781_vm5, %v4273_v23, %v4259_v52  ;;  %v2570_v44 = vunpack.i.l.bf16 %v4275_v17  ;;  %v1726_v13 = vmul.f32 %v2566_v30, %v3575_v11  ;;  %v1724_v8 = vmul.f32 %v2565_v56, %v3575_v11 }
 0x39f   : > { %2028 = vmatprep.subr.bf16.mxu1 %v1828_v61  ;;  %v1863_v17 = vmul.f32 %v1853_v39, %v3644_v24  ;;  %v1864_v52 = vmul.f32 %v1857_v53, %v3647_v25  ;;  %v1870_v56 = vmul.f32 %v2571_v47, %v3647_v25  ;;  %v1901_v36 = vsel %vm844_vm7, %v4382_v42, %v4357_v31  ;;  %v4838_v53 = vld [vmem:[#allocation38_spill] sm:$0xff] }
 0x3a0   : > { %1998 = vmatpush1.bf16.msra.mxu0 %v1686_v29  ;;  %2029 = vmatpush1.bf16.msra.mxu1 %v1827_v62  ;;  %v1867_v61 = vmul.f32 %v2570_v44, %v3644_v24  ;;  %v1868_v29 = vmul.f32 %v2570_v44, %v3647_v25 }
 0x3a1   : > { %2030 = vmatprep.subr.bf16.mxu1 %v1830_v45  ;;  %v1707_v15 = vpop.permute.xlu0 %1706  ;;  %1999 = vmatprep.subr.bf16.mxu0 %v4832_v4  ;;  %v4416_v57 = vpop.permute.xlu1 %1893  ;;  %v4835_v45 = vpack.c.bf16 %v4246_v2, %v4240_v40  ;;  %v1897_v40 = vsel %vm844_vm7, %v4357_v31, %v4382_v42  ;;  %v1756_v2 = vsel %vm649_vm6, %v4336_v27, %v4346_v63 }
 0x3a2   : > { %v1711_v20 = vsel %vm586_vm3, %v4267_v22, %v1707_v15  ;;  %v1715_v1 = vsel %vm586_vm3, %v1707_v15, %v4267_v22  ;;  %v4833_v22 = vpack.c.bf16 %v4224_v32, %v4218_v38  ;;  %v1760_v15 = vsel %vm649_vm6, %v4346_v63, %v4336_v27 }
 0x3a3   : > { %v1722_v41 = vmul.f32 %v1715_v1, %v3575_v11  ;;  %v1723_v16 = vmul.f32 %v1711_v20, %v3578_v12  ;;  %v4834_v12 = vpack.c.bf16 %v4249_v60, %v4243_v10  ;;  %v1733_v11 = vpack.c.bf16 %v1727_v51, %v1725_v3  ;;  %v4837_v20 = vld [vmem:[#allocation27_spill] sm:$0xff] }
 0x3a4   : > { %2000 = vmatpush1.bf16.msra.mxu0 %v4833_v22  ;;  %2031 = vmatpush1.bf16.msra.mxu1 %v1829_v55  ;;  %v1869_v10 = vmul.f32 %v2571_v47, %v3644_v24  ;;  %v1732_v3 = vpack.c.bf16 %v1726_v13, %v1724_v8  ;;  %v1902_v55 = vsel %vm844_vm7, %v4303_v0, %v4287_v7  ;;  %v2581_v8 = vunpack.i.h.bf16 %v4344_v5 }
 0x3a5   : > { %v1730_v14 = vpack.c.bf16 %v1722_v41, %v1720_v19  ;;  %2032 = vmatprep.subr.bf16.mxu1 %v4834_v12  ;;  %v1850_v43 = vpop.permute.xlu0 %1849  ;;  %v4446_v62 = vpop.permute.xlu1 %2573  ;;  %v1731_v23 = vpack.c.bf16 %v1723_v16, %v1721_v48  ;;  %v1906_v1 = vmul.f32 %v1901_v36, %v4837_v20  ;;  %v1876_v39 = vpack.c.bf16 %v1870_v56, %v1868_v29  ;;  %v4840_v36 = vld [vmem:[#allocation31_spill] sm:$0xff] }
 0x3a6   : > { %v1854_v38 = vsel %vm781_vm5, %v4271_v46, %v1850_v43  ;;  %v1858_v32 = vsel %vm781_vm5, %v1850_v43, %v4271_v46  ;;  %v1898_v46 = vsel %vm844_vm7, %v4287_v7, %v4303_v0  ;;  %v2576_v4 = vunpack.i.h.bf16 %v4446_v62  ;;  %v4836_v7 = vld [vmem:[#allocation26_spill] sm:$0xff] }
 0x3a7   : > { %v1865_v60 = vmul.f32 %v1854_v38, %v3644_v24  ;;  %v1866_v30 = vmul.f32 %v1858_v32, %v3647_v25  ;;  %2001 = vmatprep.subr.bf16.mxu0 %v1731_v23  ;;  %v2575_v19 = vunpack.i.l.bf16 %v4446_v62  ;;  %v1875_v0 = vpack.c.bf16 %v1869_v10, %v1867_v61 }
 0x3a8   : > { %2002 = vmatpush1.bf16.msra.mxu0 %v1730_v14  ;;  %2033 = vmatpush1.bf16.msra.mxu1 %v4835_v45  ;;  %v1907_v48 = vmul.f32 %v1898_v46, %v4836_v7  ;;  %v1908_v47 = vmul.f32 %v1902_v55, %v4837_v20  ;;  %v1766_v31 = vmul.f32 %v1760_v15, %v3688_v33  ;;  %v2580_v14 = vunpack.i.l.bf16 %v4344_v5  ;;  %v4839_v46 = vld [vmem:[#allocation29_spill] sm:$0xff]  ;;  %v4841_v15 = vld [vmem:[#allocation24_spill] sm:$0xff] }
 0x3a9   : > { %v1873_v21 = vpack.c.bf16 %v1865_v60, %v1863_v17  ;;  %v4473_v51 = vpop.permute.xlu0 %1937  ;;  %2003 = vmatprep.subr.bf16.mxu0 %v1733_v11  ;;  %v4475_v24 = vpop.permute.xlu1 %1923  ;;  %v1874_v25 = vpack.c.bf16 %v1866_v30, %v1864_v52  ;;  %v1905_v42 = vmul.f32 %v1897_v40, %v4836_v7  ;;  %v1767_v41 = vmul.f32 %v1756_v2, %v3691_v34 }
 0x3aa   : > { %v1899_v16 = vsel %vm844_vm7, %v4401_v18, %v4416_v57  ;;  %v1773_v54 = vmul.f32 %v2576_v4, %v3691_v34  ;;  %v1771_v6 = vmul.f32 %v2575_v19, %v3691_v34  ;;  %v1903_v12 = vsel %vm844_vm7, %v4416_v57, %v4401_v18 }
 0x3ab   : > { %2034 = vmatprep.subr.bf16.mxu1 %v1874_v25  ;;  %v1918_v43 = vpack.c.bf16 %v1908_v47, %v1906_v1  ;;  %v1917_v62 = vpack.c.bf16 %v1907_v48, %v1905_v42  ;;  %v1909_v23 = vmul.f32 %v1899_v16, %v4836_v7  ;;  %v1772_v5 = vmul.f32 %v2576_v4, %v3688_v33  ;;  %v4842_v48 = vld [vmem:[#allocation23_spill] sm:$0xff]  ;;  %v4844_v1 = vld [vmem:[#allocation30_spill] sm:$0xff]  ;;  %v4845_v42 = vld [vmem:[#allocation33_spill] sm:$0xff] }
 0x3ac   : > { %2004 = vmatpush1.bf16.msra.mxu0 %v1732_v3  ;;  %2035 = vmatpush1.bf16.msra.mxu1 %v1873_v21  ;;  %v1770_v11 = vmul.f32 %v2575_v19, %v3688_v33  ;;  %v1910_v37 = vmul.f32 %v1903_v12, %v4837_v20  ;;  %v1779_v52 = vpack.c.bf16 %v1773_v54, %v1771_v6  ;;  %v2968_v54 = vmov 1.0  }
 0x3ad   : > { %v1753_v27 = vpop.permute.xlu0 %1752  ;;  %2005 = vmatprep.subr.bf16.mxu0 %v1775_v35  ;;  %v1936_v63 = vpop.permute.xlu1 %1935  ;;  %2036 = vmatprep.subr.bf16.mxu1 %v1876_v39  ;;  %v1916_v10 = vmul.f32 %v2581_v8, %v4837_v20  ;;  %v1781_v21 = vpack.c.bf16 %v4840_v36, %v4839_v46  ;;  %v1915_v45 = vmul.f32 %v2581_v8, %v4836_v7  ;;  %v4849_v6 = vmov 0.0  }
 0x3ae   : > { %v1757_v44 = vsel %vm649_vm6, %v4838_v53, %v1753_v27  ;;  %v1761_v22 = vsel %vm649_vm6, %v1753_v27, %v4838_v53  ;;  %v1947_v60 = vsel %vm907_vm8, %v1936_v63, %v4475_v24  ;;  %v1778_v29 = vpack.c.bf16 %v1772_v5, %v1770_v11  ;;  %v4846_v27 = vld [vmem:[#allocation35_spill] sm:$0xff]  ;;  %v4847_v53 = vld [vmem:[#allocation32_spill] sm:$0xff] }
 0x3af   : > { %v1768_v35 = vmul.f32 %v1761_v22, %v3688_v33  ;;  %v1769_v13 = vmul.f32 %v1757_v44, %v3691_v34  ;;  %v1914_v33 = vmul.f32 %v2580_v14, %v4837_v20  ;;  %v1913_v25 = vmul.f32 %v2580_v14, %v4836_v7  ;;  %v4848_v44 = vld [vmem:[#allocation34_spill] sm:$0xff] }
 0x3b0   : > { %2006 = vmatpush1.bf16.msra.mxu0 %v1774_v9  ;;  %2037 = vmatpush1.bf16.msra.mxu1 %v1875_v0  ;;  %v1948_v3 = vsel %vm907_vm8, %v4473_v51, %v4399_v28  ;;  %v1943_v55 = vsel %vm907_vm8, %v4475_v24, %v1936_v63  ;;  %v1952_v40 = vmul.f32 %v4841_v15, %v1947_v60  ;;  %v4843_v24 = vld [vmem:[#allocation28_spill] sm:$0xff] }
 0x3b1   : > { %v1776_v17 = vpack.c.bf16 %v1768_v35, %v1766_v31  ;;  %v1896_v34 = vpop.permute.xlu0 %1895  ;;  %v1928_v38 = vpop.permute.xlu1 %1927  ;;  %v1777_v32 = vpack.c.bf16 %v1769_v13, %v1767_v41  ;;  %2038 = vmatprep.subr.bf16.mxu1 %v1918_v43  ;;  %v1922_v2 = vpack.c.bf16 %v1916_v10, %v1914_v33  ;;  %v1944_v4 = vsel %vm907_vm8, %v4399_v28, %v4473_v51 }
 0x3b2   : > { %v1900_v18 = vsel %vm844_vm7, %v4334_v26, %v1896_v34  ;;  %v1904_v49 = vsel %vm844_vm7, %v1896_v34, %v4334_v26  ;;  %v1780_v39 = vpack.c.bf16 %v4844_v1, %v4843_v24  ;;  %v1921_v47 = vpack.c.bf16 %v1915_v45, %v1913_v25  ;;  %v4853_v45 = vld [vmem:[#allocation36_spill] sm:$0xff]  ;;  %v4854_v25 = vld [vmem:[#allocation37_spill] sm:$0xff] }
 0x3b3   : > { %v1911_v9 = vmul.f32 %v1900_v18, %v4836_v7  ;;  %v1912_v57 = vmul.f32 %v1904_v49, %v4837_v20  ;;  %2007 = vmatprep.subr.bf16.mxu0 %v1777_v32  ;;  %v1954_v7 = vmul.f32 %v4841_v15, %v1948_v3  ;;  %v1951_v20 = vmul.f32 %v4842_v48, %v1943_v55 }
 0x3b4   : > { %2008 = vmatpush1.bf16.msra.mxu0 %v1776_v17  ;;  %2039 = vmatpush1.bf16.msra.mxu1 %v1917_v62  ;;  %v1783_v63 = vpack.c.bf16 %v4846_v27, %v4845_v42  ;;  %v1953_v28 = vmul.f32 %v4842_v48, %v1944_v4  ;;  %v1782_v22 = vpack.c.bf16 %v4848_v44, %v4847_v53  ;;  %v4850_v62 = vld [vmem:[#allocation25_spill] sm:$0xff]  ;;  %v2082_v27 = vld [vmem:[#allocation2] sm:$0xff] (!%p2383_p2)  ;;  %v2089_v44 = vld [vmem:[#allocation2 + $0x38] sm:$0xff] (!%p2383_p2) }
 0x3b5   : > { %v1919_v30 = vpack.c.bf16 %v1911_v9, %v1909_v23  ;;  %v1930_v26 = vpop.permute.xlu0 %1929  ;;  %v1940_v56 = vpop.permute.xlu1 %1939  ;;  %2009 = vmatprep.subr.bf16.mxu0 %v1779_v52  ;;  %v1920_v61 = vpack.c.bf16 %v1912_v57, %v1910_v37  ;;  %v1964_v41 = vpack.c.bf16 %v1954_v7, %v1952_v40  ;;  %v2377_v35 = vpack.c.bf16 %v4849_v6, %v2968_v54  ;;  %v2088_v53 = vld [vmem:[#allocation2 + $0x30] sm:$0xff] (!%p2383_p2)  ;;  %v2091_v54 = vld [vmem:[#allocation2 + $0x48] sm:$0xff] (!%p2383_p2) }
 0x3b6   : > { %v1945_v31 = vsel %vm907_vm8, %v1928_v38, %v1940_v56  ;;  %v1949_v51 = vsel %vm907_vm8, %v1940_v56, %v1928_v38  ;;  %v1963_v13 = vpack.c.bf16 %v1953_v28, %v1951_v20  ;;  %v2374_v3 = vcombine.low %v4854_v25, %v4854_v25  ;;  %v2084_v28 = vld [vmem:[#allocation2 + $0x10] sm:$0xff] (!%p2383_p2)  ;;  %2098 = vst [vmem:[%s3239_s8] sm:$0xff] (!%p2383_p2), %v2082_v27 }
 0x3b7   : > { %2040 = vmatprep.subr.bf16.mxu1 %v1920_v61  ;;  %v1955_v8 = vmul.f32 %v4842_v48, %v1945_v31  ;;  %v1956_v17 = vmul.f32 %v4841_v15, %v1949_v51  ;;  %vm2069_vm12 = vcmp.lt.s32.totalorder %v4850_v62, 4  ;;  %2100 = vst [vmem:[%s3239_s8 + $0x10] sm:$0xff] (!%p2383_p2), %v2084_v28  ;;  %v2085_v51 = vld [vmem:[#allocation2 + $0x18] sm:$0xff] (!%p2383_p2)  ;;  %2104 = vst [vmem:[%s3239_s8 + $0x30] sm:$0xff] (!%p2383_p2), %v2088_v53  ;;  %v2092_v6 = vld [vmem:[#allocation2 + $0x50] sm:$0xff] (!%p2383_p2) }
 0x3b8   : > { %2010 = vmatpush1.bf16.msra.mxu0 %v1778_v29  ;;  %2041 = vmatpush1.bf16.msra.mxu1 %v1919_v30  ;;  %2101 = vst [vmem:[%s3239_s8 + $0x18] sm:$0xff] (!%p2383_p2), %v2085_v51  ;;  %2105 = vst [vmem:[%s3239_s8 + $0x38] sm:$0xff] (!%p2383_p2), %v2089_v44 }
 0x3b9   : > { %v1788_v19 = vpop.permute.xlu0 %1787  ;;  %v1786_v0 = vpop.permute.xlu1 %1785  ;;  %2011 = vmatprep.subr.bf16.mxu0 %v1781_v21  ;;  %2042 = vmatprep.subr.bf16.mxu1 %v1922_v2  ;;  %2107 = vst [vmem:[%s3239_s8 + $0x48] sm:$0xff] (!%p2383_p2), %v2091_v54  ;;  %2108 = vst [vmem:[%s3239_s8 + $0x50] sm:$0xff] (!%p2383_p2), %v2092_v6 }
 0x3bc   : > { %2012 = vmatpush1.bf16.msra.mxu0 %v1780_v39  ;;  %2043 = vmatpush1.bf16.msra.mxu1 %v1921_v47 }
 0x3bd   : > { %v1942_v16 = vpop.permute.xlu0 %1941  ;;  %2013 = vmatprep.subr.bf16.mxu0 %v1783_v63  ;;  %2044 = vmatprep.subr.bf16.mxu1 %v1964_v41  ;;  %v1798_v43 = vpop.permute.xlu1 %1797  ;;  %v2083_v63 = vld [vmem:[#allocation2 + $0x8] sm:$0xff] (!%p2383_p2)  ;;  %v2086_v41 = vld [vmem:[#allocation2 + $0x20] sm:$0xff] (!%p2383_p2) }
 0x3be   : > { %v1946_v14 = vsel %vm907_vm8, %v1930_v26, %v1942_v16  ;;  %v1950_v12 = vsel %vm907_vm8, %v1942_v16, %v1930_v26  ;;  %v1805_v32 = vsel %vm718_vm2, %v1786_v0, %v1798_v43  ;;  %v1809_v11 = vsel %vm718_vm2, %v1798_v43, %v1786_v0  ;;  %2099 = vst [vmem:[%s3239_s8 + $0x8] sm:$0xff] (!%p2383_p2), %v2083_v63  ;;  %v2087_v16 = vld [vmem:[#allocation2 + $0x28] sm:$0xff] (!%p2383_p2) }
 0x3bf   : > { %v1957_v34 = vmul.f32 %v4842_v48, %v1946_v14  ;;  %v1958_v38 = vmul.f32 %v4841_v15, %v1950_v12  ;;  %v1813_v37 = vmul.f32 %v1805_v32, %v3550_v59  ;;  %v1814_v26 = vmul.f32 %v1809_v11, %v3547_v58  ;;  %2102 = vst [vmem:[%s3239_s8 + $0x20] sm:$0xff] (!%p2383_p2), %v2086_v41  ;;  %v2096_v14 = vld [vmem:[#allocation2 + $0x70] sm:$0xff] (!%p2383_p2)  ;;  %v2097_v12 = vld [vmem:[#allocation2 + $0x78] sm:$0xff] (!%p2383_p2) }
 0x3c0   : > { %2014 = vmatpush1.bf16.msra.mxu0 %v1782_v22  ;;  %2045 = vmatpush1.bf16.msra.mxu1 %v1963_v13  ;;  %2103 = vst [vmem:[%s3239_s8 + $0x28] sm:$0xff] (!%p2383_p2), %v2087_v16  ;;  %v2090_v22 = vld [vmem:[#allocation2 + $0x40] sm:$0xff] (!%p2383_p2)  ;;  %2112 = vst [vmem:[%s3239_s8 + $0x70] sm:$0xff] (!%p2383_p2), %v2096_v14 }
 0x3c1   : > { %v1965_v5 = vpack.c.bf16 %v1957_v34, %v1955_v8  ;;  %v1800_v18 = vpop.permute.xlu0 %1799  ;;  %2378 = vmatprep.subr.msk.bf16.mxu0 %vm4581_vm11, %v2377_v35  ;;  %v1966_v49 = vpack.c.bf16 %v1958_v38, %v1956_v17  ;;  %v2584_v52 = vpop.permute.xlu1 %2583  ;;  %2106 = vst [vmem:[%s3239_s8 + $0x40] sm:$0xff] (!%p2383_p2), %v2090_v22  ;;  %v2094_v13 = vld [vmem:[#allocation2 + $0x60] sm:$0xff] (!%p2383_p2)  ;;  %v2095_v8 = vld [vmem:[#allocation2 + $0x68] sm:$0xff] (!%p2383_p2)  ;;  %2113 = vst [vmem:[%s3239_s8 + $0x78] sm:$0xff] (!%p2383_p2), %v2097_v12 }
 0x3c2   : > { %v1806_v9 = vsel %vm718_vm2, %v1788_v19, %v1800_v18  ;;  %v1810_v57 = vsel %vm718_vm2, %v1800_v18, %v1788_v19  ;;  %v2586_v60 = vunpack.i.h.bf16 %v2584_v52  ;;  %v2585_v30 = vunpack.i.l.bf16 %v2584_v52  ;;  %2110 = vst [vmem:[%s3239_s8 + $0x60] sm:$0xff] (!%p2383_p2), %v2094_v13  ;;  %2111 = vst [vmem:[%s3239_s8 + $0x68] sm:$0xff] (!%p2383_p2), %v2095_v8 }
 0x3c3   : > { %v1815_v10 = vmul.f32 %v1806_v9, %v3550_v59  ;;  %v1816_v33 = vmul.f32 %v1810_v57, %v3547_v58  ;;  %2046 = vmatprep.subr.bf16.mxu1 %v1966_v49  ;;  %v2372_v58 = vcombine.low %v4853_v45, %v4853_v45 }
 0x3c4   : > { %2381 = vmatpush1.bf16.msk.msra.mxu0 %vm4581_vm11, %v2377_v35  ;;  %2047 = vmatpush1.bf16.msra.mxu1 %v1965_v5  ;;  %v1961_v61 = vmul.f32 %v2586_v60, %v4842_v48  ;;  %v1962_v50 = vmul.f32 %v2586_v60, %v4841_v15  ;;  %v1959_v29 = vmul.f32 %v2585_v30, %v4842_v48  ;;  %v2093_v35 = vld [vmem:[#allocation2 + $0x58] sm:$0xff] (!%p2383_p2) }
 0x3c5   : > { %v1825_v56 = vpack.c.bf16 %v1815_v10, %v1813_v37  ;;  %v1960_v59 = vmul.f32 %v2585_v30, %v4841_v15  ;;  %v1826_v46 = vpack.c.bf16 %v1816_v33, %v1814_v26  ;;  %2109 = vst [vmem:[%s3239_s8 + $0x58] sm:$0xff] (!%p2383_p2), %v2093_v35 }
 0x3c6   : > { %v1967_v36 = vpack.c.bf16 %v1961_v61, %v1959_v29 }
 0x3c7   : > { %2017 = vmatprep.subr.bf16.mxu0 %v1826_v46  ;;  %v1968_v21 = vpack.c.bf16 %v1962_v50, %v1960_v59 }
 0x3c8   : > { %2018 = vmatpush1.bf16.msra.mxu0 %v1825_v56 }
 0x3c9   : > { %2048 = vmatprep.subr.bf16.mxu1 %v1968_v21 }
 0x3ca   : > { %2049 = vmatpush1.bf16.msra.mxu1 %v1967_v36 }
 0x3cb   : > { %2020 = vmatmul.mubr.bf16.vlgmr.msra.gmra.mrb[32].mxu0 %v2372_v58 }
 0x3cd   : > { %2061 = vmatmul.mubr.bf16.vlgmr.msra.gmra.mrb[32].mxu1 %v2374_v3 }
 0x49e   : > { %v2021_v55 = vpop.f32.mrb[32].mxu0 }
 0x49f   : > { %v2023_v40 = vpop.f32.mrb[33].mxu0 }
 0x4a0   : > { %v2062_v2 = vpop.f32.mrb[32].mxu1  ;;  %v2025_v15 = vpop.f32.mrb[34].mxu0 }
 0x4a1   : > { %v2063_v4 = vadd.f32 %v2062_v2, %v2021_v55  ;;  %v2064_v19 = vpop.f32.mrb[33].mxu1  ;;  %v2026_v0 = vpop.f32.mrb[35].mxu0 }
 0x4a2   : > { %v2065_v7 = vadd.f32 %v2064_v19, %v2023_v40  ;;  %v2066_v48 = vpop.f32.mrb[34].mxu1 }
 0x4a3   : > { %v2070_v20 = vmul.f32 1.442695, %v2063_v4  ;;  %v2067_v24 = vpop.f32.mrb[35].mxu1 }
 0x4a4   : > { %v2072_v1 = vmul.f32 1.442695, %v2065_v7 }
 0x4a5   : > { %2767 = vpow2.f32 %v2070_v20 }
 0x4a6   : > { %2769 = vpow2.f32 %v2072_v1 }
 0x4ac   : > { %2081 = sbr.rel (%p2383_p2) target bundleno = 1203 (0x4b3), region = 75 }
 0x4af   : > { %v2768_v39 = vpop.eup %2767 }
 0x4b0   : > { %v2770_v47 = vpop.eup %2769  ;;  %v2074_v31 = vsel %vm2069_vm12, %v2063_v4, %v2768_v39 }
 0x4b1   : > { %2076 = vst [vmem:[%s3237_s20] sm:$0xff] %v2074_v31  ;;  %v2075_v42 = vsel %vm2069_vm12, %v2065_v7, %v2770_v47 }
 0x4b2   : > { %2077 = vst [vmem:[%s3237_s20 + $0x8] sm:$0xff] %v2075_v42 }
 0x4b3 PF: > { %s2386_s10 = sshll.u32 %s2941_s28, 1  ;;  %s2387_s16 = sshll.u32 %s2937_s27, 2 }
 0x4b4   : > { %s2136_s24 = sshll.u32 %s3237_s20, 4  ;;  %s2132_s13 = sadd.s32 %s2387_s16, %s2386_s10  ;;  %s4635_s24 = int_to_ptr.vmem [resolvable:$true] %s2136_s24 }
 0x4b5   : > { %s2388_s14 = sshll.u32 %s2132_s13, 7  ;;  %s2394_s11 = sshll.u32 %s2941_s28, 8 }
 0x4b6   : > { %s4640_s26 = scalar_lea.hbm %s4747_s5, %s2388_s14  ;;  %s2115_s21 = scalar_lea.sflag [#allocation5], %s3201_s19 }
 0x4b7   : > { %s2799_s17 = scalar_lea.vmem %s4635_s24, 256  ;;  %p4855_p9 = scmp.ne.s32.totalorder %s4804_s6, 0 }
 0x4b8   : > { %p2800_p10 = scmp.ne.s32.totalorder %s4635_s24, %s2799_s17  ;;  %s2970_s27 = smov [#allocation7]  }
 0x4b9   : > { %s2803_s20 = sshll.u32 %s2970_s27, 4  ;;  %s2804_s20 = int_to_ptr.vmem [resolvable:$false] %s2803_s20 }
 0x4ba   : > { %p2801_p6 = pnand %p2800_p10, %p4855_p9  ;;  %s2805_s18 = scalar_lea.vmem %s2804_s20, 512 }
 0x4bb   : > { %p2806_p5 = scmp.lt.s32.totalorder %s4635_s24, %s2804_s20  ;;  %p2807_p8 = scmp.lt.s32.totalorder %s2805_s18, %s2799_s17 }
 0x4bc   : > { %p2802_p1 = pneg %p2801_p6 }
 0x4bd   : > { %p2808_p11 = por %p2807_p8, %p2806_p5 }
 0x4bf   : > { %p2809_p0 = pnand %p2808_p11, %p2802_p1 }
 0x4c1   : > { %2812 = shalt.err (!%p2809_p0)
}
 0x4c2   : > { %s2813_s19 = scalar_lea.hbm %s4640_s26, 256  ;;  %s2817_s13 = scalar_lea.hbm %s4747_s5, 4096 }
 0x4c3   : > { %p2814_p3 = scmp.ne.s32.totalorder %s4640_s26, %s2813_s19  ;;  %p2818_p13 = scmp.lt.u32.totalorder %s4640_s26, %s4747_s5 }
 0x4c4   : > { %p2819_p4 = scmp.lt.u32.totalorder %s2817_s13, %s2813_s19  ;;  %p2821_p10 = scmp.lt.u32.totalorder %s2813_s19, %s4640_s26 }
 0x4c5   : > { %p2815_p7 = pnand %p2814_p3, %p4855_p9 }
 0x4c6   : > { %p2820_p2 = por %p2819_p4, %p2818_p13 }
 0x4c7   : > { %p2816_p12 = pneg %p2815_p7 }
 0x4c8   : > { %p2822_p6 = por %p2821_p10, %p2820_p2 }
 0x4ca   : > { %p2823_p1 = pnand %p2822_p6, %p2816_p12 }
 0x4cc   : > { %2826 = shalt.err (!%p2823_p1)
}
 0x4cd   : > { %s4856_s9 = sld [smem:[#allocation20_spill]]  ;;  %s2149_s10 = sshll.u32 %s3239_s8, 4  ;;  %s4673_s10 = int_to_ptr.vmem [resolvable:$true] %s2149_s10 }
 0x4ce   : > { %2431 = dma.vmem_to_hbm [thread:$0]  (%p4855_p9), %s4635_s24, 256, %s4640_s26, %s2115_s21  }
 0x4cf   : > { %s4857_s20 = sld [smem:[#allocation39_spill]]  ;;  %s4858_s19 = sand.u32 1, %s2917_s22  }
 0x4d0   : > { %s4677_s6 = scalar_lea.sflag [#allocation9], %s4858_s19  ;;  %s2827_s16 = scalar_lea.vmem %s4673_s10, 2048 }
 0x4d1   : > { %p2828_p5 = scmp.ne.s32.totalorder %s4673_s10, %s2827_s16  ;;  %s2971_s28 = smov [#allocation8]  }
 0x4d2   : > { %s2831_s24 = sshll.u32 %s2971_s28, 4  ;;  %s2832_s24 = int_to_ptr.vmem [resolvable:$false] %s2831_s24 }
 0x4d3   : > { %p4859_p8 = scmp.ne.s32.totalorder %s4856_s9, 0  ;;  %s2833_s26 = scalar_lea.vmem %s2832_s24, 4096 }
 0x4d4   : > { %p2834_p0 = scmp.lt.s32.totalorder %s4673_s10, %s2832_s24  ;;  %p2835_p3 = scmp.lt.s32.totalorder %s2833_s26, %s2827_s16 }
 0x4d5   : > { %s4670_s18 = scalar_lea.hbm %s4857_s20, %s2394_s11  ;;  %p2829_p11 = pnand %p2828_p5, %p4859_p8 }
 0x4d6   : > { %p2836_p7 = por %p2835_p3, %p2834_p0 }
 0x4d7   : > { %p2830_p9 = pneg %p2829_p11 }
 0x4d9   : > { %p2837_p12 = pnand %p2836_p7, %p2830_p9 }
 0x4db   : > { %2840 = shalt.err (!%p2837_p12)
}
 0x4dc   : > { %s2841_s8 = scalar_lea.hbm %s4670_s18, 2048  ;;  %s2845_s13 = scalar_lea.hbm %s4857_s20, 4096 }
 0x4dd   : > { %p2842_p13 = scmp.ne.s32.totalorder %s4670_s18, %s2841_s8  ;;  %p2846_p10 = scmp.lt.u32.totalorder %s4670_s18, %s4857_s20 }
 0x4de   : > { %p2847_p6 = scmp.lt.u32.totalorder %s2845_s13, %s2841_s8  ;;  %p2849_p5 = scmp.lt.u32.totalorder %s2841_s8, %s4670_s18 }
 0x4df   : > { %p2843_p4 = pnand %p2842_p13, %p4859_p8 }
 0x4e0   : > { %p2848_p1 = por %p2847_p6, %p2846_p10 }
 0x4e1   : > { %p2844_p2 = pneg %p2843_p4 }
 0x4e2   : > { %p2850_p11 = por %p2849_p5, %p2848_p1 }
 0x4e4   : > { %p2851_p9 = pnand %p2850_p11, %p2844_p2 }
 0x4e6   : > { %2854 = shalt.err (!%p2851_p9)
}
 0x4e7   : > { %s2972_s17 = smov 256   ;;  %s2973_s27 = smov 512  }
 0x4e8   : > { %2432 = dma.vmem_to_hbm [thread:$0]  (%p4859_p8), %s4673_s10, 2048, %s4670_s18, %s4677_s6, %s2972_s17, %s2973_s27, %s2960_s15  }
 0x4e9 PF: > { %s4860_s19 = sld [smem:[#allocation14_spill]]  ;;  %s4861_s16 = sld [smem:[#allocation21_spill]] }
 0x4ea   : > { %p2442_p0 = scmp.ge.s32.totalorder %s2953_s7, 2 }
 0x4ef   : > { %s2164_s28 = sand.u32 1, %s4860_s19   ;;  %p4862_p3 = scmp.ne.s32.totalorder %s4861_s16, 0 }
 0x4f0   : > { %s2165_s24 = scalar_lea.sflag [#allocation5], %s2164_s28 }
 0x4f1   : > { %p2436_p7 = pnand %p2442_p0, %p4862_p3 }
 0x4f3   : > { %2904 = dma.done.wait (!%p2436_p7), %s2165_s24, 256  }
 0x4f4   : > { %2906 = vsyncadd (!%p2436_p7), %s2165_s24, 4294967040  ;;  %s4863_s26 = sld [smem:[#allocation13_spill]]  ;;  %s4864_s8 = sld [smem:[#allocation22_spill]] }
 0x4fa   : > { %s2173_s11 = sand.u32 1, %s4863_s26   ;;  %p4865_p12 = scmp.ne.s32.totalorder %s4864_s8, 0 }
 0x4fb   : > { %s2174_s21 = scalar_lea.sflag [#allocation9], %s2173_s11 }
 0x4fc   : > { %p2439_p13 = pnand %p2442_p0, %p4865_p12 }
 0x4fe   : > { %2908 = dma.done.wait (!%p2439_p13), %s2174_s21, 2048  }
 0x4ff   : > { %2910 = vsyncadd (!%p2439_p13), %s2174_s21, 4294965248  ;;  %s26_s7 = sadd.s32 1, %s2953_s7   ;;  %s4866_s15 = sld [smem:[#allocation18_spill]] }
 0x500   : > { %p23_p8 = scmp.ge.s32.totalorder %s26_s7, 18   ;;  %s4867_s9 = sld [smem:[#allocation15_spill]] }
 0x501   : > { %s4868_s26 = sld [smem:[#allocation19_spill]]  ;;  %s4869_s18 = sld [smem:[#allocation16_spill]] }
 0x502   : > { %s4870_s10 = sld [smem:[#allocation17_spill]]  ;;  %s4871_s21 = smov %s2917_s22 }
 0x503   : > { %s4872_s22 = smov %s2921_s23  ;;  %s4874_s24 = smov %s2929_s25 }
 0x504   : > { %s4876_s27 = smov %s2945_s29  ;;  %s4877_s28 = smov %s2949_s30 }
 0x505   : > { %s4873_s23 = smov %s4866_s15  ;;  %25 = sbr.rel (!%p23_p8) target bundleno = 13 (0xd), region = 141 }
 0x506   : > { %s4875_s25 = smov %s4867_s9 }
 0x507   : > { %s4878_s29 = smov %s4869_s18 }
 0x508   : > { %s4879_s30 = smov %s4870_s10 }
 0x50c   :  { %2179 = vsyncpa [#allocation4], 1 }
 0x50d   :  { %2181 = vsyncpa [#allocation4 + $0x1], 1 }
 0x50e   :  { %2182 = vsyncpa [#allocation5], 1 }
 0x50f   :  { %2184 = vsyncpa [#allocation5 + $0x1], 1 }
 0x510   :  { %2185 = vsyncpa [#allocation9], 1 }
 0x511   :  { %2187 = vsyncpa [#allocation9 + $0x1], 1 }

</bundles_post_ra>
